<compile_context>
chip_gen: v7x
topology: tpu7x:2x2x1
jax: 0.10.0
libtpu: 0.0.40
codegen_flags: <defaults>
</compile_context>

<pallas_src>
import functools
import math

import jax
import jax.numpy as jnp
from jax.experimental import pallas as pl
from jax.experimental.pallas import tpu as pltpu


# ----------------------------- Pallas kernel --------------------------------
def bbconv_fused_kernel(x_ref, w1_ref, b1_ref, w2_ref, b2_ref, o_ref, mid_ref,
                        *, stride, tr, W1, n_row_tiles):
    """One (batch, row-tile) grid step.

    x_ref  : (Cin, Hpp, Wp)       padded CHW input (whole image, batch-squeezed)
    w1_ref : (9, Cmid, Cin)       per-tap conv1 weights (weights-as-LHS)
    b1_ref : (Cmid, 1)
    w2_ref : (9, Cout, Cmid)      per-tap conv2 weights
    b2_ref : (Cout, 1)
    o_ref  : (Cout, tr*W1)        lane-dense NCHW-flattened output rows
    mid_ref: (Cmid, tr+2, W1+2)   f32 scratch: conv1 rows (+halo) for this tile
    """
    cin = x_ref.shape[0]
    cmid = mid_ref.shape[0]
    cout = o_ref.shape[0]
    r = pl.program_id(1)

    # Row offset of this tile inside the (extra-padded) input.  conv1 is
    # recomputed for tr+2 output rows (one halo row above/below) so conv2's
    # row halo is real conv1 data, not stale scratch state.
    r0 = pl.multiple_of(r * (tr * stride), tr * stride)

    hw1 = (tr + 2) * W1
    hw2 = tr * W1
    mm_dtype = w1_ref.dtype          # f32 (exact) or bf16 (production)

    # ---- conv1: 9-tap accumulation, weights-LHS, spatial in lanes -----------
    acc1 = jnp.zeros((cmid, hw1), jnp.float32)
    for kh in range(3):
        for kw in range(3):
            if stride == 1:
                x_tap = x_ref[:, pl.ds(r0 + kh, tr + 2), kw:kw + W1]
            else:  # strided ref-level slices (not exercised by the demo)
                x_tap = x_ref[:, pl.ds(r0 + kh, tr + 2, stride),
                              pl.ds(kw, W1, stride)]
            acc1 += jnp.dot(w1_ref[3 * kh + kw],
                            x_tap.reshape(cin, hw1).astype(mm_dtype),
                            preferred_element_type=jnp.float32)
    mid = acc1 + b1_ref[...]                              # (Cmid, (tr+2)*W1)
    mid_ref[:, :, 1:W1 + 1] = mid.reshape(cmid, tr + 2, W1)

    # conv2 zero-padding halo, refreshed every step (megacore-safe):
    mid_ref[:, :, 0:1] = jnp.zeros((cmid, tr + 2, 1), jnp.float32)
    mid_ref[:, :, W1 + 1:W1 + 2] = jnp.zeros((cmid, tr + 2, 1), jnp.float32)

    @pl.when(r == 0)
    def _():                                              # top image border
        mid_ref[:, 0:1, :] = jnp.zeros((cmid, 1, W1 + 2), jnp.float32)

    @pl.when(r == n_row_tiles - 1)
    def _():                                              # bottom image border
        mid_ref[:, tr + 1:tr + 2, :] = jnp.zeros((cmid, 1, W1 + 2), jnp.float32)

    # ---- conv2 (stride 1) + bias + sigmoid, still lane-dense, no transpose --
    acc2 = jnp.zeros((cout, hw2), jnp.float32)
    for kh in range(3):
        for kw in range(3):
            m_tap = mid_ref[:, kh:kh + tr, kw:kw + W1]
            acc2 += jnp.dot(w2_ref[3 * kh + kw],
                            m_tap.reshape(cmid, hw2).astype(mm_dtype),
                            preferred_element_type=jnp.float32)
    o_ref[...] = jax.nn.sigmoid(acc2 + b2_ref[...]).astype(o_ref.dtype)


# ------------------------------ JAX wrapper ----------------------------------
def _pick_row_tile(H1, W1):
    """Smallest row tile that keeps the per-tile output lane-dense (>=128),
    so we get >=2 grid steps per image (dual-TC occupancy on v7x, deeper
    BlockSpec pipeline) without masked stores."""
    for n_tiles in (8, 4, 2):
        if H1 % n_tiles == 0 and (H1 // n_tiles) * W1 >= 128:
            return H1 // n_tiles
    return H1


def bbconv_forward(x_nchw, params, stride, *, compute_dtype=jnp.float32,
                   row_tile=None):
    """BBConv.forward: sigmoid(conv2(conv1(x))).  NCHW in, NCHW out.

    compute_dtype: dtype of the matmul operands (accumulation is always f32).
    Pass jnp.bfloat16 at production channel counts; the demo keeps f32 so the
    result matches the f32 reference to 1e-5.
    """
    N, Cin, H, W = x_nchw.shape
    Cmid = params["w1"].shape[0]
    Cout = params["w2"].shape[0]
    H1 = (H + 2 - 3) // stride + 1
    W1 = (W + 2 - 3) // stride + 1

    TR = row_tile if row_tile is not None else _pick_row_tile(H1, W1)
    assert H1 % TR == 0, (H1, TR)
    R = H1 // TR

    # Pad H by (1 + stride) per side (conv1's pad=1 plus one extra conv1 output
    # row of headroom so halo rows can be recomputed without branching; the
    # invalid halo rows are overwritten with zeros in-kernel), W by 1 per side.
    Hpp, Wp = H + 2 + 2 * stride, W + 2
    xp = jnp.pad(x_nchw, ((0, 0), (0, 0),
                          (1 + stride, 1 + stride), (1, 1)))

    # OIHW -> (kh*3+kw, Cout, Cin): per-tap, weights-as-LHS.
    w1_t = jnp.transpose(params["w1"], (2, 3, 0, 1)).reshape(9, Cmid, Cin)
    w2_t = jnp.transpose(params["w2"], (2, 3, 0, 1)).reshape(9, Cout, Cmid)
    w1_t = w1_t.astype(compute_dtype)
    w2_t = w2_t.astype(compute_dtype)
    b1_c = params["b1"].reshape(Cmid, 1).astype(jnp.float32)
    b2_c = params["b2"].reshape(Cout, 1).astype(jnp.float32)

    cost = pl.CostEstimate(
        flops=2 * N * H1 * W1 * 9 * (Cin * Cmid + Cmid * Cout),
        transcendentals=N * H1 * W1 * Cout,
        bytes_accessed=4 * (xp.size + w1_t.size + w2_t.size + b1_c.size
                            + b2_c.size + N * Cout * H1 * W1),
    )

    out = pl.pallas_call(
        functools.partial(bbconv_fused_kernel, stride=stride, tr=TR, W1=W1,
                          n_row_tiles=R),
        out_shape=jax.ShapeDtypeStruct((N, Cout, H1 * W1), x_nchw.dtype),
        grid=(N, R),
        in_specs=[
            # whole padded image per batch element (resident across row tiles)
            pl.BlockSpec((None, Cin, Hpp, Wp), lambda n, r: (n, 0, 0, 0)),
            # grid-invariant weights / biases (stay resident, no re-DMA)
            pl.BlockSpec((9, Cmid, Cin), lambda n, r: (0, 0, 0)),
            pl.BlockSpec((Cmid, 1), lambda n, r: (0, 0)),
            pl.BlockSpec((9, Cout, Cmid), lambda n, r: (0, 0, 0)),
            pl.BlockSpec((Cout, 1), lambda n, r: (0, 0)),
        ],
        out_specs=pl.BlockSpec((None, Cout, TR * W1), lambda n, r: (n, 0, r)),
        scratch_shapes=[pltpu.VMEM((Cmid, TR + 2, W1 + 2), jnp.float32)],
        compiler_params=pltpu.CompilerParams(
            dimension_semantics=("parallel", "parallel"),
            vmem_limit_bytes=16 * 1024 * 1024),
        cost_estimate=cost,
    )(xp, w1_t, b1_c, w2_t, b2_c)

    # Kernel wrote channel-major, lane-dense NCHW blocks -> reshape only.
    return out.reshape(N, Cout, H1, W1)


# -------------------------- parameter initialization -------------------------
def init_bbconv_params(key, in_channels, out_channels):
    """Deterministic init mirroring nn.Conv2d default (uniform +-1/sqrt(fan_in))."""
    k1, k2, k3, k4 = jax.random.split(key, 4)
    bnd1 = 1.0 / math.sqrt(in_channels * 9)
    bnd2 = 1.0 / math.sqrt(out_channels * 9)
    return {
        "w1": jax.random.uniform(k1, (out_channels, in_channels, 3, 3),
                                 jnp.float32, -bnd1, bnd1),
        "b1": jax.random.uniform(k2, (out_channels,), jnp.float32, -bnd1, bnd1),
        "w2": jax.random.uniform(k3, (out_channels, out_channels, 3, 3),
                                 jnp.float32, -bnd2, bnd2),
        "b2": jax.random.uniform(k4, (out_channels,), jnp.float32, -bnd2, bnd2),
    }


# ------------------------------ reference ------------------------------------
def bbconv_reference(x_nchw, params, stride):
    dn = ("NCHW", "OIHW", "NCHW")
    y = jax.lax.conv_general_dilated(
        x_nchw, params["w1"], (stride, stride), ((1, 1), (1, 1)),
        dimension_numbers=dn) + params["b1"][None, :, None, None]
    y = jax.lax.conv_general_dilated(
        y, params["w2"], (1, 1), ((1, 1), (1, 1)),
        dimension_numbers=dn) + params["b2"][None, :, None, None]
    return jax.nn.sigmoid(y)


if __name__ == "__main__":
    key = jax.random.PRNGKey(0)
    k_x, k_p = jax.random.split(key)

    N, Cin, H, W = 2, 4, 16, 16
    Cout = 8
    stride = 1  # pool_ratio is unused by the PyTorch forward; demo stride = 1

    x = jax.random.normal(k_x, (N, Cin, H, W), jnp.float32)
    params = init_bbconv_params(k_p, Cin, Cout)

    out = bbconv_forward(x, params, stride)   # f32 compute: exact vs reference
    out = jax.block_until_ready(out)

    ref = bbconv_reference(x, params, stride)
    assert out.shape == ref.shape, (out.shape, ref.shape)
    assert jnp.allclose(out, ref, rtol=1e-5, atol=1e-5), "mismatch vs reference"

    print("KERNEL_OK")
</pallas_src>

<mosaic_0001>
module attributes {stable_mosaic.version = 11 : i64} {
  func.func @bbconv_fused_kernel(%arg0: i32, %arg1: i32, %arg2: memref<1x4x20x18xf32, #tpu.memory_space<vmem>>, %arg3: memref<9x8x4xf32, #tpu.memory_space<vmem>>, %arg4: memref<8x1xf32, #tpu.memory_space<vmem>>, %arg5: memref<9x8x8xf32, #tpu.memory_space<vmem>>, %arg6: memref<8x1xf32, #tpu.memory_space<vmem>>, %arg7: memref<1x8x128xf32, #tpu.memory_space<vmem>>, %arg8: memref<8x10x18xf32, #tpu.memory_space<vmem>>) attributes {dimension_semantics = [#tpu.dimension_semantics<parallel>, #tpu.dimension_semantics<parallel>], iteration_bounds = array<i64: 2, 2>, scalar_prefetch = 0 : i64, scratch_operands = 1 : i64, tpu.core_type = #tpu.core_type<tc>, window_params = [{transform_indices = @transform_0, window_bounds = array<i64: 1, 4, 20, 18>}, {pipeline_mode = #tpu.pipeline_mode<synchronous>, transform_indices = @transform_1, window_bounds = array<i64: 9, 8, 4>}, {pipeline_mode = #tpu.pipeline_mode<synchronous>, transform_indices = @transform_2, window_bounds = array<i64: 8, 1>}, {pipeline_mode = #tpu.pipeline_mode<synchronous>, transform_indices = @transform_3, window_bounds = array<i64: 9, 8, 8>}, {pipeline_mode = #tpu.pipeline_mode<synchronous>, transform_indices = @transform_4, window_bounds = array<i64: 8, 1>}, {transform_indices = @transform_5, window_bounds = array<i64: 1, 8, 128>}]} {
    %c8_i32 = arith.constant 8 : i32
    %0 = arith.muli %arg1, %c8_i32 : i32
    %1 = tpu.assume_multiple %0, 8 : i32
    %cst = arith.constant 0.000000e+00 : f32
    %2 = vector.broadcast %cst : f32 to vector<8x160xf32>
    %c0_i32 = arith.constant 0 : i32
    %3 = arith.addi %1, %c0_i32 : i32
    %c0 = arith.constant 0 : index
    %c0_0 = arith.constant 0 : index
    %4 = arith.index_cast %3 : i32 to index
    %c0_1 = arith.constant 0 : index
    %5 = vector.load %arg2[%c0, %c0_0, %4, %c0_1] : memref<1x4x20x18xf32, #tpu.memory_space<vmem>>, vector<1x4x10x16xf32>
    %6 = vector.shape_cast %5 : vector<1x4x10x16xf32> to vector<4x10x16xf32>
    %c0_2 = arith.constant 0 : index
    %c0_3 = arith.constant 0 : index
    %c0_4 = arith.constant 0 : index
    %7 = vector.load %arg3[%c0_2, %c0_3, %c0_4] : memref<9x8x4xf32, #tpu.memory_space<vmem>>, vector<1x8x4xf32>
    %8 = vector.shape_cast %7 : vector<1x8x4xf32> to vector<8x4xf32>
    %9 = vector.shape_cast %6 : vector<4x10x16xf32> to vector<4x160xf32>
    %cst_5 = arith.constant dense<0.000000e+00> : vector<8x160xf32>
    %10 = tpu.matmul %8, %9, %cst_5 {dimension_numbers = #tpu.dot_dimension_numbers<[1], [0], [0], [1], [0, 0, 1, 1], [], []>} : vector<8x4xf32>, vector<4x160xf32>, vector<8x160xf32> -> vector<8x160xf32>
    %11 = arith.addf %2, %10 : vector<8x160xf32>
    %c0_i32_6 = arith.constant 0 : i32
    %12 = arith.addi %1, %c0_i32_6 : i32
    %c0_7 = arith.constant 0 : index
    %c0_8 = arith.constant 0 : index
    %13 = arith.index_cast %12 : i32 to index
    %c1 = arith.constant 1 : index
    %14 = vector.load %arg2[%c0_7, %c0_8, %13, %c1] : memref<1x4x20x18xf32, #tpu.memory_space<vmem>>, vector<1x4x10x16xf32>
    %15 = vector.shape_cast %14 : vector<1x4x10x16xf32> to vector<4x10x16xf32>
    %c1_9 = arith.constant 1 : index
    %c0_10 = arith.constant 0 : index
    %c0_11 = arith.constant 0 : index
    %16 = vector.load %arg3[%c1_9, %c0_10, %c0_11] : memref<9x8x4xf32, #tpu.memory_space<vmem>>, vector<1x8x4xf32>
    %17 = vector.shape_cast %16 : vector<1x8x4xf32> to vector<8x4xf32>
    %18 = vector.shape_cast %15 : vector<4x10x16xf32> to vector<4x160xf32>
    %cst_12 = arith.constant dense<0.000000e+00> : vector<8x160xf32>
    %19 = tpu.matmul %17, %18, %cst_12 {dimension_numbers = #tpu.dot_dimension_numbers<[1], [0], [0], [1], [0, 0, 1, 1], [], []>} : vector<8x4xf32>, vector<4x160xf32>, vector<8x160xf32> -> vector<8x160xf32>
    %20 = arith.addf %11, %19 : vector<8x160xf32>
    %c0_i32_13 = arith.constant 0 : i32
    %21 = arith.addi %1, %c0_i32_13 : i32
    %c0_14 = arith.constant 0 : index
    %c0_15 = arith.constant 0 : index
    %22 = arith.index_cast %21 : i32 to index
    %c2 = arith.constant 2 : index
    %23 = vector.load %arg2[%c0_14, %c0_15, %22, %c2] : memref<1x4x20x18xf32, #tpu.memory_space<vmem>>, vector<1x4x10x16xf32>
    %24 = vector.shape_cast %23 : vector<1x4x10x16xf32> to vector<4x10x16xf32>
    %c2_16 = arith.constant 2 : index
    %c0_17 = arith.constant 0 : index
    %c0_18 = arith.constant 0 : index
    %25 = vector.load %arg3[%c2_16, %c0_17, %c0_18] : memref<9x8x4xf32, #tpu.memory_space<vmem>>, vector<1x8x4xf32>
    %26 = vector.shape_cast %25 : vector<1x8x4xf32> to vector<8x4xf32>
    %27 = vector.shape_cast %24 : vector<4x10x16xf32> to vector<4x160xf32>
    %cst_19 = arith.constant dense<0.000000e+00> : vector<8x160xf32>
    %28 = tpu.matmul %26, %27, %cst_19 {dimension_numbers = #tpu.dot_dimension_numbers<[1], [0], [0], [1], [0, 0, 1, 1], [], []>} : vector<8x4xf32>, vector<4x160xf32>, vector<8x160xf32> -> vector<8x160xf32>
    %29 = arith.addf %20, %28 : vector<8x160xf32>
    %c1_i32 = arith.constant 1 : i32
    %30 = arith.addi %1, %c1_i32 : i32
    %c0_20 = arith.constant 0 : index
    %c0_21 = arith.constant 0 : index
    %31 = arith.index_cast %30 : i32 to index
    %c0_22 = arith.constant 0 : index
    %32 = vector.load %arg2[%c0_20, %c0_21, %31, %c0_22] : memref<1x4x20x18xf32, #tpu.memory_space<vmem>>, vector<1x4x10x16xf32>
    %33 = vector.shape_cast %32 : vector<1x4x10x16xf32> to vector<4x10x16xf32>
    %c3 = arith.constant 3 : index
    %c0_23 = arith.constant 0 : index
    %c0_24 = arith.constant 0 : index
    %34 = vector.load %arg3[%c3, %c0_23, %c0_24] : memref<9x8x4xf32, #tpu.memory_space<vmem>>, vector<1x8x4xf32>
    %35 = vector.shape_cast %34 : vector<1x8x4xf32> to vector<8x4xf32>
    %36 = vector.shape_cast %33 : vector<4x10x16xf32> to vector<4x160xf32>
    %cst_25 = arith.constant dense<0.000000e+00> : vector<8x160xf32>
    %37 = tpu.matmul %35, %36, %cst_25 {dimension_numbers = #tpu.dot_dimension_numbers<[1], [0], [0], [1], [0, 0, 1, 1], [], []>} : vector<8x4xf32>, vector<4x160xf32>, vector<8x160xf32> -> vector<8x160xf32>
    %38 = arith.addf %29, %37 : vector<8x160xf32>
    %c1_i32_26 = arith.constant 1 : i32
    %39 = arith.addi %1, %c1_i32_26 : i32
    %c0_27 = arith.constant 0 : index
    %c0_28 = arith.constant 0 : index
    %40 = arith.index_cast %39 : i32 to index
    %c1_29 = arith.constant 1 : index
    %41 = vector.load %arg2[%c0_27, %c0_28, %40, %c1_29] : memref<1x4x20x18xf32, #tpu.memory_space<vmem>>, vector<1x4x10x16xf32>
    %42 = vector.shape_cast %41 : vector<1x4x10x16xf32> to vector<4x10x16xf32>
    %c4 = arith.constant 4 : index
    %c0_30 = arith.constant 0 : index
    %c0_31 = arith.constant 0 : index
    %43 = vector.load %arg3[%c4, %c0_30, %c0_31] : memref<9x8x4xf32, #tpu.memory_space<vmem>>, vector<1x8x4xf32>
    %44 = vector.shape_cast %43 : vector<1x8x4xf32> to vector<8x4xf32>
    %45 = vector.shape_cast %42 : vector<4x10x16xf32> to vector<4x160xf32>
    %cst_32 = arith.constant dense<0.000000e+00> : vector<8x160xf32>
    %46 = tpu.matmul %44, %45, %cst_32 {dimension_numbers = #tpu.dot_dimension_numbers<[1], [0], [0], [1], [0, 0, 1, 1], [], []>} : vector<8x4xf32>, vector<4x160xf32>, vector<8x160xf32> -> vector<8x160xf32>
    %47 = arith.addf %38, %46 : vector<8x160xf32>
    %c1_i32_33 = arith.constant 1 : i32
    %48 = arith.addi %1, %c1_i32_33 : i32
    %c0_34 = arith.constant 0 : index
    %c0_35 = arith.constant 0 : index
    %49 = arith.index_cast %48 : i32 to index
    %c2_36 = arith.constant 2 : index
    %50 = vector.load %arg2[%c0_34, %c0_35, %49, %c2_36] : memref<1x4x20x18xf32, #tpu.memory_space<vmem>>, vector<1x4x10x16xf32>
    %51 = vector.shape_cast %50 : vector<1x4x10x16xf32> to vector<4x10x16xf32>
    %c5 = arith.constant 5 : index
    %c0_37 = arith.constant 0 : index
    %c0_38 = arith.constant 0 : index
    %52 = vector.load %arg3[%c5, %c0_37, %c0_38] : memref<9x8x4xf32, #tpu.memory_space<vmem>>, vector<1x8x4xf32>
    %53 = vector.shape_cast %52 : vector<1x8x4xf32> to vector<8x4xf32>
    %54 = vector.shape_cast %51 : vector<4x10x16xf32> to vector<4x160xf32>
    %cst_39 = arith.constant dense<0.000000e+00> : vector<8x160xf32>
    %55 = tpu.matmul %53, %54, %cst_39 {dimension_numbers = #tpu.dot_dimension_numbers<[1], [0], [0], [1], [0, 0, 1, 1], [], []>} : vector<8x4xf32>, vector<4x160xf32>, vector<8x160xf32> -> vector<8x160xf32>
    %56 = arith.addf %47, %55 : vector<8x160xf32>
    %c2_i32 = arith.constant 2 : i32
    %57 = arith.addi %1, %c2_i32 : i32
    %c0_40 = arith.constant 0 : index
    %c0_41 = arith.constant 0 : index
    %58 = arith.index_cast %57 : i32 to index
    %c0_42 = arith.constant 0 : index
    %59 = vector.load %arg2[%c0_40, %c0_41, %58, %c0_42] : memref<1x4x20x18xf32, #tpu.memory_space<vmem>>, vector<1x4x10x16xf32>
    %60 = vector.shape_cast %59 : vector<1x4x10x16xf32> to vector<4x10x16xf32>
    %c6 = arith.constant 6 : index
    %c0_43 = arith.constant 0 : index
    %c0_44 = arith.constant 0 : index
    %61 = vector.load %arg3[%c6, %c0_43, %c0_44] : memref<9x8x4xf32, #tpu.memory_space<vmem>>, vector<1x8x4xf32>
    %62 = vector.shape_cast %61 : vector<1x8x4xf32> to vector<8x4xf32>
    %63 = vector.shape_cast %60 : vector<4x10x16xf32> to vector<4x160xf32>
    %cst_45 = arith.constant dense<0.000000e+00> : vector<8x160xf32>
    %64 = tpu.matmul %62, %63, %cst_45 {dimension_numbers = #tpu.dot_dimension_numbers<[1], [0], [0], [1], [0, 0, 1, 1], [], []>} : vector<8x4xf32>, vector<4x160xf32>, vector<8x160xf32> -> vector<8x160xf32>
    %65 = arith.addf %56, %64 : vector<8x160xf32>
    %c2_i32_46 = arith.constant 2 : i32
    %66 = arith.addi %1, %c2_i32_46 : i32
    %c0_47 = arith.constant 0 : index
    %c0_48 = arith.constant 0 : index
    %67 = arith.index_cast %66 : i32 to index
    %c1_49 = arith.constant 1 : index
    %68 = vector.load %arg2[%c0_47, %c0_48, %67, %c1_49] : memref<1x4x20x18xf32, #tpu.memory_space<vmem>>, vector<1x4x10x16xf32>
    %69 = vector.shape_cast %68 : vector<1x4x10x16xf32> to vector<4x10x16xf32>
    %c7 = arith.constant 7 : index
    %c0_50 = arith.constant 0 : index
    %c0_51 = arith.constant 0 : index
    %70 = vector.load %arg3[%c7, %c0_50, %c0_51] : memref<9x8x4xf32, #tpu.memory_space<vmem>>, vector<1x8x4xf32>
    %71 = vector.shape_cast %70 : vector<1x8x4xf32> to vector<8x4xf32>
    %72 = vector.shape_cast %69 : vector<4x10x16xf32> to vector<4x160xf32>
    %cst_52 = arith.constant dense<0.000000e+00> : vector<8x160xf32>
    %73 = tpu.matmul %71, %72, %cst_52 {dimension_numbers = #tpu.dot_dimension_numbers<[1], [0], [0], [1], [0, 0, 1, 1], [], []>} : vector<8x4xf32>, vector<4x160xf32>, vector<8x160xf32> -> vector<8x160xf32>
    %74 = arith.addf %65, %73 : vector<8x160xf32>
    %c2_i32_53 = arith.constant 2 : i32
    %75 = arith.addi %1, %c2_i32_53 : i32
    %c0_54 = arith.constant 0 : index
    %c0_55 = arith.constant 0 : index
    %76 = arith.index_cast %75 : i32 to index
    %c2_56 = arith.constant 2 : index
    %77 = vector.load %arg2[%c0_54, %c0_55, %76, %c2_56] : memref<1x4x20x18xf32, #tpu.memory_space<vmem>>, vector<1x4x10x16xf32>
    %78 = vector.shape_cast %77 : vector<1x4x10x16xf32> to vector<4x10x16xf32>
    %c8 = arith.constant 8 : index
    %c0_57 = arith.constant 0 : index
    %c0_58 = arith.constant 0 : index
    %79 = vector.load %arg3[%c8, %c0_57, %c0_58] : memref<9x8x4xf32, #tpu.memory_space<vmem>>, vector<1x8x4xf32>
    %80 = vector.shape_cast %79 : vector<1x8x4xf32> to vector<8x4xf32>
    %81 = vector.shape_cast %78 : vector<4x10x16xf32> to vector<4x160xf32>
    %cst_59 = arith.constant dense<0.000000e+00> : vector<8x160xf32>
    %82 = tpu.matmul %80, %81, %cst_59 {dimension_numbers = #tpu.dot_dimension_numbers<[1], [0], [0], [1], [0, 0, 1, 1], [], []>} : vector<8x4xf32>, vector<4x160xf32>, vector<8x160xf32> -> vector<8x160xf32>
    %83 = arith.addf %74, %82 : vector<8x160xf32>
    %c0_60 = arith.constant 0 : index
    %c0_61 = arith.constant 0 : index
    %84 = vector.load %arg4[%c0_60, %c0_61] : memref<8x1xf32, #tpu.memory_space<vmem>>, vector<8x1xf32>
    %85 = vector.broadcast %84 : vector<8x1xf32> to vector<8x160xf32>
    %86 = arith.addf %83, %85 : vector<8x160xf32>
    %87 = vector.shape_cast %86 : vector<8x160xf32> to vector<8x10x16xf32>
    %c0_62 = arith.constant 0 : index
    %c0_63 = arith.constant 0 : index
    %c1_64 = arith.constant 1 : index
    %88 = vector.load %arg8[%c0_62, %c0_63, %c1_64] : memref<8x10x18xf32, #tpu.memory_space<vmem>>, vector<8x10x16xf32>
    tpu.vector_store %arg8[%c0_62, %c0_63, %c1_64], %87 {strides = array<i32>} : memref<8x10x18xf32, #tpu.memory_space<vmem>>, vector<8x10x16xf32>,
    %cst_65 = arith.constant 0.000000e+00 : f32
    %89 = vector.broadcast %cst_65 : f32 to vector<8x10x1xf32>
    %c0_66 = arith.constant 0 : index
    %c0_67 = arith.constant 0 : index
    %c0_68 = arith.constant 0 : index
    %90 = vector.load %arg8[%c0_66, %c0_67, %c0_68] : memref<8x10x18xf32, #tpu.memory_space<vmem>>, vector<8x10x1xf32>
    tpu.vector_store %arg8[%c0_66, %c0_67, %c0_68], %89 {strides = array<i32>} : memref<8x10x18xf32, #tpu.memory_space<vmem>>, vector<8x10x1xf32>,
    %cst_69 = arith.constant 0.000000e+00 : f32
    %91 = vector.broadcast %cst_69 : f32 to vector<8x10x1xf32>
    %c0_70 = arith.constant 0 : index
    %c0_71 = arith.constant 0 : index
    %c17 = arith.constant 17 : index
    %92 = vector.load %arg8[%c0_70, %c0_71, %c17] : memref<8x10x18xf32, #tpu.memory_space<vmem>>, vector<8x10x1xf32>
    tpu.vector_store %arg8[%c0_70, %c0_71, %c17], %91 {strides = array<i32>} : memref<8x10x18xf32, #tpu.memory_space<vmem>>, vector<8x10x1xf32>,
    %c0_i32_72 = arith.constant 0 : i32
    %93 = arith.cmpi eq, %arg1, %c0_i32_72 : i32
    %94 = arith.extui %93 : i1 to i32
    %c0_i32_73 = arith.constant 0 : i32
    %95 = arith.cmpi ne, %94, %c0_i32_73 : i32
    scf.if %95 {
      %cst_146 = arith.constant 0.000000e+00 : f32
      %165 = vector.broadcast %cst_146 : f32 to vector<8x1x18xf32>
      %c0_147 = arith.constant 0 : index
      %c0_148 = arith.constant 0 : index
      %c0_149 = arith.constant 0 : index
      %166 = vector.load %arg8[%c0_147, %c0_148, %c0_149] : memref<8x10x18xf32, #tpu.memory_space<vmem>>, vector<8x1x18xf32>
      tpu.vector_store %arg8[%c0_147, %c0_148, %c0_149], %165 {strides = array<i32>} : memref<8x10x18xf32, #tpu.memory_space<vmem>>, vector<8x1x18xf32>,
    } else {
    }
    %c1_i32_74 = arith.constant 1 : i32
    %96 = arith.cmpi eq, %arg1, %c1_i32_74 : i32
    %97 = arith.extui %96 : i1 to i32
    %c0_i32_75 = arith.constant 0 : i32
    %98 = arith.cmpi ne, %97, %c0_i32_75 : i32
    scf.if %98 {
      %cst_146 = arith.constant 0.000000e+00 : f32
      %165 = vector.broadcast %cst_146 : f32 to vector<8x1x18xf32>
      %c0_147 = arith.constant 0 : index
      %c9 = arith.constant 9 : index
      %c0_148 = arith.constant 0 : index
      %166 = vector.load %arg8[%c0_147, %c9, %c0_148] : memref<8x10x18xf32, #tpu.memory_space<vmem>>, vector<8x1x18xf32>
      tpu.vector_store %arg8[%c0_147, %c9, %c0_148], %165 {strides = array<i32>} : memref<8x10x18xf32, #tpu.memory_space<vmem>>, vector<8x1x18xf32>,
    } else {
    }
    %cst_76 = arith.constant 0.000000e+00 : f32
    %99 = vector.broadcast %cst_76 : f32 to vector<8x128xf32>
    %c0_77 = arith.constant 0 : index
    %c0_78 = arith.constant 0 : index
    %c0_79 = arith.constant 0 : index
    %100 = vector.load %arg8[%c0_77, %c0_78, %c0_79] : memref<8x10x18xf32, #tpu.memory_space<vmem>>, vector<8x8x16xf32>
    %c0_80 = arith.constant 0 : index
    %c0_81 = arith.constant 0 : index
    %c0_82 = arith.constant 0 : index
    %101 = vector.load %arg5[%c0_80, %c0_81, %c0_82] : memref<9x8x8xf32, #tpu.memory_space<vmem>>, vector<1x8x8xf32>
    %102 = vector.shape_cast %101 : vector<1x8x8xf32> to vector<8x8xf32>
    %103 = vector.shape_cast %100 : vector<8x8x16xf32> to vector<8x128xf32>
    %cst_83 = arith.constant dense<0.000000e+00> : vector<8x128xf32>
    %104 = tpu.matmul %102, %103, %cst_83 {dimension_numbers = #tpu.dot_dimension_numbers<[1], [0], [0], [1], [0, 0, 1, 1], [], []>} : vector<8x8xf32>, vector<8x128xf32>, vector<8x128xf32> -> vector<8x128xf32>
    %105 = arith.addf %99, %104 : vector<8x128xf32>
    %c0_84 = arith.constant 0 : index
    %c0_85 = arith.constant 0 : index
    %c1_86 = arith.constant 1 : index
    %106 = vector.load %arg8[%c0_84, %c0_85, %c1_86] : memref<8x10x18xf32, #tpu.memory_space<vmem>>, vector<8x8x16xf32>
    %c1_87 = arith.constant 1 : index
    %c0_88 = arith.constant 0 : index
    %c0_89 = arith.constant 0 : index
    %107 = vector.load %arg5[%c1_87, %c0_88, %c0_89] : memref<9x8x8xf32, #tpu.memory_space<vmem>>, vector<1x8x8xf32>
    %108 = vector.shape_cast %107 : vector<1x8x8xf32> to vector<8x8xf32>
    %109 = vector.shape_cast %106 : vector<8x8x16xf32> to vector<8x128xf32>
    %cst_90 = arith.constant dense<0.000000e+00> : vector<8x128xf32>
    %110 = tpu.matmul %108, %109, %cst_90 {dimension_numbers = #tpu.dot_dimension_numbers<[1], [0], [0], [1], [0, 0, 1, 1], [], []>} : vector<8x8xf32>, vector<8x128xf32>, vector<8x128xf32> -> vector<8x128xf32>
    %111 = arith.addf %105, %110 : vector<8x128xf32>
    %c0_91 = arith.constant 0 : index
    %c0_92 = arith.constant 0 : index
    %c2_93 = arith.constant 2 : index
    %112 = vector.load %arg8[%c0_91, %c0_92, %c2_93] : memref<8x10x18xf32, #tpu.memory_space<vmem>>, vector<8x8x16xf32>
    %c2_94 = arith.constant 2 : index
    %c0_95 = arith.constant 0 : index
    %c0_96 = arith.constant 0 : index
    %113 = vector.load %arg5[%c2_94, %c0_95, %c0_96] : memref<9x8x8xf32, #tpu.memory_space<vmem>>, vector<1x8x8xf32>
    %114 = vector.shape_cast %113 : vector<1x8x8xf32> to vector<8x8xf32>
    %115 = vector.shape_cast %112 : vector<8x8x16xf32> to vector<8x128xf32>
    %cst_97 = arith.constant dense<0.000000e+00> : vector<8x128xf32>
    %116 = tpu.matmul %114, %115, %cst_97 {dimension_numbers = #tpu.dot_dimension_numbers<[1], [0], [0], [1], [0, 0, 1, 1], [], []>} : vector<8x8xf32>, vector<8x128xf32>, vector<8x128xf32> -> vector<8x128xf32>
    %117 = arith.addf %111, %116 : vector<8x128xf32>
    %c0_98 = arith.constant 0 : index
    %c1_99 = arith.constant 1 : index
    %c0_100 = arith.constant 0 : index
    %118 = vector.load %arg8[%c0_98, %c1_99, %c0_100] : memref<8x10x18xf32, #tpu.memory_space<vmem>>, vector<8x8x16xf32>
    %c3_101 = arith.constant 3 : index
    %c0_102 = arith.constant 0 : index
    %c0_103 = arith.constant 0 : index
    %119 = vector.load %arg5[%c3_101, %c0_102, %c0_103] : memref<9x8x8xf32, #tpu.memory_space<vmem>>, vector<1x8x8xf32>
    %120 = vector.shape_cast %119 : vector<1x8x8xf32> to vector<8x8xf32>
    %121 = vector.shape_cast %118 : vector<8x8x16xf32> to vector<8x128xf32>
    %cst_104 = arith.constant dense<0.000000e+00> : vector<8x128xf32>
    %122 = tpu.matmul %120, %121, %cst_104 {dimension_numbers = #tpu.dot_dimension_numbers<[1], [0], [0], [1], [0, 0, 1, 1], [], []>} : vector<8x8xf32>, vector<8x128xf32>, vector<8x128xf32> -> vector<8x128xf32>
    %123 = arith.addf %117, %122 : vector<8x128xf32>
    %c0_105 = arith.constant 0 : index
    %c1_106 = arith.constant 1 : index
    %c1_107 = arith.constant 1 : index
    %124 = vector.load %arg8[%c0_105, %c1_106, %c1_107] : memref<8x10x18xf32, #tpu.memory_space<vmem>>, vector<8x8x16xf32>
    %c4_108 = arith.constant 4 : index
    %c0_109 = arith.constant 0 : index
    %c0_110 = arith.constant 0 : index
    %125 = vector.load %arg5[%c4_108, %c0_109, %c0_110] : memref<9x8x8xf32, #tpu.memory_space<vmem>>, vector<1x8x8xf32>
    %126 = vector.shape_cast %125 : vector<1x8x8xf32> to vector<8x8xf32>
    %127 = vector.shape_cast %124 : vector<8x8x16xf32> to vector<8x128xf32>
    %cst_111 = arith.constant dense<0.000000e+00> : vector<8x128xf32>
    %128 = tpu.matmul %126, %127, %cst_111 {dimension_numbers = #tpu.dot_dimension_numbers<[1], [0], [0], [1], [0, 0, 1, 1], [], []>} : vector<8x8xf32>, vector<8x128xf32>, vector<8x128xf32> -> vector<8x128xf32>
    %129 = arith.addf %123, %128 : vector<8x128xf32>
    %c0_112 = arith.constant 0 : index
    %c1_113 = arith.constant 1 : index
    %c2_114 = arith.constant 2 : index
    %130 = vector.load %arg8[%c0_112, %c1_113, %c2_114] : memref<8x10x18xf32, #tpu.memory_space<vmem>>, vector<8x8x16xf32>
    %c5_115 = arith.constant 5 : index
    %c0_116 = arith.constant 0 : index
    %c0_117 = arith.constant 0 : index
    %131 = vector.load %arg5[%c5_115, %c0_116, %c0_117] : memref<9x8x8xf32, #tpu.memory_space<vmem>>, vector<1x8x8xf32>
    %132 = vector.shape_cast %131 : vector<1x8x8xf32> to vector<8x8xf32>
    %133 = vector.shape_cast %130 : vector<8x8x16xf32> to vector<8x128xf32>
    %cst_118 = arith.constant dense<0.000000e+00> : vector<8x128xf32>
    %134 = tpu.matmul %132, %133, %cst_118 {dimension_numbers = #tpu.dot_dimension_numbers<[1], [0], [0], [1], [0, 0, 1, 1], [], []>} : vector<8x8xf32>, vector<8x128xf32>, vector<8x128xf32> -> vector<8x128xf32>
    %135 = arith.addf %129, %134 : vector<8x128xf32>
    %c0_119 = arith.constant 0 : index
    %c2_120 = arith.constant 2 : index
    %c0_121 = arith.constant 0 : index
    %136 = vector.load %arg8[%c0_119, %c2_120, %c0_121] : memref<8x10x18xf32, #tpu.memory_space<vmem>>, vector<8x8x16xf32>
    %c6_122 = arith.constant 6 : index
    %c0_123 = arith.constant 0 : index
    %c0_124 = arith.constant 0 : index
    %137 = vector.load %arg5[%c6_122, %c0_123, %c0_124] : memref<9x8x8xf32, #tpu.memory_space<vmem>>, vector<1x8x8xf32>
    %138 = vector.shape_cast %137 : vector<1x8x8xf32> to vector<8x8xf32>
    %139 = vector.shape_cast %136 : vector<8x8x16xf32> to vector<8x128xf32>
    %cst_125 = arith.constant dense<0.000000e+00> : vector<8x128xf32>
    %140 = tpu.matmul %138, %139, %cst_125 {dimension_numbers = #tpu.dot_dimension_numbers<[1], [0], [0], [1], [0, 0, 1, 1], [], []>} : vector<8x8xf32>, vector<8x128xf32>, vector<8x128xf32> -> vector<8x128xf32>
    %141 = arith.addf %135, %140 : vector<8x128xf32>
    %c0_126 = arith.constant 0 : index
    %c2_127 = arith.constant 2 : index
    %c1_128 = arith.constant 1 : index
    %142 = vector.load %arg8[%c0_126, %c2_127, %c1_128] : memref<8x10x18xf32, #tpu.memory_space<vmem>>, vector<8x8x16xf32>
    %c7_129 = arith.constant 7 : index
    %c0_130 = arith.constant 0 : index
    %c0_131 = arith.constant 0 : index
    %143 = vector.load %arg5[%c7_129, %c0_130, %c0_131] : memref<9x8x8xf32, #tpu.memory_space<vmem>>, vector<1x8x8xf32>
    %144 = vector.shape_cast %143 : vector<1x8x8xf32> to vector<8x8xf32>
    %145 = vector.shape_cast %142 : vector<8x8x16xf32> to vector<8x128xf32>
    %cst_132 = arith.constant dense<0.000000e+00> : vector<8x128xf32>
    %146 = tpu.matmul %144, %145, %cst_132 {dimension_numbers = #tpu.dot_dimension_numbers<[1], [0], [0], [1], [0, 0, 1, 1], [], []>} : vector<8x8xf32>, vector<8x128xf32>, vector<8x128xf32> -> vector<8x128xf32>
    %147 = arith.addf %141, %146 : vector<8x128xf32>
    %c0_133 = arith.constant 0 : index
    %c2_134 = arith.constant 2 : index
    %c2_135 = arith.constant 2 : index
    %148 = vector.load %arg8[%c0_133, %c2_134, %c2_135] : memref<8x10x18xf32, #tpu.memory_space<vmem>>, vector<8x8x16xf32>
    %c8_136 = arith.constant 8 : index
    %c0_137 = arith.constant 0 : index
    %c0_138 = arith.constant 0 : index
    %149 = vector.load %arg5[%c8_136, %c0_137, %c0_138] : memref<9x8x8xf32, #tpu.memory_space<vmem>>, vector<1x8x8xf32>
    %150 = vector.shape_cast %149 : vector<1x8x8xf32> to vector<8x8xf32>
    %151 = vector.shape_cast %148 : vector<8x8x16xf32> to vector<8x128xf32>
    %cst_139 = arith.constant dense<0.000000e+00> : vector<8x128xf32>
    %152 = tpu.matmul %150, %151, %cst_139 {dimension_numbers = #tpu.dot_dimension_numbers<[1], [0], [0], [1], [0, 0, 1, 1], [], []>} : vector<8x8xf32>, vector<8x128xf32>, vector<8x128xf32> -> vector<8x128xf32>
    %153 = arith.addf %147, %152 : vector<8x128xf32>
    %c0_140 = arith.constant 0 : index
    %c0_141 = arith.constant 0 : index
    %154 = vector.load %arg6[%c0_140, %c0_141] : memref<8x1xf32, #tpu.memory_space<vmem>>, vector<8x1xf32>
    %155 = vector.broadcast %154 : vector<8x1xf32> to vector<8x128xf32>
    %156 = arith.addf %153, %155 : vector<8x128xf32>
    %157 = arith.negf %156 : vector<8x128xf32>
    %158 = math.exp %157 : vector<8x128xf32>
    %cst_142 = arith.constant 1.000000e+00 : f32
    %159 = vector.broadcast %cst_142 : f32 to vector<8x128xf32>
    %160 = arith.addf %159, %158 : vector<8x128xf32>
    %161 = arith.divf %159, %160 : vector<8x128xf32>
    %c0_143 = arith.constant 0 : index
    %c0_144 = arith.constant 0 : index
    %c0_145 = arith.constant 0 : index
    %162 = vector.load %arg7[%c0_143, %c0_144, %c0_145] : memref<1x8x128xf32, #tpu.memory_space<vmem>>, vector<1x8x128xf32>
    %163 = vector.shape_cast %162 : vector<1x8x128xf32> to vector<8x128xf32>
    %164 = vector.shape_cast %161 : vector<8x128xf32> to vector<1x8x128xf32>
    tpu.vector_store %arg7[%c0_143, %c0_144, %c0_145], %164 {strides = array<i32>} : memref<1x8x128xf32, #tpu.memory_space<vmem>>, vector<1x8x128xf32>,
    return
  }
  func.func @transform_0(%arg0: i32, %arg1: i32) -> (i32, i32, i32, i32) {
    %c0_i32 = arith.constant 0 : i32
    %c0_i32_0 = arith.constant 0 : i32
    %c0_i32_1 = arith.constant 0 : i32
    %c0_i32_2 = arith.constant 0 : i32
    return %arg0, %c0_i32, %c0_i32_0, %c0_i32_1 : i32, i32, i32, i32
  }
  func.func @transform_1(%arg0: i32, %arg1: i32) -> (i32, i32, i32) {
    %c0_i32 = arith.constant 0 : i32
    %c0_i32_0 = arith.constant 0 : i32
    %c0_i32_1 = arith.constant 0 : i32
    %c0_i32_2 = arith.constant 0 : i32
    return %c0_i32, %c0_i32_0, %c0_i32_1 : i32, i32, i32
  }
  func.func @transform_2(%arg0: i32, %arg1: i32) -> (i32, i32) {
    %c0_i32 = arith.constant 0 : i32
    %c0_i32_0 = arith.constant 0 : i32
    %c0_i32_1 = arith.constant 0 : i32
    return %c0_i32, %c0_i32_0 : i32, i32
  }
  func.func @transform_3(%arg0: i32, %arg1: i32) -> (i32, i32, i32) {
    %c0_i32 = arith.constant 0 : i32
    %c0_i32_0 = arith.constant 0 : i32
    %c0_i32_1 = arith.constant 0 : i32
    %c0_i32_2 = arith.constant 0 : i32
    return %c0_i32, %c0_i32_0, %c0_i32_1 : i32, i32, i32
  }
  func.func @transform_4(%arg0: i32, %arg1: i32) -> (i32, i32) {
    %c0_i32 = arith.constant 0 : i32
    %c0_i32_0 = arith.constant 0 : i32
    %c0_i32_1 = arith.constant 0 : i32
    return %c0_i32, %c0_i32_0 : i32, i32
  }
  func.func @transform_5(%arg0: i32, %arg1: i32) -> (i32, i32, i32) {
    %c0_i32 = arith.constant 0 : i32
    %c0_i32_0 = arith.constant 0 : i32
    return %arg0, %c0_i32, %arg1 : i32, i32, i32
  }
}

</mosaic_0001>

<bundles_post_ra>
// kernel: tpu_custom_call.1
= control target key start
LH: loop header
LB: loop body
LE: loop exit
PB: predicated region body
PF: predicated region fallthrough
CT: control target
= control target key end

     0   :  { %10 = vsyncpa [#allocation4], 0  ;;  %s7636_s0 = inlined_call_operand.vmem [shape: f32[2,4,20,18], index: 0, kind: input, shape index: {}]   ;;  %s7637_s1 = inlined_call_operand.vmem [shape: f32[9,8,4], index: 1, kind: input, shape index: {}]   ;;  %s7638_s2 = inlined_call_operand.vmem [shape: f32[8,1], index: 2, kind: input, shape index: {}]   ;;  %s7639_s3 = inlined_call_operand.vmem [shape: f32[9,8,8], index: 3, kind: input, shape index: {}]   ;;  %s7640_s4 = inlined_call_operand.vmem [shape: f32[8,1], index: 4, kind: input, shape index: {}]   ;;  %s7641_s5 = inlined_call_operand.hbm [shape: f32[2,8,256], index: 5, kind: output, shape index: {}]  }
   0x1   :  { %12 = vsyncpa [#allocation4 + $0x1], 0  ;;  %s5878_s18 = smov 0   ;;  %s5880_s19 = smov 0  }
   0x2   :  { %s5882_s20 = smov 0   ;;  %s5884_s21 = smov 0  }
   0x3   :  { %s5886_s22 = smov 0   ;;  %s5888_s23 = smov 0  }
   0x4   :  { %s5890_s24 = smov 0   ;;  %s5892_s25 = smov 0  }
   0x5 LB: > { %s5423_s26 = sadd.s32 4294967295, %s5828_s25   ;;  %s5424_s27 = sadd.s32 4294967294, %s5828_s25   ;;  %s5828_s25 = sphi %s5892_s25, %s18_s25   ;;  %s5824_s24 = sphi %s5890_s24, %s7664_s24   ;;  %s5820_s23 = sphi %s5888_s23, %s7663_s23   ;;  %s5816_s22 = sphi %s5886_s22, %s7662_s22   ;;  %s5812_s21 = sphi %s5884_s21, %s7661_s21   ;;  %s5808_s20 = sphi %s5882_s20, %s7660_s20   ;;  %s5804_s19 = sphi %s5880_s19, %s7659_s19   ;;  %s5800_s18 = sphi %s5878_s18, %s7658_s18  }
   0x6   : > { %s27_s28 = sadd.s32 1, %s5820_s23  ;;  %s30_s29 = sadd.s32 1, %s5824_s24 }
   0x7   : > { %p28_p0 = scmp.ge.s32.totalorder %s27_s28, 2  ;;  %p159_p1 = scmp.ne.s32.totalorder %s5808_s20, %s5804_s19 }
   0x8   : > { %p160_p2 = scmp.eq.s32.totalorder %s5423_s26, 3  ;;  %p165_p5 = scmp.ne.s32.totalorder %s5804_s19, %s5800_s18 }
   0x9   : > { %s7666_s28 = smov (%p28_p0, %s27_s28), 0  ;;  %s7668_s29 = smov (!%p28_p0, %s30_s29), %s5824_s24 }
   0xa   : > { %s145_s30 = ssub.s32 %s5820_s23, %s7666_s28  ;;  %p5929_p3 = por %p160_p2, %p159_p1 }
   0xb   : > { %p32_p4 = scmp.ge.s32.totalorder %s7668_s29, 2  ;;  %p166_p6 = scmp.eq.s32.totalorder %s5424_s27, 3 }
   0xc   : > { %p5427_p7 = scmp.ge.s32.totalorder %s5828_s25, 1  ;;  %p204_p9 = scmp.lt.s32.totalorder %s5828_s25, 5 }
   0xd   : > { %s7670_s29 = smov (%p32_p4, %s7668_s29), 0  ;;  %p5938_p8 = por %p166_p6, %p165_p5 }
   0xe   : > { %s144_s8 = ssub.s32 %s5824_s24, %s7670_s29  ;;  %s149_s9 = sadd.s32 1, %s5808_s20 }
   0xf   : > { %s146_s10 = sor.u32 %s145_s30, %s144_s8  ;;  %p205_p10 = pnand %p5427_p7, %p204_p9 }
  0x10   : > { %p147_p11 = scmp.eq.s32.totalorder %s146_s10, 0  ;;  %p232_p12 = scmp.lt.s32.totalorder (!%p205_p10), %s5816_s22, 1  ;;  %v253_v0 = vlaneseq (!%p205_p10)  ;;  %v5830_v1 = vmov (!%p205_p10), 1983009808   ;;  %v7643_v3 = vmov (!%p205_p10), 0.0   ;;  %vm373_vm0 = vcmask (!%p205_p10), 130048  }
  0x11   : > { %208 = sbr.rel (%p205_p10) target bundleno = 1546 (0x60a), region = 40  ;;  %v251_v2 = vunpack.c.l.s4 (!%p205_p10), %v5830_v1  ;;  %630 = vmatprep.mubr.f32.mxu0 (!%p205_p10), %v7643_v3  ;;  %s5430_s14 = sshll.u32 (!%p205_p10), %s5812_s21, 3  ;;  %vm375_vm1 = vcmask (!%p205_p10), 261120   ;;  %vm377_vm2 = vcmask (!%p205_p10), 392192   ;;  %vm559_vm3 = vcmask (!%p205_p10), 1043456  }
  0x12   : > { %s5947_s11 = scalar_select %p147_p11, %s5808_s20, %s149_s9  }
  0x13   : > { %v252_v4 = vunpack.c.0.s8 (!%p205_p10), %v251_v2  ;;  %v5952_v5 = vshrl.u32 (!%p205_p10), %v253_v0, 7  ;;  %s5832_s27 = smov (!%p205_p10), 127   ;;  %s5833_s30 = smov (!%p205_p10), 126   ;;  %vm379_vm4 = vcmask (!%p205_p10), 523264   ;;  %vm381_vm5 = vcmask (!%p205_p10), 654336  }
  0x14   : > { %s5835_s8 = smov (!%p205_p10), 32   ;;  %s5836_s9 = smov (!%p205_p10), 16   ;;  %vm383_vm6 = vcmask (!%p205_p10), 785408   ;;  %vm385_vm7 = vcmask (!%p205_p10), 916480   ;;  %vm555_vm8 = vcmask (!%p205_p10), 31744   ;;  %vm2756_vm9 = vcmask (!%p205_p10), 138248  }
  0x15   : > { %v5961_v6 = vsub.s32 (!%p205_p10), %v252_v4, %v5952_v5  ;;  %s5837_s10 = smov (!%p205_p10), 64   ;;  %s5841_s15 = smov (!%p205_p10), 112   ;;  %vm2774_vm10 = vcmask (!%p205_p10), 7168   ;;  %vm2758_vm11 = vcmask (!%p205_p10), 132104   ;;  %vm2792_vm12 = vcmask (!%p205_p10), 146568  }
  0x16   : > { %s7642_s16 = sand.u32 (!%p205_p10), 1, %s5804_s19   ;;  %vm2776_vm13 = vcmask (!%p205_p10), 1024   ;;  %vm2794_vm14 = vcmask (!%p205_p10), 140424   ;;  %p5516_p13 = scmp.ne.s32.totalorder (!%p205_p10), %s5812_s21, 0 }
  0x18   : > { %s233_s12 = scalar_select %p232_p12, %s5816_s22, 1 }
  0x19   : > { %vm2814_vm15 = vcmask (!%p5516_p13), 139264  }
  0x1a   : > { %s5620_s13 = smul.u32 96, %s233_s12  ;;  %s5838_s12 = smov 48  }
  0x1c   : > { %s236_s17 = scalar_lea.vmem %s7636_s0, %s5620_s13  ;;  %s5839_s13 = smov 96  }
  0x1d   : > { %s5958_s26 = scalar_lea.vmem %s236_s17, %s5430_s14  ;;  %s5840_s14 = smov 80  }
  0x1e   : > { %v243_v7 = vld [vmem:[%s5958_s26 + $0x30] sm:$0xff]  ;;  %v239_v8 = vld [vmem:[%s5958_s26] sm:$0xff]  ;;  %v245_v9 = vld [vmem:[%s5958_s26 + $0x48] sm:$0xff]  ;;  %s6175_s17 = sshll.u32 %s7642_s16, 3  ;;  %s5843_s16 = smov 1  }
  0x1f   : > { %406 = vrot.lane.b32.xlu1 %v243_v7, %s5832_s27  ;;  %398 = vrot.lane.b32.xlu0 %v239_v8, %s5832_s27  ;;  %v248_v10 = vcombine.low %v239_v8, %v243_v7  ;;  %v249_v11 = vcombine.high %v239_v8, %v243_v7  ;;  %v241_v12 = vld [vmem:[%s5958_s26 + $0x18] sm:$0xff]  ;;  %v242_v13 = vld [vmem:[%s5958_s26 + $0x20] sm:$0x3] }
  0x20   : > { %v264_v14 = vcombine.low %v241_v12, %v245_v9  ;;  %v265_v15 = vcombine.high %v241_v12, %v245_v9  ;;  %v240_v16 = vld [vmem:[%s5958_s26 + $0x8] sm:$0x3]  ;;  %v246_v17 = vld [vmem:[%s5958_s26 + $0x50] sm:$0x3]  ;;  %v244_v18 = vld [vmem:[%s5958_s26 + $0x38] sm:$0x3] }
  0x21   : > { %v5974_v19 = vrot.slane %v248_v10, %v5961_v6  ;;  %v5977_v20 = vrot.slane %v249_v11, %v5961_v6  ;;  %v324_v21 = vcombine.low %v242_v13, %v246_v17  ;;  %v316_v22 = vcombine.low %v240_v16, %v244_v18  ;;  %v720_v32 = vld [vmem:[%s5958_s26 + $0x20] sm:$0x3]  ;;  %v718_v33 = vld [vmem:[%s5958_s26 + $0x8] sm:$0x3]  ;;  %v5459_v37 = vld [vmem:[%s5958_s26 + $0x31] sm:$0xff] }
  0x22   : > { %v5980_v23 = vrot.slane %v264_v14, %v5961_v6  ;;  %v5983_v24 = vrot.slane %v265_v15, %v5961_v6  ;;  %v5457_v34 = vld [vmem:[%s5958_s26 + $0x19] sm:$0xff]  ;;  %v5455_v35 = vld [vmem:[%s5958_s26 + $0x1] sm:$0xff]  ;;  %v5461_v36 = vld [vmem:[%s5958_s26 + $0x49] sm:$0xff]  ;;  %v5834_v11 = vmov 1934713408  }
  0x23   : > { %410 = vrot.lane.b32.xlu1 %v245_v9, %s5832_s27  ;;  %402 = vrot.lane.b32.xlu0 %v241_v12, %s5832_s27  ;;  %v5988_v25 = vrot.slane %v324_v21, %v5961_v6  ;;  %v5991_v26 = vrot.slane %v316_v22, %v5961_v6  ;;  %v986_v38 = vcombine.low %v5455_v35, %v5459_v37  ;;  %v724_v40 = vld [vmem:[%s5958_s26 + $0x50] sm:$0x3]  ;;  %v722_v41 = vld [vmem:[%s5958_s26 + $0x38] sm:$0x3] }
  0x24   : > { %v281_v27 = vcombine.high %v5974_v19, %v5980_v23  ;;  %v280_v28 = vcombine.low %v5974_v19, %v5980_v23  ;;  %v296_v29 = vcombine.low %v5977_v20, %v5983_v24  ;;  %v297_v30 = vcombine.high %v5977_v20, %v5983_v24  ;;  %v5458_v50 = vld [vmem:[%s5958_s26 + $0x21] sm:$0x3]  ;;  %v5456_v51 = vld [vmem:[%s5958_s26 + $0x9] sm:$0x3]  ;;  %v5462_v54 = vld [vmem:[%s5958_s26 + $0x51] sm:$0x3] }
  0x25   : > { %v332_v31 = vcombine.low %v5991_v26, %v5988_v25  ;;  %v1002_v39 = vcombine.low %v5457_v34, %v5461_v36  ;;  %v6022_v42 = vrot.slane %v986_v38, %v5961_v6  ;;  %v987_v46 = vcombine.high %v5455_v35, %v5459_v37  ;;  %v5460_v55 = vld [vmem:[%s5958_s26 + $0x39] sm:$0x3]  ;;  %v5470_v56 = vld [vmem:[%s5958_s26 + $0x21] sm:$0x3]  ;;  %v5468_v57 = vld [vmem:[%s5958_s26 + $0x9] sm:$0x3] }
  0x26   : > { %v1003_v47 = vcombine.high %v5457_v34, %v5461_v36  ;;  %v5474_v58 = vld [vmem:[%s5958_s26 + $0x51] sm:$0x3]  ;;  %v5472_v59 = vld [vmem:[%s5958_s26 + $0x39] sm:$0x3]  ;;  %v5492_v61 = vld [vmem:[%s5958_s26 + $0x2] sm:$0xff] }
  0x27   : > { %404 = vrot.lane.b32.xlu1 %v242_v13, %s5832_s27  ;;  %400 = vrot.lane.b32.xlu0 %v240_v16, %s5832_s27  ;;  %v6025_v43 = vrot.slane %v1002_v39, %v5961_v6  ;;  %v6036_v48 = vrot.slane %v987_v46, %v5961_v6  ;;  %v5494_v60 = vld [vmem:[%s5958_s26 + $0x1a] sm:$0xff]  ;;  %v5498_v62 = vld [vmem:[%s5958_s26 + $0x4a] sm:$0xff] }
  0x28   : > { %v6039_v49 = vrot.slane %v1003_v47, %v5961_v6  ;;  %v5496_v63 = vld [vmem:[%s5958_s26 + $0x32] sm:$0xff]  ;;  %v5495_v0 = vld [vmem:[%s5958_s26 + $0x22] sm:$0x3]  ;;  %v5493_v1 = vld [vmem:[%s5958_s26 + $0xa] sm:$0x3]  ;;  %v1743_v4 = vcombine.low %v5494_v60, %v5498_v62 }
  0x29   : > { %v1018_v44 = vcombine.low %v6022_v42, %v6025_v43  ;;  %v1019_v45 = vcombine.high %v6022_v42, %v6025_v43  ;;  %v1727_v2 = vcombine.low %v5492_v61, %v5496_v63  ;;  %v1728_v16 = vcombine.high %v5492_v61, %v5496_v63 }
  0x2a   : > { %v1034_v52 = vcombine.low %v6036_v48, %v6039_v49  ;;  %v1035_v53 = vcombine.high %v6036_v48, %v6039_v49  ;;  %v6085_v10 = vrot.slane %v1743_v4, %v5961_v6 }
  0x2b   : > { %412 = vrot.lane.b32.xlu1 %v246_v17, %s5832_s27  ;;  %408 = vrot.lane.b32.xlu0 %v244_v18, %s5832_s27  ;;  %v1744_v17 = vcombine.high %v5494_v60, %v5498_v62  ;;  %v6096_v18 = vrot.slane %v1728_v16, %v5961_v6 }
  0x2d   : > { %v6099_v21 = vrot.slane %v1744_v17, %v5961_v6 }
  0x2f   : > { %739 = vrot.lane.b32.xlu1 %v241_v12, %s5833_s30  ;;  %735 = vrot.lane.b32.xlu0 %v239_v8, %s5833_s30  ;;  %v5497_v8 = vld [vmem:[%s5958_s26 + $0x3a] sm:$0x3]  ;;  %v283_v12 = vunpack.c.l.s4 %v5834_v11 }
  0x31   : > { %v284_v14 = vunpack.c.0.s8 %v283_v12 }
  0x33   : > { %747 = vrot.lane.b32.xlu1 %v245_v9, %s5833_s30  ;;  %743 = vrot.lane.b32.xlu0 %v243_v7, %s5833_s30  ;;  %v5499_v7 = vld [vmem:[%s5958_s26 + $0x52] sm:$0x3]  ;;  %v6082_v9 = vrot.slane %v1727_v2, %v5961_v6  ;;  %v6104_v22 = vsub.s32 %v284_v14, %v5952_v5 }
  0x34   : > { %v5511_v5 = vld [vmem:[%s5958_s26 + $0x52] sm:$0x3] }
  0x35   : > { %v1759_v13 = vcombine.low %v6082_v9, %v6085_v10  ;;  %v1760_v15 = vcombine.high %v6082_v9, %v6085_v10  ;;  %v295_v38 = vrot.slane %v281_v27, %v6104_v22  ;;  %v311_v19 = vrot.slane %v297_v30, %v6104_v22 }
  0x36   : > { %v6148_v27 = vrot.slane %v332_v31, %v6104_v22  ;;  %v1042_v42 = vrot.slane %v1034_v52, %v6104_v22 }
  0x37   : > { %741 = vrot.lane.b32.xlu1 %v720_v32, %s5833_s30  ;;  %737 = vrot.lane.b32.xlu0 %v718_v33, %s5833_s30  ;;  %v5507_v32 = vld [vmem:[%s5958_s26 + $0x22] sm:$0x3]  ;;  %v5505_v33 = vld [vmem:[%s5958_s26 + $0xa] sm:$0x3] }
  0x38   : > { %v340_v20 = vcombine.high %v6148_v27, %v7643_v3 }
  0x3b   : > { %749 = vrot.lane.b32.xlu1 %v724_v40, %s5833_s30  ;;  %745 = vrot.lane.b32.xlu0 %v722_v41, %s5833_s30  ;;  %v313_v40 = vcombine.high %v295_v38, %v7643_v3 }
  0x3f   : > { %1223 = vrot.lane.b32.xlu1 %v5457_v34, %s5832_s27  ;;  %1219 = vrot.lane.b32.xlu0 %v5455_v35, %s5832_s27 }
  0x43   : > { %1231 = vrot.lane.b32.xlu1 %v5461_v36, %s5832_s27  ;;  %1227 = vrot.lane.b32.xlu0 %v5459_v37, %s5832_s27 }
  0x47   : > { %1225 = vrot.lane.b32.xlu1 %v5458_v50, %s5832_s27  ;;  %1221 = vrot.lane.b32.xlu0 %v5456_v51, %s5832_s27 }
  0x4b   : > { %1233 = vrot.lane.b32.xlu1 %v5462_v54, %s5832_s27  ;;  %1229 = vrot.lane.b32.xlu0 %v5460_v55, %s5832_s27 }
  0x4f   : > { %1480 = vrot.lane.b32.xlu1 %v5457_v34, %s5833_s30  ;;  %1476 = vrot.lane.b32.xlu0 %v5455_v35, %s5833_s30  ;;  %v1775_v34 = vcombine.low %v6096_v18, %v6099_v21  ;;  %v6116_v35 = vrot.slane %v280_v28, %v6104_v22  ;;  %v304_v28 = vrot.slane %v296_v29, %v6104_v22 }
  0x50   : > { %v315_v29 = vcombine.high %v311_v19, %v7643_v3 }
  0x51   : > { %v312_v39 = vcombine.high %v6116_v35, %v7643_v3  ;;  %v314_v23 = vcombine.high %v304_v28, %v7643_v3  ;;  %v1783_v9 = vrot.slane %v1775_v34, %v6104_v22 }
  0x53   : > { %1488 = vrot.lane.b32.xlu1 %v5461_v36, %s5833_s30  ;;  %1484 = vrot.lane.b32.xlu0 %v5459_v37, %s5833_s30  ;;  %v1776_v36 = vcombine.high %v6096_v18, %v6099_v21  ;;  %v5509_v37 = vld [vmem:[%s5958_s26 + $0x3a] sm:$0x3] }
  0x57   : > { %1482 = vrot.lane.b32.xlu1 %v5470_v56, %s5833_s30  ;;  %1478 = vrot.lane.b32.xlu0 %v5468_v57, %s5833_s30 }
  0x5b   : > { %1490 = vrot.lane.b32.xlu1 %v5474_v58, %s5833_s30  ;;  %1486 = vrot.lane.b32.xlu0 %v5472_v59, %s5833_s30 }
  0x5f   : > { %1964 = vrot.lane.b32.xlu1 %v5494_v60, %s5832_s27  ;;  %1960 = vrot.lane.b32.xlu0 %v5492_v61, %s5832_s27 }
  0x63   : > { %1972 = vrot.lane.b32.xlu1 %v5498_v62, %s5832_s27  ;;  %1968 = vrot.lane.b32.xlu0 %v5496_v63, %s5832_s27 }
  0x67   : > { %1966 = vrot.lane.b32.xlu1 %v5495_v0, %s5832_s27  ;;  %1962 = vrot.lane.b32.xlu0 %v5493_v1, %s5832_s27 }
  0x6b   : > { %1974 = vrot.lane.b32.xlu1 %v5499_v7, %s5832_s27  ;;  %1970 = vrot.lane.b32.xlu0 %v5497_v8, %s5832_s27 }
  0x6f   : > { %2221 = vrot.lane.b32.xlu1 %v5494_v60, %s5833_s30  ;;  %2217 = vrot.lane.b32.xlu0 %v5492_v61, %s5833_s30 }
  0x73   : > { %2229 = vrot.lane.b32.xlu1 %v5498_v62, %s5833_s30  ;;  %2225 = vrot.lane.b32.xlu0 %v5496_v63, %s5833_s30 }
  0x77   : > { %2223 = vrot.lane.b32.xlu1 %v5507_v32, %s5833_s30  ;;  %2219 = vrot.lane.b32.xlu0 %v5505_v33, %s5833_s30 }
  0x7b   : > { %2231 = vrot.lane.b32.xlu1 %v5511_v5, %s5833_s30  ;;  %2227 = vrot.lane.b32.xlu0 %v5509_v37, %s5833_s30 }
  0x7f   : > { %346 = vrot.lane.b32.xlu1 %v295_v38, %s5835_s8  ;;  %342 = vrot.lane.b32.xlu0 %v312_v39, %s5836_s9 }
  0x83   : > { %354 = vrot.lane.b32.xlu1 %v304_v28, %s5837_s10  ;;  %350 = vrot.lane.b32.xlu0 %v313_v40, %s5838_s12 }
  0x87   : > { %362 = vrot.lane.b32.xlu1 %v311_v19, %s5839_s13  ;;  %358 = vrot.lane.b32.xlu0 %v314_v23, %s5840_s14 }
  0x8b   : > { %366 = vrot.lane.b32.xlu1 %v315_v29, %s5841_s15  ;;  %370 = vrot.lane.b32.xlu0 %v340_v20, %s5836_s9 }
  0x91   : > { %v407_v24 = vpop.permute.xlu1 %406  ;;  %v399_v25 = vpop.permute.xlu0 %398 }
  0x92   : > { %v422_v26 = vcombine.low %v399_v25, %v407_v24  ;;  %v423_v41 = vcombine.high %v399_v25, %v407_v24 }
  0x94   : > { %v430_v50 = vrot.slane %v422_v26, %v5961_v6  ;;  %v437_v57 = vrot.slane %v423_v41, %v5961_v6 }
  0x95   : > { %v411_v30 = vpop.permute.xlu1 %410  ;;  %v403_v31 = vpop.permute.xlu0 %402 }
  0x96   : > { %v438_v46 = vcombine.low %v403_v31, %v411_v30  ;;  %v439_v47 = vcombine.high %v403_v31, %v411_v30 }
  0x98   : > { %v446_v51 = vrot.slane %v438_v46, %v5961_v6  ;;  %v453_v54 = vrot.slane %v439_v47, %v5961_v6 }
  0x99   : > { %v405_v55 = vpop.permute.xlu1 %404  ;;  %v401_v56 = vpop.permute.xlu0 %400 }
  0x9a   : > { %v454_v58 = vcombine.low %v430_v50, %v446_v51  ;;  %v455_v59 = vcombine.high %v430_v50, %v446_v51  ;;  %v470_v62 = vcombine.low %v437_v57, %v453_v54  ;;  %v471_v12 = vcombine.high %v437_v57, %v453_v54 }
  0x9c   : > { %v469_v60 = vrot.slane %v455_v59, %v6104_v22  ;;  %v6163_v61 = vrot.slane %v454_v58, %v6104_v22  ;;  %v478_v11 = vrot.slane %v470_v62, %v6104_v22  ;;  %v485_v33 = vrot.slane %v471_v12, %v6104_v22 }
  0x9d   : > { %v413_v63 = vpop.permute.xlu1 %412  ;;  %v409_v0 = vpop.permute.xlu0 %408 }
  0x9e   : > { %v498_v1 = vcombine.low %v405_v55, %v413_v63  ;;  %v490_v2 = vcombine.low %v401_v56, %v409_v0  ;;  %520 = vrot.lane.b32.xlu1 %v469_v60, %s5835_s8  ;;  %v486_v4 = vcombine.high %v6163_v61, %v7643_v3  ;;  %v487_v32 = vcombine.high %v469_v60, %v7643_v3 }
  0x9f   : > { %v488_v38 = vcombine.high %v478_v11, %v7643_v3 }
  0xa0   : > { %v505_v7 = vrot.slane %v498_v1, %v5961_v6  ;;  %v497_v8 = vrot.slane %v490_v2, %v5961_v6  ;;  %516 = vrot.lane.b32.xlu0 %v486_v4, %s5836_s9  ;;  %v489_v4 = vcombine.high %v485_v33, %v7643_v3 }
  0xa1   : > { %v740_v14 = vpop.permute.xlu1 %739  ;;  %v736_v16 = vpop.permute.xlu0 %735 }
  0xa2   : > { %v506_v17 = vcombine.low %v497_v8, %v505_v7  ;;  %528 = vrot.lane.b32.xlu1 %v478_v11, %s5837_s10 }
  0xa4   : > { %524 = vrot.lane.b32.xlu0 %v487_v32, %s5838_s12  ;;  %v6183_v39 = vrot.slane %v506_v17, %v6104_v22  ;;  %v5720_v32 = vld [vmem:[%s5958_s26 + $0x9] ss:$48 sps:$4 sm:$0x33]  }
  0xa5   : > { %v748_v5 = vpop.permute.xlu1 %747  ;;  %v744_v37 = vpop.permute.xlu0 %743 }
  0xa6   : > { %v775_v28 = vcombine.low %v740_v14, %v748_v5  ;;  %v776_v40 = vcombine.high %v740_v14, %v748_v5  ;;  %v759_v19 = vcombine.low %v736_v16, %v744_v37  ;;  %v760_v23 = vcombine.high %v736_v16, %v744_v37  ;;  %536 = vrot.lane.b32.xlu1 %v485_v33, %s5839_s13  ;;  %v5721_v33 = vld [vmem:[%s5958_s26 + $0x21] ss:$48 sps:$4 sm:$0x33]  }
  0xa7   : > { %v514_v41 = vcombine.high %v6183_v39, %v7643_v3  ;;  %v6218_v16 = vrot.slane %v1018_v44, %v6104_v22 }
  0xa8   : > { %v783_v29 = vrot.slane %v775_v28, %v5961_v6  ;;  %v790_v20 = vrot.slane %v776_v40, %v5961_v6  ;;  %v767_v24 = vrot.slane %v759_v19, %v5961_v6  ;;  %v774_v25 = vrot.slane %v760_v23, %v5961_v6  ;;  %532 = vrot.lane.b32.xlu0 %v488_v38, %s5840_s14 }
  0xa9   : > { %v742_v26 = vpop.permute.xlu1 %741  ;;  %v738_v30 = vpop.permute.xlu0 %737  ;;  %v1050_v28 = vcombine.high %v6218_v16, %v7643_v3  ;;  %v1033_v40 = vrot.slane %v1019_v45, %v6104_v22  ;;  %v1061_v19 = vrot.slane %v5720_v32, %v5961_v6  ;;  %v1069_v23 = vrot.slane %v5721_v33, %v5961_v6 }
  0xaa   : > { %v791_v31 = vcombine.low %v767_v24, %v783_v29  ;;  %v792_v46 = vcombine.high %v767_v24, %v783_v29  ;;  %v807_v51 = vcombine.low %v774_v25, %v790_v20  ;;  %v808_v7 = vcombine.high %v774_v25, %v790_v20 }
  0xab   : > { %v1070_v43 = vcombine.low %v1061_v19, %v1069_v23 }
  0xac   : > { %544 = vrot.lane.b32.xlu0 %v514_v41, %s5836_s9  ;;  %v806_v47 = vrot.slane %v792_v46, %v6104_v22  ;;  %v6196_v50 = vrot.slane %v791_v31, %v6104_v22  ;;  %v815_v62 = vrot.slane %v807_v51, %v6104_v22  ;;  %v822_v17 = vrot.slane %v808_v7, %v6104_v22 }
  0xad   : > { %v750_v54 = vpop.permute.xlu1 %749  ;;  %v746_v55 = vpop.permute.xlu0 %745  ;;  %v1052_v46 = vcombine.high %v1042_v42, %v7643_v3 }
  0xae   : > { %v835_v56 = vcombine.low %v742_v26, %v750_v54  ;;  %v827_v57 = vcombine.low %v738_v30, %v746_v55  ;;  %857 = vrot.lane.b32.xlu1 %v806_v47, %s5835_s8  ;;  %v823_v58 = vcombine.high %v6196_v50, %v7643_v3  ;;  %v824_v2 = vcombine.high %v806_v47, %v7643_v3 }
  0xaf   : > { %v825_v12 = vcombine.high %v815_v62, %v7643_v3  ;;  %v826_v44 = vcombine.high %v822_v17, %v7643_v3  ;;  %v1051_v26 = vcombine.high %v1033_v40, %v7643_v3  ;;  %v6250_v47 = vrot.slane %v1070_v43, %v6104_v22 }
  0xb0   : > { %v842_v59 = vrot.slane %v835_v56, %v5961_v6  ;;  %v834_v60 = vrot.slane %v827_v57, %v5961_v6  ;;  %853 = vrot.lane.b32.xlu0 %v823_v58, %s5836_s9  ;;  %v1049_v57 = vrot.slane %v1035_v53, %v6104_v22 }
  0xb1   : > { %v1224_v63 = vpop.permute.xlu1 %1223  ;;  %v1220_v0 = vpop.permute.xlu0 %1219  ;;  %v1078_v58 = vcombine.high %v6250_v47, %v7643_v3 }
  0xb2   : > { %v843_v1 = vcombine.low %v834_v60, %v842_v59  ;;  %865 = vrot.lane.b32.xlu1 %v815_v62, %s5837_s10 }
  0xb4   : > { %861 = vrot.lane.b32.xlu0 %v824_v2, %s5838_s12  ;;  %v6212_v14 = vrot.slane %v843_v1, %v6104_v22  ;;  %v1053_v2 = vcombine.high %v1049_v57, %v7643_v3 }
  0xb5   : > { %v1232_v8 = vpop.permute.xlu1 %1231  ;;  %v1228_v11 = vpop.permute.xlu0 %1227 }
  0xb6   : > { %540 = vrot.lane.b32.xlu1 %v489_v4, %s5841_s15  ;;  %v851_v38 = vcombine.high %v6212_v14, %v7643_v3  ;;  %v1259_v24 = vcombine.low %v1224_v63, %v1232_v8  ;;  %v1243_v25 = vcombine.low %v1220_v0, %v1228_v11  ;;  %v1260_v51 = vcombine.high %v1224_v63, %v1232_v8 }
  0xb7   : > { %v1244_v54 = vcombine.high %v1220_v0, %v1228_v11 }
  0xb8   : > { %869 = vrot.lane.b32.xlu0 %v825_v12, %s5840_s14  ;;  %v1267_v31 = vrot.slane %v1259_v24, %v5961_v6  ;;  %v1251_v41 = vrot.slane %v1243_v25, %v5961_v6  ;;  %v1274_v59 = vrot.slane %v1260_v51, %v5961_v6 }
  0xb9   : > { %v1226_v5 = vpop.permute.xlu1 %1225  ;;  %v1222_v37 = vpop.permute.xlu0 %1221  ;;  %v1258_v60 = vrot.slane %v1244_v54, %v5961_v6 }
  0xba   : > { %873 = vrot.lane.b32.xlu1 %v822_v17, %s5839_s13  ;;  %v1275_v56 = vcombine.low %v1251_v41, %v1267_v31  ;;  %v1276_v49 = vcombine.high %v1251_v41, %v1267_v31 }
  0xbb   : > { %v1291_v7 = vcombine.low %v1258_v60, %v1274_v59  ;;  %v1292_v23 = vcombine.high %v1258_v60, %v1274_v59 }
  0xbc   : > { %881 = vrot.lane.b32.xlu0 %v851_v38, %s5836_s9  ;;  %v6265_v48 = vrot.slane %v1275_v56, %v6104_v22  ;;  %v1290_v33 = vrot.slane %v1276_v49, %v6104_v22 }
  0xbd   : > { %v1234_v29 = vpop.permute.xlu1 %1233  ;;  %v1230_v20 = vpop.permute.xlu0 %1229  ;;  %v1299_v19 = vrot.slane %v1291_v7, %v6104_v22  ;;  %v1306_v31 = vrot.slane %v1292_v23, %v6104_v22  ;;  %v1774_v23 = vrot.slane %v1760_v15, %v6104_v22 }
  0xbe   : > { %877 = vrot.lane.b32.xlu1 %v826_v44, %s5841_s15  ;;  %v1319_v62 = vcombine.low %v1226_v5, %v1234_v29  ;;  %v1311_v63 = vcombine.low %v1222_v37, %v1230_v20  ;;  %v1307_v12 = vcombine.high %v6265_v48, %v7643_v3 }
  0xbf   : > { %v1309_v43 = vcombine.high %v1299_v19, %v7643_v3 }
  0xc0   : > { %1080 = vrot.lane.b32.xlu0 %v1050_v28, %s5836_s9  ;;  %v1326_v53 = vrot.slane %v1319_v62, %v5961_v6  ;;  %v1318_v4 = vrot.slane %v1311_v63, %v5961_v6 }
  0xc1   : > { %v1481_v45 = vpop.permute.xlu1 %1480  ;;  %v1477_v30 = vpop.permute.xlu0 %1476 }
  0xc2   : > { %1084 = vrot.lane.b32.xlu1 %v1033_v40, %s5835_s8  ;;  %v1327_v5 = vcombine.low %v1318_v4, %v1326_v53  ;;  %v1308_v40 = vcombine.high %v1290_v33, %v7643_v3 }
  0xc4   : > { %1088 = vrot.lane.b32.xlu0 %v1051_v26, %s5838_s12  ;;  %v6286_v24 = vrot.slane %v1327_v5, %v6104_v22  ;;  %v5726_v5 = vld [vmem:[%s5958_s26 + $0xa] ss:$48 sps:$4 sm:$0x33]  }
  0xc5   : > { %v1489_v55 = vpop.permute.xlu1 %1488  ;;  %v1485_v52 = vpop.permute.xlu0 %1484 }
  0xc6   : > { %1092 = vrot.lane.b32.xlu1 %v1042_v42, %s5837_s10  ;;  %v1516_v17 = vcombine.low %v1481_v45, %v1489_v55  ;;  %v1500_v32 = vcombine.low %v1477_v30, %v1485_v52  ;;  %v1517_v29 = vcombine.high %v1481_v45, %v1489_v55  ;;  %v1501_v20 = vcombine.high %v1477_v30, %v1485_v52 }
  0xc7   : > { %v1335_v30 = vcombine.high %v6286_v24, %v7643_v3 }
  0xc8   : > { %1096 = vrot.lane.b32.xlu0 %v1052_v46, %s5840_s14  ;;  %v1524_v28 = vrot.slane %v1516_v17, %v5961_v6  ;;  %v1508_v44 = vrot.slane %v1500_v32, %v5961_v6  ;;  %v1531_v41 = vrot.slane %v1517_v29, %v5961_v6  ;;  %v1515_v45 = vrot.slane %v1501_v20, %v5961_v6 }
  0xc9   : > { %v1483_v0 = vpop.permute.xlu1 %1482  ;;  %v1479_v1 = vpop.permute.xlu0 %1478  ;;  %v6338_v17 = vrot.slane %v1759_v13, %v6104_v22  ;;  %v1802_v29 = vrot.slane %v5726_v5, %v5961_v6 }
  0xca   : > { %1100 = vrot.lane.b32.xlu1 %v1049_v57, %s5839_s13  ;;  %v1532_v42 = vcombine.low %v1508_v44, %v1524_v28  ;;  %v1533_v56 = vcombine.high %v1508_v44, %v1524_v28  ;;  %v1310_v57 = vcombine.high %v1306_v31, %v7643_v3  ;;  %v1549_v7 = vcombine.high %v1515_v45, %v1531_v41  ;;  %v5727_v28 = vld [vmem:[%s5958_s26 + $0x22] ss:$48 sps:$4 sm:$0x33]   ;;  %s231_s26 = scalar_lea.vmem [#allocation3], %s6175_s17 }
  0xcb   : > { %v1810_v20 = vrot.slane %v5727_v28, %v5961_v6 }
  0xcc   : > { %1108 = vrot.lane.b32.xlu0 %v1078_v58, %s5836_s9  ;;  %v6306_v52 = vrot.slane %v1532_v42, %v6104_v22  ;;  %v1548_v58 = vcombine.low %v1515_v45, %v1531_v41  ;;  %v1563_v32 = vrot.slane %v1549_v7, %v6104_v22  ;;  %v1792_v41 = vcombine.high %v1774_v23, %v7643_v3 }
  0xcd   : > { %v1491_v8 = vpop.permute.xlu1 %1490  ;;  %v1487_v11 = vpop.permute.xlu0 %1486  ;;  %v1811_v15 = vcombine.low %v1802_v29, %v1810_v20 }
  0xce   : > { %1104 = vrot.lane.b32.xlu1 %v1053_v2, %s5841_s15  ;;  %v1576_v54 = vcombine.low %v1483_v0, %v1491_v8  ;;  %v1568_v55 = vcombine.low %v1479_v1, %v1487_v11  ;;  %v1564_v63 = vcombine.high %v6306_v52, %v7643_v3  ;;  %v1547_v0 = vrot.slane %v1533_v56, %v6104_v22 }
  0xcf   : > { %v1556_v53 = vrot.slane %v1548_v58, %v6104_v22  ;;  %v1567_v13 = vcombine.high %v1563_v32, %v7643_v3  ;;  %v6384_v56 = vrot.slane %v1811_v15, %v6104_v22 }
  0xd0   : > { %1337 = vrot.lane.b32.xlu0 %v1307_v12, %s5836_s9  ;;  %v1583_v60 = vrot.slane %v1576_v54, %v5961_v6  ;;  %v1575_v62 = vrot.slane %v1568_v55, %v5961_v6  ;;  %v1565_v49 = vcombine.high %v1547_v0, %v7643_v3  ;;  %v1793_v54 = vcombine.high %v1783_v9, %v7643_v3 }
  0xd1   : > { %v6275_v37 = vpop.permute.xlu1 %1964  ;;  %v6277_v38 = vpop.permute.xlu0 %1960  ;;  %v1566_v11 = vcombine.high %v1556_v53, %v7643_v3 }
  0xd2   : > { %1341 = vrot.lane.b32.xlu1 %v1290_v33, %s5835_s8  ;;  %v1584_v2 = vcombine.low %v1575_v62, %v1583_v60  ;;  %v1790_v60 = vrot.slane %v1776_v36, %v6104_v22 }
  0xd4   : > { %1345 = vrot.lane.b32.xlu0 %v1308_v40, %s5838_s12  ;;  %v6332_v12 = vrot.slane %v1584_v2, %v6104_v22  ;;  %v1794_v21 = vcombine.high %v1790_v60, %v7643_v3 }
  0xd5   : > { %v6288_v25 = vpop.permute.xlu1 %1972  ;;  %v6290_v26 = vpop.permute.xlu0 %1968 }
  0xd6   : > { %1349 = vrot.lane.b32.xlu1 %v1299_v19, %s5837_s10  ;;  %v1592_v44 = vcombine.high %v6332_v12, %v7643_v3  ;;  %v1791_v19 = vcombine.high %v6338_v17, %v7643_v3  ;;  %v2000_v42 = vcombine.low %v6275_v37, %v6288_v25  ;;  %v2001_v34 = vcombine.high %v6275_v37, %v6288_v25 }
  0xd8   : > { %1353 = vrot.lane.b32.xlu0 %v1309_v43, %s5840_s14  ;;  %v1984_v43 = vcombine.low %v6277_v38, %v6290_v26  ;;  %v2008_v45 = vrot.slane %v2000_v42, %v5961_v6 }
  0xd9   : > { %v6300_v46 = vpop.permute.xlu1 %1966  ;;  %v6302_v51 = vpop.permute.xlu0 %1962 }
  0xda   : > { %1357 = vrot.lane.b32.xlu1 %v1306_v31, %s5839_s13 }
  0xdc   : > { %1365 = vrot.lane.b32.xlu0 %v1335_v30, %s5836_s9  ;;  %v1992_v30 = vrot.slane %v1984_v43, %v5961_v6 }
  0xdd   : > { %v6310_v59 = vpop.permute.xlu1 %1974  ;;  %v6318_v1 = vpop.permute.xlu0 %1970 }
  0xde   : > { %1361 = vrot.lane.b32.xlu1 %v1310_v57, %s5841_s15  ;;  %v1985_v57 = vcombine.high %v6277_v38, %v6290_v26  ;;  %v2016_v58 = vcombine.low %v1992_v30, %v2008_v45  ;;  %v2060_v38 = vcombine.low %v6300_v46, %v6310_v59  ;;  %v2052_v25 = vcombine.low %v6302_v51, %v6318_v1 }
  0xdf   : > { %v2017_v26 = vcombine.high %v1992_v30, %v2008_v45 }
  0xe0   : > { %1594 = vrot.lane.b32.xlu0 %v1564_v63, %s5836_s9  ;;  %v1819_v63 = vcombine.high %v6384_v56, %v7643_v3  ;;  %v1999_v37 = vrot.slane %v1985_v57, %v5961_v6  ;;  %v6409_v36 = vrot.slane %v2016_v58, %v6104_v22  ;;  %v2067_v46 = vrot.slane %v2060_v38, %v5961_v6 }
  0xe1   : > { %v6324_v4 = vpop.permute.xlu1 %2221  ;;  %v6327_v8 = vpop.permute.xlu0 %2217  ;;  %v2059_v59 = vrot.slane %v2052_v25, %v5961_v6  ;;  %v2031_v7 = vrot.slane %v2017_v26, %v6104_v22 }
  0xe2   : > { %1598 = vrot.lane.b32.xlu1 %v1547_v0, %s5835_s8  ;;  %v2015_v0 = vrot.slane %v2001_v34, %v5961_v6 }
  0xe4   : > { %1602 = vrot.lane.b32.xlu0 %v1565_v49, %s5838_s12  ;;  %v2032_v49 = vcombine.low %v1999_v37, %v2015_v0 }
  0xe5   : > { %v6342_v33 = vpop.permute.xlu1 %2229  ;;  %v6349_v40 = vpop.permute.xlu0 %2225 }
  0xe6   : > { %1606 = vrot.lane.b32.xlu1 %v1556_v53, %s5837_s10  ;;  %v2257_v51 = vcombine.low %v6324_v4, %v6342_v33  ;;  %v2241_v1 = vcombine.low %v6327_v8, %v6349_v40  ;;  %v2048_v53 = vcombine.high %v6409_v36, %v7643_v3  ;;  %v2258_v20 = vcombine.high %v6324_v4, %v6342_v33 }
  0xe7   : > { %v2242_v42 = vcombine.high %v6327_v8, %v6349_v40 }
  0xe8   : > { %1610 = vrot.lane.b32.xlu0 %v1566_v11, %s5840_s14  ;;  %v2265_v5 = vrot.slane %v2257_v51, %v5961_v6  ;;  %v2249_v28 = vrot.slane %v2241_v1, %v5961_v6  ;;  %v2272_v30 = vrot.slane %v2258_v20, %v5961_v6 }
  0xe9   : > { %v6366_v31 = vpop.permute.xlu1 %2223  ;;  %v6374_v10 = vpop.permute.xlu0 %2219  ;;  %v2256_v4 = vrot.slane %v2242_v42, %v5961_v6 }
  0xea   : > { %1614 = vrot.lane.b32.xlu1 %v1563_v32, %s5839_s13  ;;  %v2068_v32 = vcombine.low %v2059_v59, %v2067_v46  ;;  %v2273_v43 = vcombine.low %v2249_v28, %v2265_v5  ;;  %v2274_v33 = vcombine.high %v2249_v28, %v2265_v5 }
  0xec   : > { %1622 = vrot.lane.b32.xlu0 %v1592_v44, %s5836_s9  ;;  %v6436_v29 = vrot.slane %v2068_v32, %v6104_v22  ;;  %v6459_v34 = vrot.slane %v2273_v43, %v6104_v22 }
  0xed   : > { %v6381_v55 = vpop.permute.xlu1 %2231  ;;  %v2228_v62 = vpop.permute.xlu0 %2227 }
  0xee   : > { %1618 = vrot.lane.b32.xlu1 %v1567_v13, %s5841_s15  ;;  %v2040_v13 = vrot.slane %v2032_v49, %v6104_v22  ;;  %v2076_v8 = vcombine.high %v6436_v29, %v7643_v3  ;;  %v2317_v40 = vcombine.low %v6366_v31, %v6381_v55  ;;  %v2288_v55 = vrot.slane %v2274_v33, %v6104_v22 }
  0xef   : > { %v5842_v49 = vmov 0  }
  0xf0   : > { %1821 = vrot.lane.b32.xlu0 %v1791_v19, %s5836_s9  ;;  %v2049_v19 = vcombine.high %v2031_v7, %v7643_v3  ;;  %v2306_v25 = vcombine.high %v2288_v55, %v7643_v3 }
  0xf1   : > { %v6405_v18 = vpop.permute.xlu1 %346  ;;  %v6412_v2 = vpop.permute.xlu0 %342  ;;  %5709 = vset.pattern.permute.xlu0 %v5842_v49 }
  0xf2   : > { %1825 = vrot.lane.b32.xlu1 %v1774_v23, %s5835_s8  ;;  %v2033_v23 = vcombine.high %v1999_v37, %v2015_v0  ;;  %v2324_v0 = vrot.slane %v2317_v40, %v5961_v6 }
  0xf4   : > { %1829 = vrot.lane.b32.xlu0 %v1792_v41, %s5838_s12  ;;  %v2047_v45 = vrot.slane %v2033_v23, %v6104_v22 }
  0xf5   : > { %v6425_v11 = vpop.permute.xlu1 %354  ;;  %v6430_v44 = vpop.permute.xlu0 %350 }
  0xf6   : > { %1833 = vrot.lane.b32.xlu1 %v1783_v9, %s5837_s10  ;;  %v2050_v9 = vcombine.high %v2040_v13, %v7643_v3  ;;  %v2051_v58 = vcombine.high %v2047_v45, %v7643_v3 }
  0xf8   : > { %1837 = vrot.lane.b32.xlu0 %v1793_v54, %s5840_s14  ;;  %v2309_v54 = vcombine.low %v6374_v10, %v2228_v62  ;;  %v2305_v10 = vcombine.high %v6459_v34, %v7643_v3 }
  0xf9   : > { %v6442_v41 = vpop.permute.xlu1 %362  ;;  %v6446_v15 = vpop.permute.xlu0 %358 }
  0xfa   : > { %1841 = vrot.lane.b32.xlu1 %v1790_v60, %s5839_s13  ;;  %v2316_v31 = vrot.slane %v2309_v54, %v5961_v6 }
  0xfc   : > { %1849 = vrot.lane.b32.xlu0 %v1819_v63, %s5836_s9  ;;  %v2289_v63 = vcombine.low %v2256_v4, %v2272_v30  ;;  %v2325_v37 = vcombine.low %v2316_v31, %v2324_v0 }
  0xfd   : > { %v6461_v57 = vpop.permute.xlu1 %366  ;;  %v6465_v60 = vpop.permute.xlu0 %370 }
  0xfe   : > { %1845 = vrot.lane.b32.xlu1 %v1794_v21, %s5841_s15  ;;  %v2297_v26 = vrot.slane %v2289_v63, %v6104_v22  ;;  %v2290_v21 = vcombine.high %v2256_v4, %v2272_v30  ;;  %v6480_v46 = vrot.slane %v2325_v37, %v6104_v22 }
 0x100   : > { %2078 = vrot.lane.b32.xlu0 %v2048_v53, %s5836_s9  ;;  %v2307_v1 = vcombine.high %v2297_v26, %v7643_v3  ;;  %v2304_v53 = vrot.slane %v2290_v21, %v6104_v22  ;;  %v2333_v5 = vcombine.high %v6480_v46, %v7643_v3 }
 0x102   : > { %2082 = vrot.lane.b32.xlu1 %v2031_v7, %s5835_s8  ;;  %v374_v7 = vsel %vm373_vm0, %v6116_v35, %v6412_v2  ;;  %v2456_v35 = vld [vmem:[%s7638_s2] sm:$0xff] }
 0x103   : > { %v376_v28 = vsel %vm375_vm1, %v374_v7, %v6405_v18  ;;  %v5438_v7 = vld [vmem:[%s7637_s1 + $0x10] sm:$0xff] }
 0x104   : > { %2086 = vrot.lane.b32.xlu0 %v2049_v19, %s5838_s12  ;;  %v378_v18 = vsel %vm377_vm2, %v376_v28, %v6430_v44 }
 0x106   : > { %2090 = vrot.lane.b32.xlu1 %v2040_v13, %s5837_s10  ;;  %v2308_v13 = vcombine.high %v2304_v53, %v7643_v3 }
 0x108   : > { %2094 = vrot.lane.b32.xlu0 %v2050_v9, %s5840_s14  ;;  %v380_v9 = vsel %vm379_vm4, %v378_v18, %v6425_v11 }
 0x109   : > { %v382_v4 = vsel %vm381_vm5, %v380_v9, %v6446_v15  ;;  %v5431_v15 = vld [vmem:[%s7637_s1 + $0x8] sm:$0xff] }
 0x10a   : > { %2098 = vrot.lane.b32.xlu1 %v2047_v45, %s5839_s13  ;;  %v384_v40 = vsel %vm383_vm6, %v382_v4, %v6442_v41 }
 0x10b   : > { %v386_v31 = vsel %vm385_vm7, %v384_v40, %v6461_v57 }
 0x10c   : > { %2106 = vrot.lane.b32.xlu0 %v2076_v8, %s5836_s9 }
 0x10e   : > { %2102 = vrot.lane.b32.xlu1 %v2051_v58, %s5841_s15 }
 0x110   : > { %v521_v62 = vpop.permute.xlu1 %520  ;;  %2335 = vrot.lane.b32.xlu0 %v2305_v10, %s5836_s9 }
 0x112   : > { %2339 = vrot.lane.b32.xlu1 %v2288_v55, %s5835_s8  ;;  %v517_v38 = vpop.permute.xlu0 %516 }
 0x113   : > { %v547_v23 = vsel %vm373_vm0, %v6163_v61, %v517_v38  ;;  %v247_v38 = vld [vmem:[%s7637_s1] sm:$0xff] }
 0x114   : > { %2343 = vrot.lane.b32.xlu0 %v2306_v25, %s5838_s12  ;;  %v529_v59 = vpop.permute.xlu1 %528  ;;  %v548_v42 = vsel %vm375_vm1, %v547_v23, %v521_v62 }
 0x116   : > { %2347 = vrot.lane.b32.xlu1 %v2297_v26, %s5837_s10  ;;  %v525_v51 = vpop.permute.xlu0 %524 }
 0x117   : > { %v549_v61 = vsel %vm377_vm2, %v548_v42, %v525_v51 }
 0x118   : > { %2351 = vrot.lane.b32.xlu0 %v2307_v1, %s5840_s14  ;;  %v537_v19 = vpop.permute.xlu1 %536  ;;  %v550_v30 = vsel %vm379_vm4, %v549_v61, %v529_v59 }
 0x11a   : > { %2355 = vrot.lane.b32.xlu1 %v2304_v53, %s5839_s13  ;;  %v533_v32 = vpop.permute.xlu0 %532 }
 0x11c   : > { %2363 = vrot.lane.b32.xlu0 %v2333_v5, %s5836_s9 }
 0x11e   : > { %2359 = vrot.lane.b32.xlu1 %v2308_v13, %s5841_s15  ;;  %v545_v2 = vpop.permute.xlu0 %544 }
 0x11f   : > { %v554_v20 = vsel %vm373_vm0, %v6183_v39, %v545_v2  ;;  %v551_v39 = vsel %vm381_vm5, %v550_v30, %v533_v32  ;;  %v5451_v2 = vld [vmem:[%s7637_s1 + $0x18] sm:$0xff] }
 0x120   : > { %v858_v43 = vpop.permute.xlu1 %857  ;;  %5432 = vmatprep.subr.msk.mxu0 %vm559_vm3, %v554_v20  ;;  %2459 = vperm.xlu0 %5709, %v2456_v35   ;;  %v552_v58 = vsel %vm383_vm6, %v551_v39, %v537_v19 }
 0x122   : > { %v854_v45 = vpop.permute.xlu0 %853 }
 0x123   : > { %v884_v8 = vsel %vm373_vm0, %v6196_v50, %v854_v45  ;;  %v387_v50 = vsel %vm373_vm0, %v6148_v27, %v6465_v60 }
 0x124   : > { %v866_v44 = vpop.permute.xlu1 %865  ;;  %v885_v11 = vsel %vm375_vm1, %v884_v8, %v858_v43 }
 0x126   : > { %v862_v33 = vpop.permute.xlu0 %861 }
 0x127   : > { %v886_v63 = vsel %vm377_vm2, %v885_v11, %v862_v33  ;;  %v5463_v11 = vld [vmem:[%s7637_s1 + $0x20] sm:$0xff] }
 0x128   : > { %v541_v54 = vpop.permute.xlu1 %540  ;;  %v887_v10 = vsel %vm379_vm4, %v886_v63, %v866_v44 }
 0x129   : > { %v553_v0 = vsel %vm385_vm7, %v552_v58, %v541_v54 }
 0x12a   : > { %5433 = vmatpush1.msk.msra.mxu0 %vm559_vm3, %v553_v0  ;;  %v870_v41 = vpop.permute.xlu0 %869 }
 0x12b   : > { %5434 = vmatmul.mubr.msk.f32.vlgmr.msra.gmra.mrb[0].mxu0 %vm555_vm8, %v5431_v15  ;;  %5435 = vmatprep.subr.msk.mxu0 %vm559_vm3, %v387_v50  ;;  %v888_v62 = vsel %vm381_vm5, %v887_v10, %v870_v41 }
 0x12c   : > { %v874_v55 = vpop.permute.xlu1 %873  ;;  %5436 = vmatpush1.msk.msra.mxu0 %vm559_vm3, %v386_v31  ;;  %710 = vmatprep.mubr.f32.mxu0 %v7643_v3 }
 0x12d   : > { %v889_v37 = vsel %vm383_vm6, %v888_v62, %v874_v55 }
 0x12e   : > { %v882_v27 = vpop.permute.xlu0 %881 }
 0x12f   : > { %v891_v60 = vsel %vm373_vm0, %v6212_v14, %v882_v27 }
 0x130   : > { %v878_v57 = vpop.permute.xlu1 %877  ;;  %5439 = vmatprep.subr.msk.mxu0 %vm559_vm3, %v891_v60 }
 0x131   : > { %v890_v25 = vsel %vm385_vm7, %v889_v37, %v878_v57  ;;  %v5475_v57 = vld [vmem:[%s7637_s1 + $0x28] sm:$0xff] }
 0x132   : > { %v1081_v26 = vpop.permute.xlu0 %1080 }
 0x133   : > { %v1111_v21 = vsel %vm373_vm0, %v6218_v16, %v1081_v26  ;;  %5437 = vmatmul.mubr.msk.f32.vlgmr.msra.gmra.mrb[0].mxu0 %vm555_vm8, %v247_v38 }
 0x134   : > { %5440 = vmatpush1.msk.msra.mxu0 %vm559_vm3, %v890_v25  ;;  %v1085_v14 = vpop.permute.xlu1 %1084  ;;  %965 = vmatprep.mubr.f32.mxu0 %v7643_v3 }
 0x135   : > { %v1112_v59 = vsel %vm375_vm1, %v1111_v21, %v1085_v14 }
 0x136   : > { %v1089_v51 = vpop.permute.xlu0 %1088 }
 0x137   : > { %v1113_v1 = vsel %vm377_vm2, %v1112_v59, %v1089_v51 }
 0x138   : > { %v1093_v53 = vpop.permute.xlu1 %1092 }
 0x139   : > { %v1114_v32 = vsel %vm379_vm4, %v1113_v1, %v1093_v53 }
 0x13a   : > { %v1097_v16 = vpop.permute.xlu0 %1096 }
 0x13b   : > { %5441 = vmatmul.mubr.msk.f32.vlgmr.msra.gmra.mrb[0].mxu0 %vm555_vm8, %v5438_v7  ;;  %v1115_v28 = vsel %vm381_vm5, %v1114_v32, %v1097_v16 }
 0x13c   : > { %v1101_v5 = vpop.permute.xlu1 %1100  ;;  %1192 = vmatprep.mubr.f32.mxu0 %v7643_v3 }
 0x13d   : > { %v1116_v23 = vsel %vm383_vm6, %v1115_v28, %v1101_v5 }
 0x13e   : > { %v1109_v19 = vpop.permute.xlu0 %1108 }
 0x13f   : > { %v1118_v13 = vsel %vm373_vm0, %v6250_v47, %v1109_v19  ;;  %v5488_v19 = vld [vmem:[%s7637_s1 + $0x30] sm:$0xff] }
 0x140   : > { %v1105_v35 = vpop.permute.xlu1 %1104  ;;  %5452 = vmatprep.subr.msk.mxu0 %vm559_vm3, %v1118_v13 }
 0x141   : > { %v1117_v18 = vsel %vm385_vm7, %v1116_v23, %v1105_v35 }
 0x142   : > { %5453 = vmatpush1.msk.msra.mxu0 %vm559_vm3, %v1117_v18  ;;  %v1338_v20 = vpop.permute.xlu0 %1337 }
 0x143   : > { %v1368_v42 = vsel %vm373_vm0, %v6265_v48, %v1338_v20  ;;  %5454 = vmatmul.mubr.msk.f32.vlgmr.msra.gmra.mrb[0].mxu0 %vm555_vm8, %v5451_v2 }
 0x144   : > { %v1342_v47 = vpop.permute.xlu1 %1341  ;;  %1449 = vmatprep.mubr.f32.mxu0 %v7643_v3 }
 0x145   : > { %v1369_v43 = vsel %vm375_vm1, %v1368_v42, %v1342_v47 }
 0x146   : > { %v1346_v61 = vpop.permute.xlu0 %1345 }
 0x147   : > { %v1370_v9 = vsel %vm377_vm2, %v1369_v43, %v1346_v61 }
 0x148   : > { %v1350_v45 = vpop.permute.xlu1 %1349 }
 0x149   : > { %v1371_v30 = vsel %vm379_vm4, %v1370_v9, %v1350_v45 }
 0x14a   : > { %v1354_v44 = vpop.permute.xlu0 %1353 }
 0x14b   : > { %v1372_v39 = vsel %vm381_vm5, %v1371_v30, %v1354_v44 }
 0x14c   : > { %v1358_v4 = vpop.permute.xlu1 %1357 }
 0x14d   : > { %v1373_v33 = vsel %vm383_vm6, %v1372_v39, %v1358_v4  ;;  %v5500_v4 = vld [vmem:[%s7637_s1 + $0x38] sm:$0xff] }
 0x14e   : > { %v1366_v8 = vpop.permute.xlu0 %1365 }
 0x14f   : > { %v1375_v48 = vsel %vm373_vm0, %v6286_v24, %v1366_v8 }
 0x150   : > { %v1362_v40 = vpop.permute.xlu1 %1361  ;;  %5464 = vmatprep.subr.msk.mxu0 %vm559_vm3, %v1375_v48 }
 0x151   : > { %v1374_v54 = vsel %vm385_vm7, %v1373_v33, %v1362_v40 }
 0x152   : > { %5465 = vmatpush1.msk.msra.mxu0 %vm559_vm3, %v1374_v54  ;;  %v1595_v58 = vpop.permute.xlu0 %1594 }
 0x153   : > { %v1625_v15 = vsel %vm373_vm0, %v6306_v52, %v1595_v58  ;;  %5466 = vmatmul.mubr.msk.f32.vlgmr.msra.gmra.mrb[0].mxu0 %vm555_vm8, %v5463_v11 }
 0x154   : > { %v1599_v24 = vpop.permute.xlu1 %1598  ;;  %1706 = vmatprep.mubr.f32.mxu0 %v7643_v3 }
 0x155   : > { %v1626_v63 = vsel %vm375_vm1, %v1625_v15, %v1599_v24 }
 0x156   : > { %v1603_v0 = vpop.permute.xlu0 %1602 }
 0x157   : > { %v1627_v50 = vsel %vm377_vm2, %v1626_v63, %v1603_v0 }
 0x158   : > { %v1607_v41 = vpop.permute.xlu1 %1606 }
 0x159   : > { %v1628_v31 = vsel %vm379_vm4, %v1627_v50, %v1607_v41 }
 0x15a   : > { %v1611_v10 = vpop.permute.xlu0 %1610 }
 0x15b   : > { %v1629_v62 = vsel %vm381_vm5, %v1628_v31, %v1611_v10  ;;  %v5512_v31 = vld [vmem:[%s7637_s1 + $0x40] sm:$0xff] }
 0x15c   : > { %v1615_v55 = vpop.permute.xlu1 %1614 }
 0x15d   : > { %v1630_v60 = vsel %vm383_vm6, %v1629_v62, %v1615_v55 }
 0x15e   : > { %v1623_v27 = vpop.permute.xlu0 %1622 }
 0x15f   : > { %v1632_v52 = vsel %vm373_vm0, %v6332_v12, %v1623_v27 }
 0x160   : > { %v1619_v37 = vpop.permute.xlu1 %1618  ;;  %5476 = vmatprep.subr.msk.mxu0 %vm559_vm3, %v1632_v52 }
 0x161   : > { %v1631_v38 = vsel %vm385_vm7, %v1630_v60, %v1619_v37 }
 0x162   : > { %5477 = vmatpush1.msk.msra.mxu0 %vm559_vm3, %v1631_v38  ;;  %v1822_v25 = vpop.permute.xlu0 %1821 }
 0x163   : > { %v1852_v26 = vsel %vm373_vm0, %v6338_v17, %v1822_v25  ;;  %5478 = vmatmul.mubr.msk.f32.vlgmr.msra.gmra.mrb[0].mxu0 %vm555_vm8, %v5475_v57 }
 0x164   : > { %v1826_v12 = vpop.permute.xlu1 %1825  ;;  %1933 = vmatprep.mubr.f32.mxu0 %v7643_v3 }
 0x165   : > { %v1853_v21 = vsel %vm375_vm1, %v1852_v26, %v1826_v12 }
 0x166   : > { %v1830_v14 = vpop.permute.xlu0 %1829 }
 0x167   : > { %v1854_v59 = vsel %vm377_vm2, %v1853_v21, %v1830_v14 }
 0x168   : > { %v1834_v51 = vpop.permute.xlu1 %1833 }
 0x169   : > { %v1855_v1 = vsel %vm379_vm4, %v1854_v59, %v1834_v51 }
 0x16a   : > { %v1838_v53 = vpop.permute.xlu0 %1837 }
 0x16b   : > { %v1856_v32 = vsel %vm381_vm5, %v1855_v1, %v1838_v53 }
 0x16c   : > { %v1842_v7 = vpop.permute.xlu1 %1841 }
 0x16d   : > { %v1857_v5 = vsel %vm383_vm6, %v1856_v32, %v1842_v7 }
 0x16e   : > { %v1850_v16 = vpop.permute.xlu0 %1849 }
 0x16f   : > { %v1859_v17 = vsel %vm373_vm0, %v6384_v56, %v1850_v16 }
 0x170   : > { %v1846_v28 = vpop.permute.xlu1 %1845  ;;  %5489 = vmatprep.subr.msk.mxu0 %vm559_vm3, %v1859_v17 }
 0x171   : > { %v1858_v13 = vsel %vm385_vm7, %v1857_v5, %v1846_v28 }
 0x172   : > { %5490 = vmatpush1.msk.msra.mxu0 %vm559_vm3, %v1858_v13  ;;  %v2079_v23 = vpop.permute.xlu0 %2078 }
 0x173   : > { %v2109_v35 = vsel %vm373_vm0, %v6409_v36, %v2079_v23  ;;  %5491 = vmatmul.mubr.msk.f32.vlgmr.msra.gmra.mrb[0].mxu0 %vm555_vm8, %v5488_v19 }
 0x174   : > { %v2083_v56 = vpop.permute.xlu1 %2082  ;;  %2190 = vmatprep.mubr.f32.mxu0 %v7643_v3 }
 0x175   : > { %v2110_v2 = vsel %vm375_vm1, %v2109_v35, %v2083_v56 }
 0x176   : > { %v2087_v18 = vpop.permute.xlu0 %2086 }
 0x177   : > { %v2111_v20 = vsel %vm377_vm2, %v2110_v2, %v2087_v18 }
 0x178   : > { %v2091_v42 = vpop.permute.xlu1 %2090 }
 0x179   : > { %v2112_v47 = vsel %vm379_vm4, %v2111_v20, %v2091_v42 }
 0x17a   : > { %v2095_v43 = vpop.permute.xlu0 %2094 }
 0x17b   : > { %v2113_v9 = vsel %vm381_vm5, %v2112_v47, %v2095_v43 }
 0x17c   : > { %v2099_v61 = vpop.permute.xlu1 %2098 }
 0x17d   : > { %v2114_v30 = vsel %vm383_vm6, %v2113_v9, %v2099_v61 }
 0x17e   : > { %v2107_v45 = vpop.permute.xlu0 %2106 }
 0x17f   : > { %v2116_v36 = vsel %vm373_vm0, %v6436_v29, %v2107_v45 }
 0x180   : > { %v2103_v44 = vpop.permute.xlu1 %2102  ;;  %5501 = vmatprep.subr.msk.mxu0 %vm559_vm3, %v2116_v36 }
 0x181   : > { %v2115_v39 = vsel %vm385_vm7, %v2114_v30, %v2103_v44 }
 0x182   : > { %5502 = vmatpush1.msk.msra.mxu0 %vm559_vm3, %v2115_v39  ;;  %v2336_v8 = vpop.permute.xlu0 %2335 }
 0x183   : > { %v2366_v48 = vsel %vm373_vm0, %v6459_v34, %v2336_v8  ;;  %5503 = vmatmul.mubr.msk.f32.vlgmr.msra.gmra.mrb[0].mxu0 %vm555_vm8, %v5500_v4 }
 0x184   : > { %v2340_v29 = vpop.permute.xlu1 %2339  ;;  %2447 = vmatprep.mubr.f32.mxu0 %v7643_v3 }
 0x185   : > { %v2367_v33 = vsel %vm375_vm1, %v2366_v48, %v2340_v29 }
 0x186   : > { %v2344_v40 = vpop.permute.xlu0 %2343 }
 0x187   : > { %v2368_v11 = vsel %vm377_vm2, %v2367_v33, %v2344_v40 }
 0x188   : > { %v2348_v54 = vpop.permute.xlu1 %2347 }
 0x189   : > { %v2369_v58 = vsel %vm379_vm4, %v2368_v11, %v2348_v54 }
 0x18a   : > { %v2352_v15 = vpop.permute.xlu0 %2351 }
 0x18b   : > { %v2370_v63 = vsel %vm381_vm5, %v2369_v58, %v2352_v15 }
 0x18c   : > { %v2356_v24 = vpop.permute.xlu1 %2355 }
 0x18d   : > { %v2371_v50 = vsel %vm383_vm6, %v2370_v63, %v2356_v24 }
 0x18e   : > { %v2364_v0 = vpop.permute.xlu0 %2363 }
 0x18f   : > { %v2373_v34 = vsel %vm373_vm0, %v6480_v46, %v2364_v0 }
 0x190   : > { %v2360_v41 = vpop.permute.xlu1 %2359  ;;  %5513 = vmatprep.subr.msk.mxu0 %vm559_vm3, %v2373_v34 }
 0x191   : > { %v2372_v10 = vsel %vm385_vm7, %v2371_v50, %v2360_v41 }
 0x192   : > { %5514 = vmatpush1.msk.msra.mxu0 %vm559_vm3, %v2372_v10 }
 0x193   : > { %5515 = vmatmul.mubr.msk.f32.vlgmr.msra.gmra.mrb[0].mxu0 %vm555_vm8, %v5512_v31 }
 0x19f   : > { %v2460_v55 = vpop.permute.xlu0 %2459 }
 0x266   : > { %v2449_v62 = vpop.f32.mrb[0].mxu0 }
 0x267   : > { %v2462_v27 = vadd.f32 %v2460_v55, %v2449_v62  ;;  %v2451_v52 = vpop.f32.mrb[1].mxu0 }
 0x268   : > { %v2463_v46 = vadd.f32 %v2460_v55, %v2451_v52 }
 0x269   : > { %2471 = vrot.lane.b32.xlu0 %v2462_v27, %s5840_s14  ;;  %2465 = vrot.lane.b32.xlu1 %v2462_v27, %s5841_s15 }
 0x26a   : > { %v2633_v28 = vrot.slane %v2463_v46, %v5961_v6  ;;  %v2626_v29 = vcombine.high %v2463_v46, %v7643_v3 }
 0x26c   : > { %v2640_v24 = vrot.slane %v2626_v29, %v5961_v6 }
 0x26d   : > { %2477 = vrot.lane.b32.xlu0 %v2462_v27, %s5838_s12  ;;  %2468 = vrot.lane.b32.xlu1 %v2462_v27, %s5839_s13 }
 0x271   : > { %2483 = vrot.lane.b32.xlu0 %v2462_v27, %s5836_s9  ;;  %2474 = vrot.lane.b32.xlu1 %v2462_v27, %s5837_s10 }
 0x275   : > { %2480 = vrot.lane.b32.xlu1 %v2462_v27, %s5835_s8 }
 0x279   : > { %2487 = vrot.lane.b32.xlu1 %v2463_v46, %s5841_s15 }
 0x2db   : > { %v2472_v60 = vpop.permute.xlu0 %2471  ;;  %v2466_v37 = vpop.permute.xlu1 %2465 }
 0x2dc   : > { %v2506_v21 = vcombine.low %v2466_v37, %v2472_v60  ;;  %v2507_v9 = vcombine.high %v2466_v37, %v2472_v60 }
 0x2de   : > { %v2514_v1 = vrot.slane %v2506_v21, %v5961_v6  ;;  %v2521_v33 = vrot.slane %v2507_v9, %v5961_v6 }
 0x2df   : > { %v2478_v57 = vpop.permute.xlu0 %2477  ;;  %v2469_v38 = vpop.permute.xlu1 %2468 }
 0x2e0   : > { %v2490_v25 = vcombine.low %v2462_v27, %v2469_v38  ;;  %v2491_v47 = vcombine.high %v2462_v27, %v2469_v38 }
 0x2e2   : > { %v2498_v14 = vrot.slane %v2490_v25, %v5961_v6  ;;  %v2505_v39 = vrot.slane %v2491_v47, %v5961_v6 }
 0x2e3   : > { %v2484_v26 = vpop.permute.xlu0 %2483  ;;  %v2475_v12 = vpop.permute.xlu1 %2474 }
 0x2e4   : > { %v2538_v59 = vcombine.low %v2478_v57, %v2484_v26  ;;  %v2554_v7 = vcombine.low %v2498_v14, %v2514_v1  ;;  %v2555_v43 = vcombine.high %v2498_v14, %v2514_v1  ;;  %v2539_v61 = vcombine.high %v2478_v57, %v2484_v26 }
 0x2e5   : > { %v2570_v15 = vcombine.low %v2505_v39, %v2521_v33  ;;  %v2571_v27 = vcombine.high %v2505_v39, %v2521_v33 }
 0x2e6   : > { %v2546_v32 = vrot.slane %v2538_v59, %v5961_v6  ;;  %v2562_v13 = vrot.slane %v2554_v7, %v6104_v22  ;;  %v2569_v8 = vrot.slane %v2555_v43, %v6104_v22  ;;  %v2553_v48 = vrot.slane %v2539_v61, %v5961_v6 }
 0x2e7   : > { %v2481_v51 = vpop.permute.xlu1 %2480  ;;  %v2578_v41 = vrot.slane %v2570_v15, %v6104_v22  ;;  %v2585_v37 = vrot.slane %v2571_v27, %v6104_v22 }
 0x2e8   : > { %v2522_v53 = vcombine.low %v2475_v12, %v2481_v51  ;;  %v2523_v56 = vcombine.high %v2475_v12, %v2481_v51 }
 0x2ea   : > { %v2530_v16 = vrot.slane %v2522_v53, %v5961_v6  ;;  %v2537_v45 = vrot.slane %v2523_v56, %v5961_v6 }
 0x2eb   : > { %v2488_v17 = vpop.permute.xlu1 %2487 }
 0x2ec   : > { %v2586_v5 = vcombine.low %v2530_v16, %v2546_v32  ;;  %v2648_v19 = vrot.slane %v2488_v17, %v5961_v6  ;;  %v2587_v2 = vcombine.high %v2530_v16, %v2546_v32  ;;  %v2641_v44 = vcombine.high %v2488_v17, %v7643_v3 }
 0x2ed   : > { %v2602_v40 = vcombine.low %v2537_v45, %v2553_v48  ;;  %v2603_v31 = vcombine.high %v2537_v45, %v2553_v48 }
 0x2ee   : > { %v2594_v23 = vrot.slane %v2586_v5, %v6104_v22  ;;  %v2656_v35 = vcombine.low %v2633_v28, %v2648_v19  ;;  %v2657_v20 = vcombine.high %v2633_v28, %v2648_v19  ;;  %v2601_v36 = vrot.slane %v2587_v2, %v6104_v22 }
 0x2ef   : > { %v2655_v54 = vrot.slane %v2641_v44, %v5961_v6  ;;  %v2610_v63 = vrot.slane %v2602_v40, %v6104_v22  ;;  %v2617_v52 = vrot.slane %v2603_v31, %v6104_v22 }
 0x2f0   : > { %v2618_v18 = vcombine.low %v2562_v13, %v2594_v23  ;;  %v2664_v42 = vrot.slane %v2656_v35, %v6104_v22  ;;  %v2619_v30 = vcombine.high %v2562_v13, %v2594_v23  ;;  %v2671_v4 = vrot.slane %v2657_v20, %v6104_v22 }
 0x2f1   : > { %v2620_v11 = vcombine.low %v2569_v8, %v2601_v36  ;;  %v2621_v0 = vcombine.high %v2569_v8, %v2601_v36  ;;  %v2672_v34 = vcombine.low %v2640_v24, %v2655_v54  ;;  %v2622_v10 = vcombine.low %v2578_v41, %v2610_v63 }
 0x2f2   : > { %2708 = vrot.lane.b32.xlu0 %v2618_v18, %s5843_s16  ;;  %2710 = vrot.lane.b32.xlu1 %v2664_v42, %s5843_s16  ;;  %v2688_v58 = vcombine.high %v2664_v42, %v7643_v3  ;;  %v2689_v50 = vcombine.high %v2671_v4, %v7643_v3  ;;  %v2673_v55 = vcombine.high %v2640_v24, %v2655_v54  ;;  %v5844_v35 = vmov (!%p5516_p13), 0.0  }
 0x2f3   : > { %v2680_v62 = vrot.slane %v2672_v34, %v6104_v22  ;;  %v2623_v46 = vcombine.high %v2578_v41, %v2610_v63  ;;  %v2624_v57 = vcombine.low %v2585_v37, %v2617_v52  ;;  %v2625_v25 = vcombine.high %v2585_v37, %v2617_v52 }
 0x2f4   : > { %v2687_v60 = vrot.slane %v2673_v55, %v6104_v22 }
 0x2f5   : > { %v2690_v38 = vcombine.high %v2680_v62, %v7643_v3 }
 0x2f6   : > { %2712 = vrot.lane.b32.xlu0 %v2619_v30, %s5843_s16  ;;  %2718 = vrot.lane.b32.xlu1 %v2671_v4, %s5843_s16  ;;  %v2691_v26 = vcombine.high %v2687_v60, %v7643_v3 }
 0x2fa   : > { %2716 = vrot.lane.b32.xlu0 %v2620_v11, %s5843_s16  ;;  %2714 = vrot.lane.b32.xlu1 %v2688_v58, %s5843_s16 }
 0x2fe   : > { %2720 = vrot.lane.b32.xlu0 %v2621_v0, %s5843_s16  ;;  %2722 = vrot.lane.b32.xlu1 %v2689_v50, %s5843_s16 }
 0x302   : > { %2724 = vrot.lane.b32.xlu0 %v2622_v10, %s5843_s16  ;;  %2726 = vrot.lane.b32.xlu1 %v2680_v62, %s5843_s16 }
 0x306   : > { %2728 = vrot.lane.b32.xlu0 %v2623_v46, %s5843_s16  ;;  %2734 = vrot.lane.b32.xlu1 %v2687_v60, %s5843_s16 }
 0x30a   : > { %2732 = vrot.lane.b32.xlu0 %v2624_v57, %s5843_s16  ;;  %2730 = vrot.lane.b32.xlu1 %v2690_v38, %s5843_s16 }
 0x30e   : > { %2736 = vrot.lane.b32.xlu0 %v2625_v25, %s5843_s16  ;;  %2738 = vrot.lane.b32.xlu1 %v2691_v26, %s5843_s16 }
 0x364   : > { %v2709_v12 = vpop.permute.xlu0 %2708  ;;  %v2711_v21 = vpop.permute.xlu1 %2710 }
 0x365   : > { %2757 = vst.msk [vmem:[#allocation2] sm:$0xff] %vm2756_vm9, %v2709_v12 }
 0x366   : > { %2775 = vst.msk [vmem:[#allocation2] sm:$0xff] %vm2774_vm10, %v7643_v3 }
 0x367   : > { %2759 = vst.msk [vmem:[#allocation2 + $0x8] sm:$0x3] %vm2758_vm11, %v2711_v21 }
 0x368   : > { %2793 = vst.msk [vmem:[#allocation2] sm:$0xff] %vm2792_vm12, %v7643_v3  ;;  %v2713_v14 = vpop.permute.xlu0 %2712  ;;  %v2719_v59 = vpop.permute.xlu1 %2718 }
 0x369   : > { %2777 = vst.msk [vmem:[#allocation2 + $0x8] sm:$0x3] %vm2776_vm13, %v7643_v3 }
 0x36a   : > { %2795 = vst.msk [vmem:[#allocation2 + $0x8] sm:$0x3] %vm2794_vm14, %v7643_v3 }
 0x36b   : > { %2760 = vst.msk [vmem:[#allocation2 + $0x10] sm:$0xff] %vm2756_vm9, %v2713_v14 }
 0x36c   : > { %2778 = vst.msk [vmem:[#allocation2 + $0x10] sm:$0xff] %vm2774_vm10, %v7643_v3  ;;  %v2717_v51 = vpop.permute.xlu0 %2716  ;;  %v2715_v1 = vpop.permute.xlu1 %2714 }
 0x36d   : > { %2763 = vst.msk [vmem:[#allocation2 + $0x28] sm:$0x3] %vm2758_vm11, %v2719_v59  ;;  %2761 = vst.msk [vmem:[#allocation2 + $0x18] sm:$0x3] %vm2758_vm11, %v2715_v1 }
 0x36e   : > { %2796 = vst.msk [vmem:[#allocation2 + $0x10] sm:$0xff] %vm2792_vm12, %v7643_v3 }
 0x36f   : > { %2781 = vst.msk [vmem:[#allocation2 + $0x28] sm:$0x3] %vm2776_vm13, %v7643_v3  ;;  %2779 = vst.msk [vmem:[#allocation2 + $0x18] sm:$0x3] %vm2776_vm13, %v7643_v3 }
 0x370   : > { %2799 = vst.msk [vmem:[#allocation2 + $0x28] sm:$0x3] %vm2794_vm14, %v7643_v3  ;;  %2797 = vst.msk [vmem:[#allocation2 + $0x18] sm:$0x3] %vm2794_vm14, %v7643_v3  ;;  %v2721_v53 = vpop.permute.xlu0 %2720  ;;  %v2723_v7 = vpop.permute.xlu1 %2722 }
 0x371   : > { %2762 = vst.msk [vmem:[#allocation2 + $0x20] sm:$0xff] %vm2756_vm9, %v2717_v51  ;;  %2764 = vst.msk [vmem:[#allocation2 + $0x30] sm:$0xff] %vm2756_vm9, %v2721_v53 }
 0x372   : > { %2780 = vst.msk [vmem:[#allocation2 + $0x20] sm:$0xff] %vm2774_vm10, %v7643_v3  ;;  %2782 = vst.msk [vmem:[#allocation2 + $0x30] sm:$0xff] %vm2774_vm10, %v7643_v3 }
 0x373   : > { %2798 = vst.msk [vmem:[#allocation2 + $0x20] sm:$0xff] %vm2792_vm12, %v7643_v3  ;;  %2800 = vst.msk [vmem:[#allocation2 + $0x30] sm:$0xff] %vm2792_vm12, %v7643_v3 }
 0x374   : > { %2765 = vst.msk [vmem:[#allocation2 + $0x38] sm:$0x3] %vm2758_vm11, %v2723_v7  ;;  %v2725_v32 = vpop.permute.xlu0 %2724  ;;  %v2727_v16 = vpop.permute.xlu1 %2726 }
 0x375   : > { %2783 = vst.msk [vmem:[#allocation2 + $0x38] sm:$0x3] %vm2776_vm13, %v7643_v3 }
 0x376   : > { %2801 = vst.msk [vmem:[#allocation2 + $0x38] sm:$0x3] %vm2794_vm14, %v7643_v3 }
 0x377   : > { %2766 = vst.msk [vmem:[#allocation2 + $0x40] sm:$0xff] %vm2756_vm9, %v2725_v32 }
 0x378   : > { %2784 = vst.msk [vmem:[#allocation2 + $0x40] sm:$0xff] %vm2774_vm10, %v7643_v3  ;;  %v2729_v17 = vpop.permute.xlu0 %2728  ;;  %v2735_v5 = vpop.permute.xlu1 %2734 }
 0x379   : > { %2767 = vst.msk [vmem:[#allocation2 + $0x48] sm:$0x3] %vm2758_vm11, %v2727_v16  ;;  %2771 = vst.msk [vmem:[#allocation2 + $0x68] sm:$0x3] %vm2758_vm11, %v2735_v5 }
 0x37a   : > { %2802 = vst.msk [vmem:[#allocation2 + $0x40] sm:$0xff] %vm2792_vm12, %v7643_v3 }
 0x37b   : > { %2785 = vst.msk [vmem:[#allocation2 + $0x48] sm:$0x3] %vm2776_vm13, %v7643_v3  ;;  %2789 = vst.msk [vmem:[#allocation2 + $0x68] sm:$0x3] %vm2776_vm13, %v7643_v3 }
 0x37c   : > { %2803 = vst.msk [vmem:[#allocation2 + $0x48] sm:$0x3] %vm2794_vm14, %v7643_v3  ;;  %2807 = vst.msk [vmem:[#allocation2 + $0x68] sm:$0x3] %vm2794_vm14, %v7643_v3  ;;  %v2733_v28 = vpop.permute.xlu0 %2732  ;;  %v2731_v19 = vpop.permute.xlu1 %2730 }
 0x37d   : > { %2768 = vst.msk [vmem:[#allocation2 + $0x50] sm:$0xff] %vm2756_vm9, %v2729_v17  ;;  %2770 = vst.msk [vmem:[#allocation2 + $0x60] sm:$0xff] %vm2756_vm9, %v2733_v28 }
 0x37e   : > { %2786 = vst.msk [vmem:[#allocation2 + $0x50] sm:$0xff] %vm2774_vm10, %v7643_v3  ;;  %2788 = vst.msk [vmem:[#allocation2 + $0x60] sm:$0xff] %vm2774_vm10, %v7643_v3 }
 0x37f   : > { %2804 = vst.msk [vmem:[#allocation2 + $0x50] sm:$0xff] %vm2792_vm12, %v7643_v3  ;;  %2806 = vst.msk [vmem:[#allocation2 + $0x60] sm:$0xff] %vm2792_vm12, %v7643_v3 }
 0x380   : > { %2769 = vst.msk [vmem:[#allocation2 + $0x58] sm:$0x3] %vm2758_vm11, %v2731_v19  ;;  %v2737_v13 = vpop.permute.xlu0 %2736  ;;  %v2739_v23 = vpop.permute.xlu1 %2738 }
 0x381   : > { %2787 = vst.msk [vmem:[#allocation2 + $0x58] sm:$0x3] %vm2776_vm13, %v7643_v3 }
 0x382   : > { %2805 = vst.msk [vmem:[#allocation2 + $0x58] sm:$0x3] %vm2794_vm14, %v7643_v3  ;;  %2813 = sbr.rel (%p5516_p13) target bundleno = 909 (0x38d), region = 44 }
 0x383   : > { %2772 = vst.msk [vmem:[#allocation2 + $0x70] sm:$0xff] %vm2756_vm9, %v2737_v13 }
 0x384   : > { %2790 = vst.msk [vmem:[#allocation2 + $0x70] sm:$0xff] %vm2774_vm10, %v7643_v3 }
 0x385   : > { %2773 = vst.msk [vmem:[#allocation2 + $0x78] sm:$0x3] %vm2758_vm11, %v2739_v23 }
 0x386   : > { %2808 = vst.msk [vmem:[#allocation2 + $0x70] sm:$0xff] %vm2792_vm12, %v7643_v3 }
 0x387   : > { %2791 = vst.msk [vmem:[#allocation2 + $0x78] sm:$0x3] %vm2776_vm13, %v7643_v3 }
 0x388   : > { %2809 = vst.msk [vmem:[#allocation2 + $0x78] sm:$0x3] %vm2794_vm14, %v7643_v3 }
 0x389   : > { %2815 = vst.msk [vmem:[#allocation2] sm:$0x1] %vm2814_vm15, %v5844_v35  ;;  %2816 = vst.msk [vmem:[#allocation2 + $0x10] sm:$0x1] %vm2814_vm15, %v5844_v35 }
 0x38a   : > { %2817 = vst.msk [vmem:[#allocation2 + $0x20] sm:$0x1] %vm2814_vm15, %v5844_v35  ;;  %2818 = vst.msk [vmem:[#allocation2 + $0x30] sm:$0x1] %vm2814_vm15, %v5844_v35 }
 0x38b   : > { %2819 = vst.msk [vmem:[#allocation2 + $0x40] sm:$0x1] %vm2814_vm15, %v5844_v35  ;;  %2820 = vst.msk [vmem:[#allocation2 + $0x50] sm:$0x1] %vm2814_vm15, %v5844_v35 }
 0x38c   : > { %2821 = vst.msk [vmem:[#allocation2 + $0x60] sm:$0x1] %vm2814_vm15, %v5844_v35  ;;  %2822 = vst.msk [vmem:[#allocation2 + $0x70] sm:$0x1] %vm2814_vm15, %v5844_v35 }
 0x38d PF: > { %p5517_p0 = scmp.ne.s32.totalorder %s5812_s21, 1 }
 0x38e   : > { %vm2827_vm3 = vcmask (!%p5517_p0), 139264   ;;  %v5845_v56 = vmov (!%p5517_p0), 0.0  }
 0x38f   : > { %2826 = sbr.rel (%p5517_p0) target bundleno = 918 (0x396), region = 48  ;;  %2828 = vst.msk [vmem:[#allocation2 + $0x9] sm:$0x1] (!%p5517_p0), %vm2827_vm3, %v5845_v56  ;;  %2829 = vst.msk [vmem:[#allocation2 + $0x19] sm:$0x1] (!%p5517_p0), %vm2827_vm3, %v5845_v56 }
 0x390   : > { %2830 = vst.msk [vmem:[#allocation2 + $0x29] sm:$0x1] (!%p5517_p0), %vm2827_vm3, %v5845_v56  ;;  %2831 = vst.msk [vmem:[#allocation2 + $0x39] sm:$0x1] (!%p5517_p0), %vm2827_vm3, %v5845_v56 }
 0x391   : > { %2832 = vst.msk [vmem:[#allocation2 + $0x49] sm:$0x1] (!%p5517_p0), %vm2827_vm3, %v5845_v56  ;;  %2833 = vst.msk [vmem:[#allocation2 + $0x59] sm:$0x1] (!%p5517_p0), %vm2827_vm3, %v5845_v56 }
 0x392   : > { %2834 = vst.msk [vmem:[#allocation2 + $0x69] sm:$0x1] (!%p5517_p0), %vm2827_vm3, %v5845_v56  ;;  %2835 = vst.msk [vmem:[#allocation2 + $0x79] sm:$0x1] (!%p5517_p0), %vm2827_vm3, %v5845_v56 }
 0x396 PF: > { %v2838_v2 = vld [vmem:[#allocation2 + $0x20] sm:$0xff]  ;;  %5559 = vmatprep.subr.mxu1 %v7643_v3  ;;  %5728 = vset.pattern.permute.xlu1 %v5842_v49  ;;  %v2839_v47 = vld [vmem:[#allocation2 + $0x30] sm:$0xff]  ;;  %vm5846_vm8 = vmmov 0   ;;  %vm3221_vm9 = vcmask 64512  }
 0x397   : > { %v2836_v18 = vld [vmem:[#allocation2] sm:$0xff]  ;;  %3030 = vrot.lane.b32.xlu1 %v2838_v2, %s5832_s27  ;;  %v2837_v43 = vld [vmem:[#allocation2 + $0x10] sm:$0xff]  ;;  %5729 = vset.pattern.permute.xlu0 %v5842_v49 }
 0x398   : > { %3026 = vrot.lane.b32.xlu0 %v2836_v18, %s5832_s27  ;;  %v2845_v20 = vcombine.low %v2836_v18, %v2838_v2  ;;  %v2846_v42 = vcombine.high %v2836_v18, %v2838_v2  ;;  %v2861_v61 = vcombine.low %v2837_v43, %v2839_v47  ;;  %v2862_v9 = vcombine.high %v2837_v43, %v2839_v47  ;;  %v2841_v45 = vld [vmem:[#allocation2 + $0x50] sm:$0xff]  ;;  %v2840_v4 = vld [vmem:[#allocation2 + $0x40] sm:$0xff] }
 0x399   : > { %v2843_v36 = vld [vmem:[#allocation2 + $0x70] sm:$0xff]  ;;  %v2842_v48 = vld [vmem:[#allocation2 + $0x60] sm:$0xff]  ;;  %5561 = vmatprep.mubr.msk.f32.mxu1 %vm5846_vm8, %v7643_v3 }
 0x39a   : > { %v6798_v30 = vrot.slane %v2845_v20, %v5961_v6  ;;  %v2860_v44 = vrot.slane %v2846_v42, %v5961_v6  ;;  %v2893_v39 = vcombine.low %v2841_v45, %v2843_v36  ;;  %v2894_v8 = vcombine.high %v2841_v45, %v2843_v36  ;;  %v3911_v21 = vld [vmem:[#allocation2 + $0x11] sm:$0xff]  ;;  %v3910_v14 = vld [vmem:[#allocation2 + $0x1] sm:$0xff] }
 0x39b   : > { %v6802_v29 = vrot.slane %v2861_v61, %v5961_v6  ;;  %v2876_v33 = vrot.slane %v2862_v9, %v5961_v6  ;;  %v2877_v40 = vcombine.low %v2840_v4, %v2842_v48  ;;  %v2878_v11 = vcombine.high %v2840_v4, %v2842_v48  ;;  %3032 = vrot.lane.b32.xlu1 %v2839_v47, %s5832_s27  ;;  %v3913_v59 = vld [vmem:[#allocation2 + $0x31] sm:$0xff]  ;;  %v3912_v51 = vld [vmem:[#allocation2 + $0x21] sm:$0xff] }
 0x39c   : > { %3028 = vrot.lane.b32.xlu0 %v2837_v43, %s5832_s27  ;;  %v6808_v49 = vrot.slane %v2893_v39, %v5961_v6  ;;  %v2908_v54 = vrot.slane %v2894_v8, %v5961_v6  ;;  %v3915_v1 = vld [vmem:[#allocation2 + $0x51] sm:$0xff]  ;;  %v3914_v53 = vld [vmem:[#allocation2 + $0x41] sm:$0xff]  ;;  %v3665_v16 = vcombine.low %v3910_v14, %v3912_v51  ;;  %v3681_v17 = vcombine.low %v3911_v21, %v3913_v59 }
 0x39d   : > { %v6812_v58 = vrot.slane %v2877_v40, %v5961_v6  ;;  %v2892_v15 = vrot.slane %v2878_v11, %v5961_v6  ;;  %v2909_v24 = vcombine.low %v6798_v30, %v6802_v29  ;;  %v2910_v63 = vcombine.high %v6798_v30, %v6802_v29  ;;  %v3917_v7 = vld [vmem:[#allocation2 + $0x71] sm:$0xff]  ;;  %v3916_v32 = vld [vmem:[#allocation2 + $0x61] sm:$0xff] }
 0x39e   : > { %v2925_v0 = vcombine.low %v2860_v44, %v2876_v33  ;;  %v2926_v34 = vcombine.high %v2860_v44, %v2876_v33  ;;  %v3697_v5 = vcombine.low %v3914_v53, %v3916_v32  ;;  %v3713_v28 = vcombine.low %v3915_v1, %v3917_v7 }
 0x39f   : > { %v2941_v50 = vcombine.low %v6812_v58, %v6808_v49  ;;  %v6822_v41 = vrot.slane %v2910_v63, %v6104_v22  ;;  %v2942_v31 = vcombine.high %v6812_v58, %v6808_v49  ;;  %3036 = vrot.lane.b32.xlu1 %v2841_v45, %s5832_s27  ;;  %v2957_v55 = vcombine.low %v2892_v15, %v2908_v54 }
 0x3a0   : > { %3034 = vrot.lane.b32.xlu0 %v2840_v4, %s5832_s27  ;;  %v6829_v10 = vrot.slane %v2925_v0, %v6104_v22  ;;  %v6835_v27 = vrot.slane %v2926_v34, %v6104_v22  ;;  %v2958_v52 = vcombine.high %v2892_v15, %v2908_v54  ;;  %v6866_v19 = vrot.slane %v3665_v16, %v5961_v6 }
 0x3a1   : > { %v6832_v62 = vrot.slane %v2942_v31, %v6104_v22  ;;  %v6838_v46 = vrot.slane %v2957_v55, %v6104_v22  ;;  %v6869_v13 = vrot.slane %v3681_v17, %v5961_v6  ;;  %v6872_v23 = vrot.slane %v3697_v5, %v5961_v6  ;;  %v4742_v17 = vld [vmem:[#allocation2 + $0x32] sm:$0xff]  ;;  %v4741_v5 = vld [vmem:[#allocation2 + $0x22] sm:$0xff] }
 0x3a2   : > { %v6845_v57 = vrot.slane %v2958_v52, %v6104_v22  ;;  %v6875_v35 = vrot.slane %v3713_v28, %v5961_v6  ;;  %v3666_v61 = vcombine.high %v3910_v14, %v3912_v51  ;;  %v3682_v9 = vcombine.high %v3911_v21, %v3913_v59 }
 0x3a3   : > { %v2975_v60 = vcombine.low %v6822_v41, %v6832_v62  ;;  %v2976_v37 = vcombine.high %v6822_v41, %v6832_v62  ;;  %3040 = vrot.lane.b32.xlu1 %v2843_v36, %s5832_s27  ;;  %v2978_v38 = vcombine.high %v6829_v10, %v6838_v46  ;;  %v2977_v25 = vcombine.low %v6829_v10, %v6838_v46 }
 0x3a4   : > { %3038 = vrot.lane.b32.xlu0 %v2842_v48, %s5832_s27  ;;  %v2979_v26 = vcombine.low %v6835_v27, %v6845_v57  ;;  %v2980_v12 = vcombine.high %v6835_v27, %v6845_v57  ;;  %v3729_v56 = vcombine.low %v6866_v19, %v6869_v13  ;;  %v3762_v20 = vcombine.high %v6872_v23, %v6875_v35 }
 0x3a5   : > { %v3680_v44 = vrot.slane %v3666_v61, %v5961_v6 }
 0x3a7   : > { %3388 = vrot.lane.b32.xlu1 %v2837_v43, %s5833_s30 }
 0x3a8   : > { %3386 = vrot.lane.b32.xlu0 %v2836_v18, %s5833_s30  ;;  %v3730_v18 = vcombine.high %v6866_v19, %v6869_v13 }
 0x3aa   : > { %v6890_v42 = vrot.slane %v3730_v18, %v6104_v22 }
 0x3ab   : > { %3392 = vrot.lane.b32.xlu1 %v2839_v47, %s5833_s30  ;;  %v6893_v47 = vrot.slane %v3762_v20, %v6104_v22 }
 0x3ac   : > { %3390 = vrot.lane.b32.xlu0 %v2838_v2, %s5833_s30  ;;  %v3761_v2 = vcombine.low %v6872_v23, %v6875_v35 }
 0x3ad   : > { %v3795_v43 = vcombine.low %v6890_v42, %v6893_v47  ;;  %v3796_v8 = vcombine.high %v6890_v42, %v6893_v47 }
 0x3af   : > { %3396 = vrot.lane.b32.xlu1 %v2841_v45, %s5833_s30  ;;  %v3698_v45 = vcombine.high %v3914_v53, %v3916_v32 }
 0x3b0   : > { %3394 = vrot.lane.b32.xlu0 %v2840_v4, %s5833_s30  ;;  %v3696_v4 = vrot.slane %v3682_v9, %v5961_v6 }
 0x3b1   : > { %v3712_v39 = vrot.slane %v3698_v45, %v5961_v6 }
 0x3b2   : > { %v3745_v33 = vcombine.low %v3680_v44, %v3696_v4  ;;  %v3746_v15 = vcombine.high %v3680_v44, %v3696_v4 }
 0x3b3   : > { %3400 = vrot.lane.b32.xlu1 %v2843_v36, %s5833_s30  ;;  %v3714_v36 = vcombine.high %v3915_v1, %v3917_v7 }
 0x3b4   : > { %3398 = vrot.lane.b32.xlu0 %v2842_v48, %s5833_s30  ;;  %v6908_v11 = vrot.slane %v3745_v33, %v6104_v22  ;;  %v6918_v34 = vrot.slane %v3746_v15, %v6104_v22 }
 0x3b5   : > { %v3728_v48 = vrot.slane %v3714_v36, %v5961_v6 }
 0x3b7   : > { %3930 = vrot.lane.b32.xlu1 %v3911_v21, %s5832_s27  ;;  %v3777_v40 = vcombine.low %v3712_v39, %v3728_v48  ;;  %v3778_v63 = vcombine.high %v3712_v39, %v3728_v48 }
 0x3b8   : > { %3928 = vrot.lane.b32.xlu0 %v3910_v14, %s5832_s27 }
 0x3b9   : > { %v6911_v54 = vrot.slane %v3777_v40, %v6104_v22  ;;  %v6921_v31 = vrot.slane %v3778_v63, %v6104_v22 }
 0x3bb   : > { %3934 = vrot.lane.b32.xlu1 %v3913_v59, %s5832_s27  ;;  %v3798_v0 = vcombine.high %v6908_v11, %v6911_v54  ;;  %v3799_v55 = vcombine.low %v6918_v34, %v6921_v31  ;;  %v3797_v52 = vcombine.low %v6908_v11, %v6911_v54  ;;  %v3800_v16 = vcombine.high %v6918_v34, %v6921_v31 }
 0x3bc   : > { %3932 = vrot.lane.b32.xlu0 %v3912_v51, %s5832_s27 }
 0x3bf   : > { %3938 = vrot.lane.b32.xlu1 %v3915_v1, %s5832_s27 }
 0x3c0   : > { %3936 = vrot.lane.b32.xlu0 %v3914_v53, %s5832_s27 }
 0x3c3   : > { %3942 = vrot.lane.b32.xlu1 %v3917_v7, %s5832_s27 }
 0x3c4   : > { %3940 = vrot.lane.b32.xlu0 %v3916_v32, %s5832_s27 }
 0x3c7   : > { %4217 = vrot.lane.b32.xlu1 %v3911_v21, %s5833_s30  ;;  %v4740_v21 = vld [vmem:[#allocation2 + $0x12] sm:$0xff] }
 0x3c8   : > { %4215 = vrot.lane.b32.xlu0 %v3910_v14, %s5833_s30  ;;  %v4739_v14 = vld [vmem:[#allocation2 + $0x2] sm:$0xff]  ;;  %v4511_v4 = vcombine.high %v4740_v21, %v4742_v17 }
 0x3c9   : > { %v4495_v44 = vcombine.high %v4739_v14, %v4741_v5 }
 0x3ca   : > { %v4525_v15 = vrot.slane %v4511_v4, %v5961_v6 }
 0x3cb   : > { %4221 = vrot.lane.b32.xlu1 %v3913_v59, %s5833_s30  ;;  %v4744_v59 = vld [vmem:[#allocation2 + $0x52] sm:$0xff]  ;;  %v4509_v40 = vrot.slane %v4495_v44, %v5961_v6 }
 0x3cc   : > { %4219 = vrot.lane.b32.xlu0 %v3912_v51, %s5833_s30  ;;  %v4743_v51 = vld [vmem:[#allocation2 + $0x42] sm:$0xff] }
 0x3cd   : > { %v4575_v29 = vcombine.high %v4509_v40, %v4525_v15 }
 0x3cf   : > { %4225 = vrot.lane.b32.xlu1 %v3915_v1, %s5833_s30  ;;  %v4746_v1 = vld [vmem:[#allocation2 + $0x72] sm:$0xff]  ;;  %v7015_v49 = vrot.slane %v4575_v29, %v6104_v22 }
 0x3d0   : > { %4223 = vrot.lane.b32.xlu0 %v3914_v53, %s5833_s30  ;;  %v4745_v53 = vld [vmem:[#allocation2 + $0x62] sm:$0xff]  ;;  %v4542_v18 = vcombine.low %v4744_v59, %v4746_v1  ;;  %v4543_v33 = vcombine.high %v4744_v59, %v4746_v1 }
 0x3d1   : > { %v4526_v28 = vcombine.low %v4743_v51, %v4745_v53  ;;  %v4527_v39 = vcombine.high %v4743_v51, %v4745_v53 }
 0x3d2   : > { %v6953_v45 = vrot.slane %v4542_v18, %v5961_v6 }
 0x3d3   : > { %4229 = vrot.lane.b32.xlu1 %v3917_v7, %s5833_s30  ;;  %v4494_v7 = vcombine.low %v4739_v14, %v4741_v5  ;;  %v6950_v9 = vrot.slane %v4526_v28, %v5961_v6  ;;  %v4541_v63 = vrot.slane %v4527_v39, %v5961_v6 }
 0x3d4   : > { %4227 = vrot.lane.b32.xlu0 %v3916_v32, %s5833_s30  ;;  %v4510_v32 = vcombine.low %v4740_v21, %v4742_v17 }
 0x3d5   : > { %v6944_v20 = vrot.slane %v4494_v7, %v5961_v6  ;;  %v4557_v7 = vrot.slane %v4543_v33, %v5961_v6  ;;  %v4591_v18 = vcombine.high %v6950_v9, %v6953_v45 }
 0x3d6   : > { %v6947_v61 = vrot.slane %v4510_v32, %v5961_v6  ;;  %v4574_v32 = vcombine.low %v4509_v40, %v4525_v15 }
 0x3d7   : > { %4759 = vrot.lane.b32.xlu1 %v4740_v21, %s5832_s27  ;;  %v4606_v48 = vcombine.low %v4541_v63, %v4557_v7  ;;  %v6978_v44 = vrot.slane %v4591_v18, %v6104_v22 }
 0x3d8   : > { %4757 = vrot.lane.b32.xlu0 %v4739_v14, %s5832_s27  ;;  %v4559_v28 = vcombine.high %v6944_v20, %v6947_v61 }
 0x3d9   : > { %v6981_v4 = vrot.slane %v4606_v48, %v6104_v22  ;;  %v6999_v48 = vrot.slane %v2941_v50, %v6104_v22 }
 0x3db   : > { %4763 = vrot.lane.b32.xlu1 %v4742_v17, %s5832_s27 }
 0x3dc   : > { %4761 = vrot.lane.b32.xlu0 %v4741_v5, %s5832_s27 }
 0x3df   : > { %4767 = vrot.lane.b32.xlu1 %v4744_v59, %s5832_s27 }
 0x3e0   : > { %4765 = vrot.lane.b32.xlu0 %v4743_v51, %s5832_s27 }
 0x3e3   : > { %4771 = vrot.lane.b32.xlu1 %v4746_v1, %s5832_s27 }
 0x3e4   : > { %4769 = vrot.lane.b32.xlu0 %v4745_v53, %s5832_s27  ;;  %s5537_s27 = sshll.u32 %s5816_s22, 1 }
 0x3e7   : > { %5046 = vrot.lane.b32.xlu1 %v4740_v21, %s5833_s30  ;;  %v6972_v21 = vrot.slane %v4574_v32, %v6104_v22 }
 0x3e8   : > { %5044 = vrot.lane.b32.xlu0 %v4739_v14, %s5833_s30  ;;  %v6975_v14 = vrot.slane %v4559_v28, %v6104_v22 }
 0x3eb   : > { %5050 = vrot.lane.b32.xlu1 %v4742_v17, %s5833_s30 }
 0x3ec   : > { %5048 = vrot.lane.b32.xlu0 %v4741_v5, %s5833_s30  ;;  %v6993_v5 = vrot.slane %v2909_v24, %v6104_v22  ;;  %v4607_v24 = vcombine.high %v4541_v63, %v4557_v7 }
 0x3ee   : > { %v7018_v58 = vrot.slane %v4607_v24, %v6104_v22 }
 0x3ef   : > { %5054 = vrot.lane.b32.xlu1 %v4744_v59, %s5833_s30  ;;  %v2974_v59 = vcombine.high %v6993_v5, %v6999_v48 }
 0x3f0   : > { %5052 = vrot.lane.b32.xlu0 %v4743_v51, %s5833_s30 }
 0x3f3   : > { %5058 = vrot.lane.b32.xlu1 %v4746_v1, %s5833_s30 }
 0x3f4   : > { %5056 = vrot.lane.b32.xlu0 %v4745_v53, %s5833_s30  ;;  %s5339_s30 = sadd.s32 %s5812_s21, %s5537_s27  ;;  %s5847_s21 = smov [#allocation3]  }
 0x3f5   : > { %s5738_s16 = sshll.u32 %s5847_s21, 4  ;;  %s5739_s16 = int_to_ptr.vmem [resolvable:$false] %s5738_s16 }
 0x3f6   : > { %s5740_s27 = scalar_lea.vmem %s5739_s16, 256 }
 0x3f7   : > { %2998 = vrot.lane.b32.xlu1 %v2978_v38, %s5840_s14 }
 0x3f8   : > { %2982 = vrot.lane.b32.xlu0 %v2974_v59, %s5836_s9 }
 0x3fb   : > { %3002 = vrot.lane.b32.xlu1 %v2979_v26, %s5839_s13 }
 0x3fc   : > { %2986 = vrot.lane.b32.xlu0 %v2975_v60, %s5835_s8 }
 0x3ff   : > { %3006 = vrot.lane.b32.xlu1 %v2980_v12, %s5841_s15 }
 0x400   : > { %2990 = vrot.lane.b32.xlu0 %v2976_v37, %s5838_s12 }
 0x404   : > { %2994 = vrot.lane.b32.xlu0 %v2977_v25, %s5837_s10 }
 0x409   : > { %v3031_v60 = vpop.permute.xlu1 %3030 }
 0x40a   : > { %v3027_v26 = vpop.permute.xlu0 %3026 }
 0x40b   : > { %v3050_v63 = vcombine.low %v3027_v26, %v3031_v60  ;;  %v3051_v28 = vcombine.high %v3027_v26, %v3031_v60 }
 0x40d   : > { %v3033_v51 = vpop.permute.xlu1 %3032  ;;  %v3058_v10 = vrot.slane %v3050_v63, %v5961_v6  ;;  %v3065_v60 = vrot.slane %v3051_v28, %v5961_v6 }
 0x40e   : > { %v3029_v1 = vpop.permute.xlu0 %3028 }
 0x40f   : > { %v3066_v53 = vcombine.low %v3029_v1, %v3033_v51  ;;  %v3067_v41 = vcombine.high %v3029_v1, %v3033_v51 }
 0x411   : > { %v3037_v40 = vpop.permute.xlu1 %3036  ;;  %v3074_v62 = vrot.slane %v3066_v53, %v5961_v6  ;;  %v3081_v29 = vrot.slane %v3067_v41, %v5961_v6 }
 0x412   : > { %v3035_v15 = vpop.permute.xlu0 %3034 }
 0x413   : > { %v3115_v1 = vcombine.high %v3058_v10, %v3074_v62  ;;  %v3114_v53 = vcombine.low %v3058_v10, %v3074_v62  ;;  %v3131_v33 = vcombine.high %v3065_v60, %v3081_v29 }
 0x415   : > { %v3041_v37 = vpop.permute.xlu1 %3040  ;;  %v7058_v41 = vrot.slane %v3114_v53, %v6104_v22 }
 0x416   : > { %v3039_v7 = vpop.permute.xlu0 %3038  ;;  %v3098_v27 = vcombine.low %v3037_v40, %v3041_v37  ;;  %v3099_v57 = vcombine.high %v3037_v40, %v3041_v37 }
 0x417   : > { %v3082_v12 = vcombine.low %v3035_v15, %v3039_v7  ;;  %v3083_v32 = vcombine.high %v3035_v15, %v3039_v7 }
 0x418   : > { %v3106_v46 = vrot.slane %v3098_v27, %v5961_v6  ;;  %v3113_v25 = vrot.slane %v3099_v57, %v5961_v6  ;;  %v3129_v57 = vrot.slane %v3115_v1, %v6104_v22 }
 0x419   : > { %v3090_v18 = vrot.slane %v3082_v12, %v5961_v6  ;;  %v3097_v59 = vrot.slane %v3083_v32, %v5961_v6  ;;  %v3389_v24 = vpop.permute.xlu1 %3388  ;;  %v3130_v12 = vcombine.low %v3065_v60, %v3081_v29 }
 0x41a   : > { %v3387_v51 = vpop.permute.xlu0 %3386 }
 0x41b   : > { %v3147_v40 = vcombine.high %v3090_v18, %v3106_v46  ;;  %v3146_v37 = vcombine.low %v3090_v18, %v3106_v46  ;;  %v3162_v26 = vcombine.low %v3097_v59, %v3113_v25  ;;  %v3138_v1 = vrot.slane %v3130_v12, %v6104_v22 }
 0x41c   : > { %v3163_v38 = vcombine.high %v3097_v59, %v3113_v25 }
 0x41d   : > { %v3161_v15 = vrot.slane %v3147_v40, %v6104_v22  ;;  %v7054_v63 = vrot.slane %v3146_v37, %v6104_v22  ;;  %v3393_v7 = vpop.permute.xlu1 %3392  ;;  %v3170_v28 = vrot.slane %v3162_v26, %v6104_v22 }
 0x41e   : > { %v3391_v27 = vpop.permute.xlu0 %3390  ;;  %v3426_v10 = vcombine.low %v3389_v24, %v3393_v7  ;;  %v3427_v30 = vcombine.high %v3389_v24, %v3393_v7  ;;  %v3177_v29 = vrot.slane %v3163_v38, %v6104_v22  ;;  %v3145_v38 = vrot.slane %v3131_v33, %v6104_v22 }
 0x41f   : > { %v3180_v32 = vcombine.low %v3129_v57, %v3161_v15  ;;  %v3179_v62 = vcombine.high %v7058_v41, %v7054_v63  ;;  %v3410_v46 = vcombine.low %v3387_v51, %v3391_v27  ;;  %v3182_v37 = vcombine.low %v3138_v1, %v3170_v28 }
 0x420   : > { %v3181_v53 = vcombine.high %v3129_v57, %v3161_v15  ;;  %v3178_v50 = vcombine.low %v7058_v41, %v7054_v63  ;;  %v3434_v26 = vrot.slane %v3426_v10, %v5961_v6  ;;  %v3411_v39 = vcombine.high %v3387_v51, %v3391_v27 }
 0x421   : > { %3191 = vrot.lane.b32.xlu1 %v3180_v32, %s5835_s8  ;;  %3187 = vrot.lane.b32.xlu0 %v3179_v62, %s5836_s9  ;;  %v3397_v18 = vpop.permute.xlu1 %3396  ;;  %v3418_v17 = vrot.slane %v3410_v46, %v5961_v6  ;;  %v3183_v59 = vcombine.high %v3138_v1, %v3170_v28  ;;  %v3441_v27 = vrot.slane %v3427_v30, %v5961_v6 }
 0x422   : > { %v3395_v40 = vpop.permute.xlu0 %3394  ;;  %v3425_v57 = vrot.slane %v3411_v39, %v5961_v6 }
 0x423   : > { %v3474_v28 = vcombine.low %v3418_v17, %v3434_v26 }
 0x425   : > { %3199 = vrot.lane.b32.xlu1 %v3182_v37, %s5837_s10  ;;  %3195 = vrot.lane.b32.xlu0 %v3181_v53, %s5838_s12  ;;  %v3401_v32 = vpop.permute.xlu1 %3400  ;;  %v7092_v53 = vrot.slane %v3474_v28, %v6104_v22 }
 0x426   : > { %v3399_v62 = vpop.permute.xlu0 %3398  ;;  %v3458_v12 = vcombine.low %v3397_v18, %v3401_v32  ;;  %v3459_v36 = vcombine.high %v3397_v18, %v3401_v32  ;;  %v3490_v32 = vcombine.low %v3425_v57, %v3441_v27 }
 0x427   : > { %v3442_v15 = vcombine.low %v3395_v40, %v3399_v62  ;;  %v3443_v25 = vcombine.high %v3395_v40, %v3399_v62  ;;  %v3184_v40 = vcombine.low %v3145_v38, %v3177_v29  ;;  %v3475_v62 = vcombine.high %v3418_v17, %v3434_v26 }
 0x428   : > { %v3466_v24 = vrot.slane %v3458_v12, %v5961_v6  ;;  %v3473_v51 = vrot.slane %v3459_v36, %v5961_v6  ;;  %v3185_v12 = vcombine.high %v3145_v38, %v3177_v29  ;;  %v3498_v26 = vrot.slane %v3490_v32, %v6104_v22 }
 0x429   : > { %v3450_v60 = vrot.slane %v3442_v15, %v5961_v6  ;;  %v3457_v7 = vrot.slane %v3443_v25, %v5961_v6  ;;  %3203 = vrot.lane.b32.xlu1 %v3183_v59, %s5840_s14  ;;  %v7082_v10 = vpop.permute.xlu1 %3930  ;;  %v7102_v59 = vrot.slane %v3729_v56, %v6104_v22  ;;  %v3489_v29 = vrot.slane %v3475_v62, %v6104_v22 }
 0x42a   : > { %v7084_v46 = vpop.permute.xlu0 %3928 }
 0x42b   : > { %v3506_v18 = vcombine.low %v3450_v60, %v3466_v24  ;;  %v3522_v36 = vcombine.low %v3457_v7, %v3473_v51  ;;  %v3507_v1 = vcombine.high %v3450_v60, %v3466_v24  ;;  %v7112_v60 = vrot.slane %v3761_v2, %v6104_v22 }
 0x42d   : > { %v7088_v37 = vrot.slane %v3506_v18, %v6104_v22  ;;  %3207 = vrot.lane.b32.xlu1 %v3184_v40, %s5839_s13  ;;  %v3935_v30 = vpop.permute.xlu1 %3934  ;;  %v3530_v15 = vrot.slane %v3522_v36, %v6104_v22  ;;  %v3521_v25 = vrot.slane %v3507_v1, %v6104_v22  ;;  %v3794_v23 = vcombine.high %v7102_v59, %v7112_v60 }
 0x42e   : > { %v3933_v39 = vpop.permute.xlu0 %3932  ;;  %v3968_v19 = vcombine.low %v7082_v10, %v3935_v30  ;;  %v3523_v36 = vcombine.high %v3457_v7, %v3473_v51 }
 0x42f   : > { %v3539_v33 = vcombine.high %v7092_v53, %v7088_v37  ;;  %v3952_v13 = vcombine.low %v7084_v46, %v3933_v39  ;;  %v3542_v56 = vcombine.low %v3498_v26, %v3530_v15  ;;  %v3540_v38 = vcombine.low %v3489_v29, %v3521_v25 }
 0x430   : > { %v3976_v1 = vrot.slane %v3968_v19, %v5961_v6  ;;  %v3541_v62 = vcombine.high %v3489_v29, %v3521_v25  ;;  %v3537_v51 = vrot.slane %v3523_v36, %v6104_v22  ;;  %v3543_v7 = vcombine.high %v3498_v26, %v3530_v15 }
 0x431   : > { %3211 = vrot.lane.b32.xlu1 %v3185_v12, %s5841_s15  ;;  %3547 = vrot.lane.b32.xlu0 %v3539_v33, %s5836_s9  ;;  %v3939_v24 = vpop.permute.xlu1 %3938  ;;  %v3960_v32 = vrot.slane %v3952_v13, %v5961_v6  ;;  %v3969_v29 = vcombine.high %v7082_v10, %v3935_v30  ;;  %v3953_v13 = vcombine.high %v7084_v46, %v3933_v39 }
 0x432   : > { %v3937_v17 = vpop.permute.xlu0 %3936 }
 0x433   : > { %v4016_v19 = vcombine.low %v3960_v32, %v3976_v1  ;;  %v7148_v10 = vrot.slane %v3969_v29, %v5961_v6  ;;  %v7151_v46 = vrot.slane %v3953_v13, %v5961_v6 }
 0x435   : > { %3559 = vrot.lane.b32.xlu1 %v3542_v56, %s5837_s10  ;;  %3551 = vrot.lane.b32.xlu0 %v3540_v38, %s5835_s8  ;;  %v3943_v18 = vpop.permute.xlu1 %3942  ;;  %v3491_v56 = vcombine.high %v3425_v57, %v3441_v27  ;;  %v7142_v26 = vrot.slane %v4016_v19, %v6104_v22  ;;  %v4017_v19 = vcombine.high %v3960_v32, %v3976_v1 }
 0x436   : > { %v3941_v40 = vpop.permute.xlu0 %3940  ;;  %v4000_v35 = vcombine.low %v3939_v24, %v3943_v18  ;;  %v4033_v34 = vcombine.high %v7151_v46, %v7148_v10 }
 0x437   : > { %v3984_v2 = vcombine.low %v3937_v17, %v3941_v40  ;;  %v3505_v25 = vrot.slane %v3491_v56, %v6104_v22  ;;  %v3985_v15 = vcombine.high %v3937_v17, %v3941_v40 }
 0x438   : > { %v4008_v12 = vrot.slane %v4000_v35, %v5961_v6  ;;  %v4001_v35 = vcombine.high %v3939_v24, %v3943_v18 }
 0x439   : > { %v3992_v33 = vrot.slane %v3984_v2, %v5961_v6  ;;  %3802 = vrot.lane.b32.xlu1 %v3794_v23, %s5836_s9  ;;  %3555 = vrot.lane.b32.xlu0 %v3541_v62, %s5838_s12  ;;  %v7128_v38 = vpop.permute.xlu1 %4217  ;;  %v3544_v23 = vcombine.low %v3505_v25, %v3537_v51  ;;  %v7164_v17 = vrot.slane %v3985_v15, %v5961_v6 }
 0x43a   : > { %v7130_v28 = vpop.permute.xlu0 %4215  ;;  %v7161_v24 = vrot.slane %v4001_v35, %v5961_v6  ;;  %v3545_v18 = vcombine.high %v3505_v25, %v3537_v51 }
 0x43b   : > { %v4048_v3 = vcombine.low %v3992_v33, %v4008_v12  ;;  %v4049_v25 = vcombine.high %v3992_v33, %v4008_v12 }
 0x43c   : > { %v4065_v31 = vcombine.high %v7164_v17, %v7161_v24 }
 0x43d   : > { %3806 = vrot.lane.b32.xlu1 %v3795_v43, %s5835_s8  ;;  %3563 = vrot.lane.b32.xlu0 %v3543_v7, %s5840_s14  ;;  %v4222_v27 = vpop.permute.xlu1 %4221  ;;  %v7145_v2 = vrot.slane %v4048_v3, %v6104_v22  ;;  %v4064_v7 = vcombine.low %v7164_v17, %v7161_v24  ;;  %v4063_v15 = vrot.slane %v4049_v25, %v6104_v22 }
 0x43e   : > { %v4220_v57 = vpop.permute.xlu0 %4219  ;;  %v4255_v39 = vcombine.low %v7128_v38, %v4222_v27  ;;  %v4256_v11 = vcombine.high %v7128_v38, %v4222_v27  ;;  %v4079_v25 = vrot.slane %v4065_v31, %v6104_v22 }
 0x43f   : > { %v4239_v3 = vcombine.low %v7130_v28, %v4220_v57  ;;  %v4080_v40 = vcombine.low %v7142_v26, %v7145_v2  ;;  %v4081_v33 = vcombine.high %v7142_v26, %v7145_v2  ;;  %v4072_v35 = vrot.slane %v4064_v7, %v6104_v22  ;;  %v5525_v26 = vld [vmem:[%s7639_s3 + $0x20] sm:$0xff] }
 0x440   : > { %v4263_v36 = vrot.slane %v4255_v39, %v5961_v6  ;;  %v4240_v54 = vcombine.high %v7130_v28, %v4220_v57 }
 0x441   : > { %3810 = vrot.lane.b32.xlu1 %v3796_v8, %s5838_s12  ;;  %3567 = vrot.lane.b32.xlu0 %v3544_v23, %s5839_s13  ;;  %v4226_v43 = vpop.permute.xlu1 %4225  ;;  %v4032_v8 = vcombine.low %v7151_v46, %v7148_v10  ;;  %v4247_v62 = vrot.slane %v4239_v3, %v5961_v6 }
 0x442   : > { %v4224_v30 = vpop.permute.xlu0 %4223 }
 0x443   : > { %v4040_v1 = vrot.slane %v4032_v8, %v6104_v22  ;;  %v4303_v32 = vcombine.low %v4247_v62, %v4263_v36  ;;  %v4304_v3 = vcombine.high %v4247_v62, %v4263_v36 }
 0x445   : > { %3818 = vrot.lane.b32.xlu1 %v3798_v0, %s5840_s14  ;;  %3571 = vrot.lane.b32.xlu0 %v3545_v18, %s5841_s15  ;;  %v4230_v42 = vpop.permute.xlu1 %4229  ;;  %v4084_v28 = vcombine.low %v4040_v1, %v4072_v35  ;;  %v4318_v46 = vrot.slane %v4304_v3, %v6104_v22 }
 0x446   : > { %v4228_v47 = vpop.permute.xlu0 %4227  ;;  %v4287_v56 = vcombine.low %v4226_v43, %v4230_v42  ;;  %v4288_v18 = vcombine.high %v4226_v43, %v4230_v42  ;;  %v4254_v43 = vrot.slane %v4240_v54, %v5961_v6 }
 0x447   : > { %v4271_v51 = vcombine.low %v4224_v30, %v4228_v47  ;;  %v4272_v8 = vcombine.high %v4224_v30, %v4228_v47 }
 0x448   : > { %v4295_v0 = vrot.slane %v4287_v56, %v5961_v6  ;;  %v7211_v56 = vrot.slane %v4303_v32, %v6104_v22  ;;  %v4302_v36 = vrot.slane %v4288_v18, %v5961_v6  ;;  %v4085_v32 = vcombine.high %v4040_v1, %v4072_v35 }
 0x449   : > { %v4279_v29 = vrot.slane %v4271_v51, %v5961_v6  ;;  %3822 = vrot.lane.b32.xlu1 %v3799_v55, %s5839_s13  ;;  %3814 = vrot.lane.b32.xlu0 %v3797_v52, %s5837_s10  ;;  %v7189_v13 = vpop.permute.xlu1 %4759  ;;  %v4031_v55 = vrot.slane %v4017_v19, %v6104_v22  ;;  %v4286_v10 = vrot.slane %v4272_v8, %v5961_v6 }
 0x44a   : > { %v7191_v23 = vpop.permute.xlu0 %4757  ;;  %v4047_v19 = vrot.slane %v4033_v34, %v6104_v22 }
 0x44b   : > { %v4335_v12 = vcombine.low %v4279_v29, %v4295_v0  ;;  %v4082_v27 = vcombine.low %v4031_v55, %v4063_v15  ;;  %v4336_v57 = vcombine.high %v4279_v29, %v4295_v0  ;;  %v4083_v30 = vcombine.high %v4031_v55, %v4063_v15 }
 0x44c   : > { %v4351_v3 = vcombine.low %v4286_v10, %v4302_v36  ;;  %v4352_v34 = vcombine.high %v4286_v10, %v4302_v36 }
 0x44d   : > { %3826 = vrot.lane.b32.xlu1 %v3800_v16, %s5841_s15  ;;  %4089 = vrot.lane.b32.xlu0 %v4081_v33, %s5836_s9  ;;  %v7206_v52 = vpop.permute.xlu1 %4763  ;;  %v7214_v38 = vrot.slane %v4335_v12, %v6104_v22  ;;  %v4270_v16 = vrot.slane %v4256_v11, %v5961_v6  ;;  %v4350_v7 = vrot.slane %v4336_v57, %v6104_v22 }
 0x44e   : > { %v7208_v39 = vpop.permute.xlu0 %4761  ;;  %v4797_v62 = vcombine.low %v7189_v13, %v7206_v52  ;;  %v4366_v36 = vrot.slane %v4352_v34, %v6104_v22 }
 0x44f   : > { %v4367_v24 = vcombine.low %v7211_v56, %v7214_v38  ;;  %v4368_v17 = vcombine.high %v7211_v56, %v7214_v38  ;;  %v4781_v51 = vcombine.low %v7191_v23, %v7208_v39  ;;  %v4319_v55 = vcombine.low %v4254_v43, %v4270_v16 }
 0x450   : > { %v7253_v15 = vrot.slane %v4797_v62, %v5961_v6  ;;  %v4369_v54 = vcombine.low %v4318_v46, %v4350_v7  ;;  %v4320_v57 = vcombine.high %v4254_v43, %v4270_v16  ;;  %v4370_v31 = vcombine.high %v4318_v46, %v4350_v7 }
 0x451   : > { %4101 = vrot.lane.b32.xlu1 %v4084_v28, %s5837_s10  ;;  %4093 = vrot.lane.b32.xlu0 %v4082_v27, %s5835_s8  ;;  %v7224_v42 = vpop.permute.xlu1 %4767  ;;  %v7256_v11 = vrot.slane %v4781_v51, %v5961_v6  ;;  %v4086_v28 = vcombine.low %v4047_v19, %v4079_v25  ;;  %v4327_v27 = vrot.slane %v4319_v55, %v6104_v22 }
 0x452   : > { %v7226_v47 = vpop.permute.xlu0 %4765  ;;  %v4334_v16 = vrot.slane %v4320_v57, %v6104_v22  ;;  %v7648_v55 = vcombine.low %v6950_v9, %v6953_v45 }
 0x454   : > { %v4373_v57 = vcombine.low %v4334_v16, %v4366_v36 }
 0x455   : > { %4376 = vrot.lane.b32.xlu1 %v4368_v17, %s5836_s9  ;;  %4097 = vrot.lane.b32.xlu0 %v4083_v30, %s5838_s12  ;;  %v7244_v0 = vpop.permute.xlu1 %4771  ;;  %v4359_v30 = vrot.slane %v4351_v3, %v6104_v22  ;;  %v4845_v17 = vcombine.low %v7256_v11, %v7253_v15 }
 0x456   : > { %v7246_v29 = vpop.permute.xlu0 %4769  ;;  %v4829_v12 = vcombine.low %v7224_v42, %v7244_v0 }
 0x457   : > { %v4813_v33 = vcombine.low %v7226_v47, %v7246_v29  ;;  %v4372_v43 = vcombine.high %v4327_v27, %v4359_v30  ;;  %v7285_v10 = vrot.slane %v4845_v17, %v6104_v22  ;;  %v4371_v34 = vcombine.low %v4327_v27, %v4359_v30 }
 0x458   : > { %v7259_v18 = vrot.slane %v4829_v12, %v5961_v6  ;;  %v4087_v12 = vcombine.high %v4047_v19, %v4079_v25  ;;  %v7647_v19 = vcombine.low %v6944_v20, %v6947_v61  ;;  %v4374_v30 = vcombine.high %v4334_v16, %v4366_v36 }
 0x459   : > { %v7262_v1 = vrot.slane %v4813_v33, %v5961_v6  ;;  %4380 = vrot.lane.b32.xlu1 %v4369_v54, %s5835_s8  ;;  %4105 = vrot.lane.b32.xlu0 %v4085_v32, %s5840_s14  ;;  %v7266_v35 = vpop.permute.xlu1 %5046  ;;  %v7306_v54 = vrot.slane %v7648_v55, %v6104_v22  ;;  %v4846_v36 = vcombine.high %v7256_v11, %v7253_v15 }
 0x45a   : > { %v7268_v8 = vpop.permute.xlu0 %5044  ;;  %v7300_v25 = vrot.slane %v7647_v19, %v6104_v22  ;;  %v4782_v19 = vcombine.high %v7191_v23, %v7208_v39  ;;  %v4830_v55 = vcombine.high %v7224_v42, %v7244_v0  ;;  %v7650_v39 = vcombine.low %v6975_v14, %v6978_v44 }
 0x45b   : > { %v4877_v62 = vcombine.low %v7262_v1, %v7259_v18  ;;  %v4860_v0 = vrot.slane %v4846_v36, %v6104_v22 }
 0x45c   : > { %v4623_v61 = vcombine.high %v7300_v25, %v7306_v54 }
 0x45d   : > { %4384 = vrot.lane.b32.xlu1 %v4370_v31, %s5838_s12  ;;  %4109 = vrot.lane.b32.xlu0 %v4086_v28, %s5839_s13  ;;  %v7278_v51 = vpop.permute.xlu1 %5050  ;;  %v7288_v46 = vrot.slane %v4877_v62, %v6104_v22 }
 0x45e   : > { %v7280_v32 = vpop.permute.xlu0 %5048  ;;  %v5084_v7 = vcombine.low %v7266_v35, %v7278_v51  ;;  %v5085_v36 = vcombine.high %v7266_v35, %v7278_v51 }
 0x45f   : > { %v5068_v33 = vcombine.low %v7268_v8, %v7280_v32  ;;  %v4909_v31 = vcombine.low %v7285_v10, %v7288_v46  ;;  %v4910_v11 = vcombine.high %v7285_v10, %v7288_v46 }
 0x460   : > { %v7311_v17 = vrot.slane %v5084_v7, %v5961_v6 }
 0x461   : > { %4392 = vrot.lane.b32.xlu1 %v4372_v43, %s5840_s14  ;;  %4113 = vrot.lane.b32.xlu0 %v4087_v12, %s5841_s15  ;;  %v5055_v3 = vpop.permute.xlu1 %5054  ;;  %v7314_v20 = vrot.slane %v5068_v33, %v5961_v6  ;;  %v4798_v33 = vcombine.high %v7189_v13, %v7206_v52  ;;  %v7649_v52 = vcombine.low %v6972_v21, %v6981_v4 }
 0x462   : > { %v5053_v28 = vpop.permute.xlu0 %5052 }
 0x463   : > { %v5132_v12 = vcombine.low %v7314_v20, %v7311_v17  ;;  %v4812_v42 = vrot.slane %v4798_v33, %v5961_v6  ;;  %v7652_v33 = vcombine.high %v6972_v21, %v6981_v4  ;;  %v7653_v21 = vcombine.low %v7015_v49, %v7018_v58 }
 0x465   : > { %4396 = vrot.lane.b32.xlu1 %v4373_v57, %s5839_s13  ;;  %4388 = vrot.lane.b32.xlu0 %v4371_v34, %s5837_s10  ;;  %v5059_v9 = vpop.permute.xlu1 %5058  ;;  %v4814_v57 = vcombine.high %v7226_v47, %v7246_v29  ;;  %v4878_v34 = vcombine.high %v7262_v1, %v7259_v18  ;;  %v7345_v13 = vrot.slane %v5132_v12, %v6104_v22 }
 0x466   : > { %v5057_v45 = vpop.permute.xlu0 %5056  ;;  %v5116_v62 = vcombine.low %v5055_v3, %v5059_v9  ;;  %v4796_v47 = vrot.slane %v4782_v19, %v5961_v6  ;;  %v4844_v29 = vrot.slane %v4830_v55, %v5961_v6  ;;  %v5117_v55 = vcombine.high %v5055_v3, %v5059_v9 }
 0x467   : > { %v5100_v27 = vcombine.low %v5053_v28, %v5057_v45  ;;  %v4828_v15 = vrot.slane %v4814_v57, %v5961_v6  ;;  %v4892_v18 = vrot.slane %v4878_v34, %v6104_v22  ;;  %v5101_v57 = vcombine.high %v5053_v28, %v5057_v45 }
 0x468   : > { %v7323_v43 = vrot.slane %v5116_v62, %v5961_v6  ;;  %v4861_v62 = vcombine.low %v4796_v47, %v4812_v42  ;;  %v4862_v12 = vcombine.high %v4796_v47, %v4812_v42  ;;  %v5131_v51 = vrot.slane %v5117_v55, %v5961_v6 }
 0x469   : > { %v7326_v7 = vrot.slane %v5100_v27, %v5961_v6  ;;  %4400 = vrot.lane.b32.xlu1 %v4374_v30, %s5841_s15  ;;  %4631 = vrot.lane.b32.xlu0 %v4623_v61, %s5836_s9  ;;  %v7651_v61 = vcombine.high %v6975_v14, %v6978_v44  ;;  %v4893_v27 = vcombine.low %v4828_v15, %v4844_v29 }
 0x46a   : > { %v4911_v30 = vcombine.low %v4860_v0, %v4892_v18  ;;  %v4869_v19 = vrot.slane %v4861_v62, %v6104_v22  ;;  %v5069_v14 = vcombine.high %v7268_v8, %v7280_v32  ;;  %v4912_v34 = vcombine.high %v4860_v0, %v4892_v18 }
 0x46b   : > { %v5164_v16 = vcombine.low %v7326_v7, %v7323_v43  ;;  %v4901_v44 = vrot.slane %v4893_v27, %v6104_v22  ;;  %v4876_v4 = vrot.slane %v4862_v12, %v6104_v22  ;;  %v5115_v32 = vrot.slane %v5101_v57, %v5961_v6 }
 0x46c   : > { %v5083_v35 = vrot.slane %v5069_v14, %v5961_v6  ;;  %v7654_v28 = vcombine.high %v7015_v49, %v7018_v58  ;;  %v5133_v9 = vcombine.high %v7314_v20, %v7311_v17  ;;  %v5313_v14 = vld [vmem:[%s7640_s4] sm:$0xff] }
 0x46d   : > { %v7348_v23 = vrot.slane %v5164_v16, %v6104_v22  ;;  %4643 = vrot.lane.b32.xlu1 %v7649_v52, %s5837_s10  ;;  %4635 = vrot.lane.b32.xlu0 %v7650_v39, %s5835_s8  ;;  %v4894_v16 = vcombine.high %v4828_v15, %v4844_v29  ;;  %v5099_v52 = vrot.slane %v5085_v36, %v5961_v6  ;;  %v2983_v29 = vpop.permute.xlu0 %2982  ;;  %v2999_v6 = vpop.permute.xlu1 %2998 }
 0x46e   : > { %v4914_v3 = vcombine.high %v4869_v19, %v4901_v44  ;;  %v5165_v39 = vcombine.high %v7326_v7, %v7323_v43  ;;  %v5180_v42 = vcombine.low %v5115_v32, %v5131_v51  ;;  %v4913_v0 = vcombine.low %v4869_v19, %v4901_v44 }
 0x46f   : > { %v5196_v1 = vcombine.low %v7345_v13, %v7348_v23  ;;  %v4908_v8 = vrot.slane %v4894_v16, %v6104_v22  ;;  %v5148_v45 = vcombine.low %v5083_v35, %v5099_v52  ;;  %v5147_v15 = vrot.slane %v5133_v9, %v6104_v22 }
 0x470   : > { %v5149_v49 = vcombine.high %v5083_v35, %v5099_v52  ;;  %v5179_v17 = vrot.slane %v5165_v39, %v6104_v22  ;;  %v5181_v20 = vcombine.high %v5115_v32, %v5131_v51  ;;  %v5188_v43 = vrot.slane %v5180_v42, %v6104_v22 }
 0x471   : > { %4918 = vrot.lane.b32.xlu1 %v4910_v11, %s5836_s9  ;;  %4639 = vrot.lane.b32.xlu0 %v7651_v61, %s5838_s12  ;;  %v4915_v47 = vcombine.low %v4876_v4, %v4908_v8  ;;  %v5156_v58 = vrot.slane %v5148_v45, %v6104_v22  ;;  %v4916_v11 = vcombine.high %v4876_v4, %v4908_v8  ;;  %v2987_v18 = vpop.permute.xlu0 %2986  ;;  %v3003_v12 = vpop.permute.xlu1 %3002 }
 0x472   : > { %v5197_v7 = vcombine.high %v7345_v13, %v7348_v23  ;;  %v5163_v61 = vrot.slane %v5149_v49, %v6104_v22  ;;  %v5195_v62 = vrot.slane %v5181_v20, %v6104_v22  ;;  %v5199_v16 = vcombine.high %v5147_v15, %v5179_v17  ;;  %v5533_v13 = vld [vmem:[%s7639_s3 + $0x40] sm:$0xff] }
 0x473   : > { %v5200_v27 = vcombine.low %v5156_v58, %v5188_v43  ;;  %v5201_v22 = vcombine.high %v5156_v58, %v5188_v43  ;;  %v2973_v44 = vcombine.low %v6993_v5, %v6999_v48 }
 0x474   : > { %v5202_v19 = vcombine.low %v5163_v61, %v5195_v62 }
 0x475   : > { %4922 = vrot.lane.b32.xlu1 %v4911_v30, %s5835_s8  ;;  %4647 = vrot.lane.b32.xlu0 %v7652_v33, %s5840_s14  ;;  %v5198_v30 = vcombine.low %v5147_v15, %v5179_v17  ;;  %v2991_v33 = vpop.permute.xlu0 %2990  ;;  %v3007_v36 = vpop.permute.xlu1 %3006  ;;  %v7655_v15 = vmov 0.0  }
 0x479   : > { %4926 = vrot.lane.b32.xlu1 %v4912_v34, %s5838_s12  ;;  %4651 = vrot.lane.b32.xlu0 %v7653_v21, %s5839_s13  ;;  %v2995_v55 = vpop.permute.xlu0 %2994  ;;  %v5203_v34 = vcombine.high %v5163_v61, %v5195_v62  ;;  %v3009_v21 = vsel %vm373_vm0, %v2973_v44, %v2983_v29 }
 0x47a   : > { %v3010_v52 = vsel %vm375_vm1, %v3009_v21, %v2987_v18  ;;  %v7656_v18 = vcombine.low %v7092_v53, %v7088_v37 }
 0x47b   : > { %v3011_v8 = vsel %vm377_vm2, %v3010_v52, %v2991_v33 }
 0x47c   : > { %v3012_v32 = vsel %vm379_vm4, %v3011_v8, %v2995_v55  ;;  %v5523_v8 = vld [vmem:[%s7639_s3 + $0x18] sm:$0xff] }
 0x47d   : > { %4934 = vrot.lane.b32.xlu1 %v4914_v3, %s5840_s14  ;;  %4655 = vrot.lane.b32.xlu0 %v7654_v28, %s5841_s15  ;;  %v3013_v45 = vsel %vm381_vm5, %v3012_v32, %v2999_v6 }
 0x481   : > { %4938 = vrot.lane.b32.xlu1 %v4915_v47, %s5839_s13  ;;  %4930 = vrot.lane.b32.xlu0 %v4913_v0, %s5837_s10  ;;  %v3014_v47 = vsel %vm383_vm6, %v3013_v45, %v3003_v12  ;;  %v5518_v0 = vld [vmem:[%s7639_s3 + $0x8] sm:$0xff] }
 0x482   : > { %v3015_v6 = vsel %vm385_vm7, %v3014_v47, %v3007_v36 }
 0x485   : > { %4942 = vrot.lane.b32.xlu1 %v4916_v11, %s5841_s15  ;;  %5205 = vrot.lane.b32.xlu0 %v5197_v7, %s5836_s9  ;;  %v2844_v11 = vld [vmem:[%s7639_s3] sm:$0xff]  ;;  %s5343_s9 = sshll.u32 %s231_s26, 4  ;;  %s7581_s9 = int_to_ptr.vmem [resolvable:$true] %s5343_s9 }
 0x486   : > { %s5734_s22 = scalar_lea.vmem %s7581_s9, 128  ;;  %p5741_p5 = scmp.lt.s32.totalorder %s7581_s9, %s5739_s16 }
 0x487   : > { %p5735_p1 = scmp.ne.s32.totalorder %s7581_s9, %s5734_s22  ;;  %p5742_p6 = scmp.lt.s32.totalorder %s5740_s27, %s5734_s22 }
 0x489   : > { %5217 = vrot.lane.b32.xlu1 %v5200_v27, %s5837_s10  ;;  %5209 = vrot.lane.b32.xlu0 %v5198_v30, %s5835_s8  ;;  %v3793_v27 = vcombine.low %v7102_v59, %v7112_v60  ;;  %s5538_s8 = sshll.u32 %s5339_s30, 7  ;;  %p5736_p2 = pnand %p5735_p1, %p5929_p3 }
 0x48a   : > { %p5743_p7 = por %p5742_p6, %p5741_p5 }
 0x48b   : > { %p5737_p4 = pneg %p5736_p2 }
 0x48d   : > { %5225 = vrot.lane.b32.xlu1 %v5202_v19, %s5839_s13  ;;  %5213 = vrot.lane.b32.xlu0 %v5199_v16, %s5838_s12  ;;  %s7579_s13 = scalar_lea.hbm %s7641_s5, %s5538_s8  ;;  %p5744_p9 = pnand %p5743_p7, %p5737_p4 }
 0x491   : > { %5221 = vrot.lane.b32.xlu0 %v5201_v22, %s5840_s14  ;;  %5316 = vperm.xlu1 %5728, %v5313_v14   ;;  %v5521_v22 = vld [vmem:[%s7639_s3 + $0x10] sm:$0xff]  ;;  %s7657_s14 = sand.u32 1, %s5804_s19  }
 0x493   : > { %v3192_v57 = vpop.permute.xlu1 %3191  ;;  %v3188_v4 = vpop.permute.xlu0 %3187 }
 0x494   : > { %v3214_v5 = vsel %vm373_vm0, %v3178_v50, %v3188_v4 }
 0x495   : > { %5229 = vrot.lane.b32.xlu0 %v5203_v34, %s5841_s15  ;;  %v3215_v3 = vsel %vm375_vm1, %v3214_v5, %v3192_v57  ;;  %s5328_s15 = scalar_lea.sflag [#allocation4], %s7657_s14 }
 0x497   : > { %v3200_v35 = vpop.permute.xlu1 %3199  ;;  %v3196_v48 = vpop.permute.xlu0 %3195 }
 0x498   : > { %v3216_v28 = vsel %vm377_vm2, %v3215_v3, %v3196_v48 }
 0x499   : > { %v3217_v39 = vsel %vm379_vm4, %v3216_v28, %v3200_v35 }
 0x49b   : > { %v3204_v51 = vpop.permute.xlu1 %3203 }
 0x49c   : > { %v3218_v42 = vsel %vm381_vm5, %v3217_v39, %v3204_v51 }
 0x49f   : > { %v3208_v9 = vpop.permute.xlu1 %3207 }
 0x4a0   : > { %v3219_v63 = vsel %vm383_vm6, %v3218_v42, %v3208_v9 }
 0x4a3   : > { %v3212_v50 = vpop.permute.xlu1 %3211  ;;  %v3548_v41 = vpop.permute.xlu0 %3547 }
 0x4a4   : > { %v3220_v29 = vsel %vm385_vm7, %v3219_v63, %v3212_v50  ;;  %v3574_v61 = vsel %vm373_vm0, %v7656_v18, %v3548_v41 }
 0x4a5   : > { %5560 = vmatpush3.msra.mxu1 %v3220_v29 }
 0x4a6   : > { %5564 = vmatprep.subr.mxu1 %v7655_v15  ;;  %5562 = vmatmul.mubr.msk.f32.vlgmr.msra.gmra.mrb[0].mxu1 %vm3221_vm9, %v5518_v0 }
 0x4a7   : > { %v3560_v49 = vpop.permute.xlu1 %3559  ;;  %v3552_v58 = vpop.permute.xlu0 %3551  ;;  %5565 = vmatpush3.msra.mxu1 %v3015_v6  ;;  %5566 = vmatprep.mubr.msk.f32.mxu1 %vm5846_vm8, %v7655_v15 }
 0x4a8   : > { %5569 = vmatprep.subr.mxu1 %v7655_v15  ;;  %v3575_v62 = vsel %vm375_vm1, %v3574_v61, %v3552_v58 }
 0x4aa   : > { %5567 = vmatmul.mubr.msk.f32.vlgmr.msra.gmra.mrb[2].mxu1 %vm3221_vm9, %v2844_v11 }
 0x4ab   : > { %v3803_v17 = vpop.permute.xlu1 %3802  ;;  %v3556_v20 = vpop.permute.xlu0 %3555  ;;  %5571 = vmatprep.mubr.msk.f32.mxu1 %vm5846_vm8, %v7655_v15 }
 0x4ac   : > { %v3576_v30 = vsel %vm377_vm2, %v3575_v62, %v3556_v20  ;;  %v3829_v19 = vsel %vm373_vm0, %v3793_v27, %v3803_v17 }
 0x4ad   : > { %v3577_v16 = vsel %vm379_vm4, %v3576_v30, %v3560_v49 }
 0x4af   : > { %v3807_v43 = vpop.permute.xlu1 %3806  ;;  %v3564_v7 = vpop.permute.xlu0 %3563 }
 0x4b0   : > { %v3578_v36 = vsel %vm381_vm5, %v3577_v16, %v3564_v7  ;;  %v3830_v59 = vsel %vm375_vm1, %v3829_v19, %v3807_v43  ;;  %v5527_v7 = vld [vmem:[%s7639_s3 + $0x28] sm:$0xff] }
 0x4b3   : > { %v3811_v12 = vpop.permute.xlu1 %3810  ;;  %v3568_v33 = vpop.permute.xlu0 %3567 }
 0x4b4   : > { %v3579_v14 = vsel %vm383_vm6, %v3578_v36, %v3568_v33  ;;  %v3831_v44 = vsel %vm377_vm2, %v3830_v59, %v3811_v12  ;;  %v4622_v12 = vcombine.low %v7300_v25, %v7306_v54  ;;  %v5529_v25 = vld [vmem:[%s7639_s3 + $0x30] sm:$0xff] }
 0x4b7   : > { %v3819_v37 = vpop.permute.xlu1 %3818  ;;  %v3572_v53 = vpop.permute.xlu0 %3571 }
 0x4b8   : > { %v3580_v60 = vsel %vm385_vm7, %v3579_v14, %v3572_v53 }
 0x4b9   : > { %5570 = vmatpush3.msra.mxu1 %v3580_v60 }
 0x4ba   : > { %5574 = vmatprep.subr.mxu1 %v7655_v15  ;;  %5572 = vmatmul.mubr.msk.f32.vlgmr.msra.gmra.mrb[4].mxu1 %vm3221_vm9, %v5521_v22 }
 0x4bb   : > { %v3823_v55 = vpop.permute.xlu1 %3822  ;;  %v3815_v57 = vpop.permute.xlu0 %3814  ;;  %5576 = vmatprep.mubr.msk.f32.mxu1 %vm5846_vm8, %v7655_v15 }
 0x4bc   : > { %v3832_v34 = vsel %vm379_vm4, %v3831_v44, %v3815_v57 }
 0x4bd   : > { %v3833_v21 = vsel %vm381_vm5, %v3832_v34, %v3819_v37 }
 0x4be   : > { %v3834_v4 = vsel %vm383_vm6, %v3833_v21, %v3823_v55 }
 0x4bf   : > { %v3827_v52 = vpop.permute.xlu1 %3826  ;;  %v4090_v35 = vpop.permute.xlu0 %4089 }
 0x4c0   : > { %v3835_v5 = vsel %vm385_vm7, %v3834_v4, %v3827_v52  ;;  %v4116_v45 = vsel %vm373_vm0, %v4080_v40, %v4090_v35 }
 0x4c1   : > { %5575 = vmatpush3.msra.mxu1 %v3835_v5  ;;  %v5531_v5 = vld [vmem:[%s7639_s3 + $0x38] sm:$0xff] }
 0x4c2   : > { %5579 = vmatprep.subr.mxu1 %v7655_v15  ;;  %5577 = vmatmul.mubr.msk.f32.vlgmr.msra.gmra.mrb[6].mxu1 %vm3221_vm9, %v5523_v8 }
 0x4c3   : > { %v4102_v48 = vpop.permute.xlu1 %4101  ;;  %v4094_v51 = vpop.permute.xlu0 %4093  ;;  %5581 = vmatprep.mubr.msk.f32.mxu1 %vm5846_vm8, %v7655_v15 }
 0x4c4   : > { %v4117_v39 = vsel %vm375_vm1, %v4116_v45, %v4094_v51 }
 0x4c7   : > { %v4377_v32 = vpop.permute.xlu1 %4376  ;;  %v4098_v3 = vpop.permute.xlu0 %4097 }
 0x4c8   : > { %v4118_v42 = vsel %vm377_vm2, %v4117_v39, %v4098_v3  ;;  %v4403_v40 = vsel %vm373_vm0, %v4367_v24, %v4377_v32 }
 0x4c9   : > { %v4119_v50 = vsel %vm379_vm4, %v4118_v42, %v4102_v48 }
 0x4cb   : > { %v4381_v28 = vpop.permute.xlu1 %4380  ;;  %v4106_v9 = vpop.permute.xlu0 %4105 }
 0x4cc   : > { %v4120_v41 = vsel %vm381_vm5, %v4119_v50, %v4106_v9  ;;  %v4404_v49 = vsel %vm375_vm1, %v4403_v40, %v4381_v28 }
 0x4cf   : > { %v4385_v47 = vpop.permute.xlu1 %4384  ;;  %v4110_v63 = vpop.permute.xlu0 %4109 }
 0x4d0   : > { %v4121_v0 = vsel %vm383_vm6, %v4120_v41, %v4110_v63  ;;  %v4405_v58 = vsel %vm377_vm2, %v4404_v49, %v4385_v47 }
 0x4d3   : > { %v4393_v29 = vpop.permute.xlu1 %4392  ;;  %v4114_v6 = vpop.permute.xlu0 %4113 }
 0x4d4   : > { %v4122_v2 = vsel %vm385_vm7, %v4121_v0, %v4114_v6 }
 0x4d5   : > { %5580 = vmatpush3.msra.mxu1 %v4122_v2 }
 0x4d6   : > { %5584 = vmatprep.subr.mxu1 %v7655_v15  ;;  %5582 = vmatmul.mubr.msk.f32.vlgmr.msra.gmra.mrb[8].mxu1 %vm3221_vm9, %v5525_v26 }
 0x4d7   : > { %v4397_v11 = vpop.permute.xlu1 %4396  ;;  %v4389_v17 = vpop.permute.xlu0 %4388  ;;  %5586 = vmatprep.mubr.msk.f32.mxu1 %vm5846_vm8, %v7655_v15 }
 0x4d8   : > { %v4406_v20 = vsel %vm379_vm4, %v4405_v58, %v4389_v17 }
 0x4d9   : > { %v4407_v56 = vsel %vm381_vm5, %v4406_v20, %v4393_v29 }
 0x4da   : > { %v4408_v38 = vsel %vm383_vm6, %v4407_v56, %v4397_v11 }
 0x4db   : > { %v4401_v24 = vpop.permute.xlu1 %4400  ;;  %v4632_v43 = vpop.permute.xlu0 %4631 }
 0x4dc   : > { %v4409_v18 = vsel %vm385_vm7, %v4408_v38, %v4401_v24  ;;  %v4658_v16 = vsel %vm373_vm0, %v4622_v12, %v4632_v43 }
 0x4dd   : > { %5585 = vmatpush3.msra.mxu1 %v4409_v18 }
 0x4de   : > { %5589 = vmatprep.subr.mxu1 %v7655_v15  ;;  %5587 = vmatmul.mubr.msk.f32.vlgmr.msra.gmra.mrb[10].mxu1 %vm3221_vm9, %v5527_v7 }
 0x4df   : > { %v4644_v61 = vpop.permute.xlu1 %4643  ;;  %v4636_v62 = vpop.permute.xlu0 %4635  ;;  %5591 = vmatprep.mubr.msk.f32.mxu1 %vm5846_vm8, %v7655_v15 }
 0x4e0   : > { %v4659_v36 = vsel %vm375_vm1, %v4658_v16, %v4636_v62 }
 0x4e3   : > { %v4919_v27 = vpop.permute.xlu1 %4918  ;;  %v4640_v30 = vpop.permute.xlu0 %4639 }
 0x4e4   : > { %v4660_v14 = vsel %vm377_vm2, %v4659_v36, %v4640_v30  ;;  %v4945_v57 = vsel %vm373_vm0, %v4909_v31, %v4919_v27 }
 0x4e5   : > { %v4661_v22 = vsel %vm379_vm4, %v4660_v14, %v4644_v61 }
 0x4e7   : > { %v4923_v33 = vpop.permute.xlu1 %4922  ;;  %v4648_v19 = vpop.permute.xlu0 %4647 }
 0x4e8   : > { %v4662_v59 = vsel %vm381_vm5, %v4661_v22, %v4648_v19  ;;  %v4946_v34 = vsel %vm375_vm1, %v4945_v57, %v4923_v33 }
 0x4eb   : > { %v4927_v37 = vpop.permute.xlu1 %4926  ;;  %v4652_v53 = vpop.permute.xlu0 %4651 }
 0x4ec   : > { %v4663_v60 = vsel %vm383_vm6, %v4662_v59, %v4652_v53  ;;  %v4947_v21 = vsel %vm377_vm2, %v4946_v34, %v4927_v37 }
 0x4ef   : > { %v4935_v44 = vpop.permute.xlu1 %4934  ;;  %v4656_v55 = vpop.permute.xlu0 %4655 }
 0x4f0   : > { %v4664_v54 = vsel %vm385_vm7, %v4663_v60, %v4656_v55 }
 0x4f1   : > { %5590 = vmatpush3.msra.mxu1 %v4664_v54 }
 0x4f2   : > { %5592 = vmatmul.mubr.msk.f32.vlgmr.msra.gmra.mrb[12].mxu1 %vm3221_vm9, %v5529_v25  ;;  %5594 = vmatprep.subr.mxu1 %v7655_v15 }
 0x4f3   : > { %v4939_v4 = vpop.permute.xlu1 %4938  ;;  %v4931_v52 = vpop.permute.xlu0 %4930  ;;  %5596 = vmatprep.mubr.msk.f32.mxu1 %vm5846_vm8, %v7655_v15 }
 0x4f4   : > { %v4948_v35 = vsel %vm379_vm4, %v4947_v21, %v4931_v52 }
 0x4f5   : > { %v4949_v10 = vsel %vm381_vm5, %v4948_v35, %v4935_v44 }
 0x4f6   : > { %v4950_v46 = vsel %vm383_vm6, %v4949_v10, %v4939_v4 }
 0x4f7   : > { %v4943_v31 = vpop.permute.xlu1 %4942  ;;  %v5206_v8 = vpop.permute.xlu0 %5205 }
 0x4f8   : > { %v4951_v48 = vsel %vm385_vm7, %v4950_v46, %v4943_v31  ;;  %v5232_v32 = vsel %vm373_vm0, %v5196_v1, %v5206_v8 }
 0x4f9   : > { %5595 = vmatpush3.msra.mxu1 %v4951_v48 }
 0x4fa   : > { %5597 = vmatmul.mubr.msk.f32.vlgmr.msra.gmra.mrb[14].mxu1 %vm3221_vm9, %v5531_v5  ;;  %5599 = vmatprep.subr.mxu1 %v7655_v15 }
 0x4fb   : > { %v5210_v51 = vpop.permute.xlu0 %5209  ;;  %5601 = vmatprep.mubr.msk.f32.mxu1 %vm5846_vm8, %v7655_v15  ;;  %v5218_v9 = vpop.permute.xlu1 %5217 }
 0x4fc   : > { %v5233_v3 = vsel %vm375_vm1, %v5232_v32, %v5210_v51 }
 0x4ff   : > { %v5214_v28 = vpop.permute.xlu0 %5213  ;;  %v5226_v63 = vpop.permute.xlu1 %5225 }
 0x500   : > { %v5234_v45 = vsel %vm377_vm2, %v5233_v3, %v5214_v28 }
 0x501   : > { %v5235_v39 = vsel %vm379_vm4, %v5234_v45, %v5218_v9 }
 0x503   : > { %v5222_v42 = vpop.permute.xlu0 %5221 }
 0x504   : > { %v5236_v47 = vsel %vm381_vm5, %v5235_v39, %v5222_v42 }
 0x505   : > { %v5237_v50 = vsel %vm383_vm6, %v5236_v47, %v5226_v63 }
 0x507   : > { %v5230_v15 = vpop.permute.xlu0 %5229 }
 0x508   : > { %v5238_v23 = vsel %vm385_vm7, %v5237_v50, %v5230_v15 }
 0x509   : > { %5600 = vmatpush3.msra.mxu1 %v5238_v23 }
 0x50a   : > { %5602 = vmatmul.mubr.msk.f32.vlgmr.msra.gmra.mrb[16].mxu1 %vm3221_vm9, %v5533_v13 }
 0x510   : > { %v5317_v33 = vpop.permute.xlu1 %5316 }
 0x579   : > { %v3291_v1 = vpop.f32.mrb[0].mxu1 }
 0x57a   : > { %v5563_v41 = vpop.f32.mrb[1].mxu1 }
 0x57d   : > { %v3364_v0 = vpop.f32.mrb[2].mxu1 }
 0x57e   : > { %v3365_v29 = vadd.f32 %v3364_v0, %v3291_v1  ;;  %v5568_v6 = vpop.f32.mrb[3].mxu1 }
 0x58d   : > { %v3650_v26 = vpop.f32.mrb[4].mxu1 }
 0x58e   : > { %v3654_v2 = vadd.f32 %v3650_v26, %v3365_v29  ;;  %v5573_v40 = vpop.f32.mrb[5].mxu1 }
 0x595   : > { %v3905_v49 = vpop.f32.mrb[6].mxu1 }
 0x596   : > { %v3909_v58 = vadd.f32 %v3905_v49, %v3654_v2  ;;  %v5578_v11 = vpop.f32.mrb[7].mxu1 }
 0x5a9   : > { %v4192_v17 = vpop.f32.mrb[8].mxu1 }
 0x5aa   : > { %v4196_v20 = vadd.f32 %v4192_v17, %v3909_v58  ;;  %v5583_v56 = vpop.f32.mrb[9].mxu1 }
 0x5b1   : > { %v4479_v38 = vpop.f32.mrb[10].mxu1 }
 0x5b2   : > { %v4483_v24 = vadd.f32 %v4479_v38, %v4196_v20  ;;  %v5588_v43 = vpop.f32.mrb[11].mxu1 }
 0x5c5   : > { %v4734_v7 = vpop.f32.mrb[12].mxu1 }
 0x5c6   : > { %v4738_v18 = vadd.f32 %v4734_v7, %v4483_v24  ;;  %v5593_v61 = vpop.f32.mrb[13].mxu1 }
 0x5cd   : > { %v5021_v62 = vpop.f32.mrb[14].mxu1 }
 0x5ce   : > { %v5025_v27 = vadd.f32 %v5021_v62, %v4738_v18  ;;  %v5598_v30 = vpop.f32.mrb[15].mxu1 }
 0x5dd   : > { %v5308_v12 = vpop.f32.mrb[16].mxu1 }
 0x5de   : > { %v5312_v19 = vadd.f32 %v5308_v12, %v5025_v27  ;;  %v5603_v16 = vpop.f32.mrb[17].mxu1 }
 0x5e0   : > { %v5319_v36 = vadd.f32 %v5317_v33, %v5312_v19 }
 0x5e2   : > { %v5535_v14 = vmul.f32 -1.442695, %v5319_v36 }
 0x5e4   : > { %5730 = vpow2.f32 %v5535_v14 }
 0x5ee   : > { %v5731_v37 = vpop.eup %5730 }
 0x5ef   : > { %v5323_v53 = vadd.f32 1.0, %v5731_v37 }
 0x5f1   : > { %5732 = vrcp.f32 %v5323_v53 }
 0x5fb   : > { %v5733_v22 = vpop.eup %5732 }
 0x5fc   : > { %5326 = vst [vmem:[%s231_s26] sm:$0xff] %v5733_v22 }
 0x5fd   : > { %5747 = shalt.err (!%p5744_p9)
}
 0x5fe   : > { %s5748_s17 = scalar_lea.hbm %s7579_s13, 128  ;;  %s5752_s8 = scalar_lea.hbm %s7641_s5, 512 }
 0x5ff   : > { %p5749_p10 = scmp.ne.s32.totalorder %s7579_s13, %s5748_s17  ;;  %p5753_p13 = scmp.lt.u32.totalorder %s7579_s13, %s7641_s5 }
 0x600   : > { %p5754_p0 = scmp.lt.u32.totalorder %s5752_s8, %s5748_s17  ;;  %p5756_p2 = scmp.lt.u32.totalorder %s5748_s17, %s7579_s13 }
 0x601   : > { %p5750_p11 = pnand %p5749_p10, %p5929_p3 }
 0x602   : > { %p5755_p1 = por %p5754_p0, %p5753_p13 }
 0x603   : > { %p5751_p12 = pneg %p5750_p11 }
 0x604   : > { %p5757_p4 = por %p5756_p2, %p5755_p1 }
 0x606   : > { %p5758_p5 = pnand %p5757_p4, %p5751_p12 }
 0x608   : > { %5761 = shalt.err (!%p5758_p5)
}
 0x609   : > { %5621 = dma.vmem_to_hbm [thread:$0]  (%p5929_p3), %s7581_s9, 128, %s7579_s13, %s5328_s15  }
 0x60a PF: > { %p5627_p6 = scmp.ge.s32.totalorder %s5828_s25, 2  ;;  %s5355_s14 = sand.u32 1, %s5800_s18  }
 0x60b   : > { %s5356_s22 = scalar_lea.sflag [#allocation4], %s5355_s14 }
 0x60c   : > { %p5624_p7 = pnand %p5627_p6, %p5938_p8 }
 0x60e   : > { %5795 = dma.done.wait (!%p5624_p7), %s5356_s22, 128  }
 0x60f   : > { %5797 = vsyncadd (!%p5624_p7), %s5356_s22, 4294967168  ;;  %s18_s25 = sadd.s32 1, %s5828_s25   ;;  %s7658_s18 = smov %s5804_s19 }
 0x610   : > { %p15_p9 = scmp.ge.s32.totalorder %s18_s25, 6   ;;  %s7659_s19 = smov %s5808_s20 }
 0x611   : > { %s7660_s20 = smov %s5947_s11  ;;  %s7661_s21 = smov %s5820_s23 }
 0x612   : > { %s7662_s22 = smov %s5824_s24  ;;  %s7663_s23 = smov %s7666_s28 }
 0x613   : > { %s7664_s24 = smov %s7670_s29  ;;  %17 = sbr.rel (!%p15_p9) target bundleno = 5 (0x5), region = 102 }
 0x61a   :  { %5361 = vsyncpa [#allocation4], 1 }
 0x61b   :  { %5363 = vsyncpa [#allocation4 + $0x1], 1 }

</bundles_post_ra>
